<compile_context>
chip_gen: v7x
topology: tpu7x:2x2x1
jax: 0.10.0
libtpu: 0.0.40
codegen_flags: <defaults>
</compile_context>

<pallas_src>
import jax
import jax.numpy as jnp
from jax import lax
from jax.experimental import pallas as pl
from jax.experimental.pallas import tpu as pltpu

EPS = 1e-5
LANE = 128
SUBLANE = 8
EXTRA = 8    # zero slack rows so the bottom-row taps never read past the block


def _round_up(x, m):
    return -(-x // m) * m


# ----------------------------- kernel helpers ------------------------------

def _conv3x3_flat(load_rows, row0, w_ref, n_rows, w_pad):
    """3x3 / stride-1 conv as 9 contiguous-window (n_rows, Cin) x (Cin, Cout)
    MXU matmuls over a *flattened*, halo-padded activation (padded width
    `w_pad`, row-major).

    `load_rows(start, n)` loads `n` consecutive flat rows straight off a ref
    (input block / VMEM scratch) -> no per-tap patch copies.  Output row
    r = h*w_pad + w is the conv result at (h, w) for w < W; the last two
    columns per row are junk (row wrap-around) and are masked by the caller.
    Accumulation is f32 and starts from the first tap's product.
    """
    acc = None
    for dh in range(3):
        for dw in range(3):
            win = load_rows(row0 + dh * w_pad + dw, n_rows)
            d = jnp.dot(win, w_ref[dh, dw], preferred_element_type=jnp.float32)
            acc = d if acc is None else acc + d
    return acc


def _welford_update(acc_f32, maskf, images_seen, count, mean_ref, m2_ref):
    """Stream per-channel batch stats across images (Chan/Welford combine).

    `maskf` multiplicatively zeroes the junk (padded-width) columns, `count` is
    the number of valid elements this image contributes, `images_seen` how many
    images are already folded into (mean_ref, m2_ref).  Returns the masked f32
    activation (junk cols = 0) so the caller can reuse it for the output store.
    """
    y = acc_f32 * maskf
    tile_mean = jnp.sum(y, axis=0, keepdims=True) * (1.0 / count)       # (1, Cp)
    centered = (acc_f32 - tile_mean) * maskf
    tile_m2 = jnp.sum(centered * centered, axis=0, keepdims=True)       # (1, Cp)
    n_b = jnp.float32(count)
    n_a = images_seen.astype(jnp.float32) * jnp.float32(count)
    inv_nab = 1.0 / (n_a + n_b)
    delta = tile_mean - mean_ref[...]
    mean_ref[...] = mean_ref[...] + delta * (n_b * inv_nab)
    m2_ref[...] = m2_ref[...] + tile_m2 + delta * delta * (n_a * n_b * inv_nab)
    return y


# --------------------------------- wrapper ----------------------------------

def basic_block(x_nchw, w1_oihw, w2_oihw, g1, b1, g2, b2,
                *, compute_dtype=jnp.float32):
    """BasicBlock forward (stride=1, no downsample). x: (N,C,H,W), weights OIHW.

    compute_dtype controls the matmul-input and inter-pass-activation dtype
    (bf16 recommended on v5e/v6e/v7x); BN / residual / statistics math stays f32.
    """
    N, C, H, W = x_nchw.shape
    P = w1_oihw.shape[0]
    if C != P:
        raise ValueError("identity residual requires inplanes == planes "
                         "(stride=1, downsample=None)")

    cdt = jnp.dtype(compute_dtype)
    Cp = _round_up(C, LANE)            # lane-dense channel count
    Hp, Wp = H + 2, W + 2              # spatially padded extents
    Ly = H * Wp                        # flat rows of a conv output at padded width
    Lx = Hp * Wp + EXTRA               # flat rows of the halo-padded input (+slack)

    # conv2 halo scratch geometry: the interior store starts on a sublane boundary.
    store_off = _round_up(Wp + 1, SUBLANE)   # flat scratch row of padded (1, 1)
    base = store_off - 1 - Wp                # flat scratch row of padded (0, 0)
    scratch_rows = _round_up(base + Hp * Wp + EXTRA, SUBLANE)

    # ---- host-side layout prep (TODO(synk): hoist to network level) --------
    x_nhwc = jnp.transpose(x_nchw, (0, 2, 3, 1))
    x_cp = jnp.pad(x_nhwc, ((0, 0), (0, 0), (0, 0), (0, Cp - C)))
    # conv input: halo pad, flatten to (Hp*Wp, Cp), add slack rows, cast.
    xpad = jnp.pad(x_cp, ((0, 0), (1, 1), (1, 1), (0, 0)))
    xpad = xpad.reshape(N, Hp * Wp, Cp)
    xpad = jnp.pad(xpad, ((0, 0), (0, EXTRA), (0, 0))).astype(compute_dtype)
    # identity for pass 3: same flat padded-width layout as y2, kept f32 so the
    # residual add matches PyTorch exactly even on the bf16 path.
    x_id = jnp.pad(x_cp, ((0, 0), (0, 0), (0, 2), (0, 0)))
    x_id = x_id.reshape(N, Ly, Cp).astype(jnp.float32)
    # validity mask for the padded-width junk columns (shared by passes 1-2).
    col_mask = ((jnp.arange(Ly) % Wp) < W).astype(jnp.float32).reshape(Ly, 1)

    def prep_w(w_oihw):
        w = jnp.transpose(w_oihw, (2, 3, 1, 0))              # OIHW -> HWIO
        w = jnp.pad(w, ((0, 0), (0, 0),
                        (0, Cp - w.shape[2]), (0, Cp - w.shape[3])))
        return w.astype(compute_dtype)

    w1p, w2p = prep_w(w1_oihw), prep_w(w2_oihw)

    def prep_vec(v):
        return jnp.pad(v.astype(jnp.float32), (0, Cp - v.shape[0])).reshape(1, Cp)

    g1p, b1p, g2p, b2p = map(prep_vec, (g1, b1, g2, b2))

    # ---- batch tile: enough rows per step to amortize overhead, VMEM-capped --
    bt_rows = max(1, -(-1024 // max(1, H * W)))
    per_image_bytes = (Lx + 3 * Ly) * Cp * max(cdt.itemsize, 4)
    bt_vmem = max(1, (8 * 1024 * 1024) // per_image_bytes)
    Bt = 1
    for cand in range(min(N, bt_rows, bt_vmem), 0, -1):
        if N % cand == 0:
            Bt = cand
            break
    T = N // Bt

    # --------------------------------- kernels -------------------------------

    def pass1_kernel(x_ref, w_ref, mask_ref, y_ref, mean_ref, m2_ref):
        """Pass 1: raw conv1 + streaming BN1 statistics."""
        step = pl.program_id(0)

        @pl.when(step == 0)
        def _init():
            mean_ref[...] = jnp.zeros_like(mean_ref)
            m2_ref[...] = jnp.zeros_like(m2_ref)

        maskf = mask_ref[...]
        for b in range(Bt):
            acc = _conv3x3_flat(
                lambda s, m, b=b: x_ref[b, s:s + m, :], 0, w_ref, Ly, Wp)
            y = _welford_update(acc, maskf, step * Bt + b, H * W,
                                mean_ref, m2_ref)
            y_ref[b, :, :] = y.astype(y_ref.dtype)

    def pass2_kernel(y1_ref, s_ref, o_ref, w_ref, mask_ref,
                     y2_ref, mean_ref, m2_ref, pad_ref):
        """Pass 2: bn1 (folded scale/offset) + relu + conv2 + streaming BN2 stats."""
        step = pl.program_id(0)

        @pl.when(step == 0)
        def _init():
            pad_ref[...] = jnp.zeros_like(pad_ref)   # zero halo border once
            mean_ref[...] = jnp.zeros_like(mean_ref)
            m2_ref[...] = jnp.zeros_like(m2_ref)

        maskf = mask_ref[...]
        scale = s_ref[...]
        offset = o_ref[...]
        for b in range(Bt):
            a = jnp.maximum(
                y1_ref[b, :, :].astype(jnp.float32) * scale + offset, 0.0)
            a = a * maskf                              # keep the halo columns zero
            # aligned, full-lane interior store into the persistent halo scratch
            pad_ref[store_off:store_off + Ly, :] = a.astype(pad_ref.dtype)
            acc = _conv3x3_flat(
                lambda s, m: pad_ref[s:s + m, :], base, w_ref, Ly, Wp)
            y = _welford_update(acc, maskf, step * Bt + b, H * W,
                                mean_ref, m2_ref)
            y2_ref[b, :, :] = y.astype(y2_ref.dtype)

    def pass3_kernel(y2_ref, s_ref, o_ref, xid_ref, out_ref):
        """Pass 3: bn2 (folded scale/offset) + identity residual + relu."""
        scale = s_ref[...]
        offset = o_ref[...]
        for b in range(Bt):
            y = y2_ref[b, :, :].astype(jnp.float32)
            out = jnp.maximum(y * scale + offset + xid_ref[b, :, :], 0.0)
            out_ref[b, :, :] = out.astype(out_ref.dtype)

    # ------------------------------ specs / calls ----------------------------

    x_spec = pl.BlockSpec((Bt, Lx, Cp), lambda t: (t, 0, 0))
    act_spec = pl.BlockSpec((Bt, Ly, Cp), lambda t: (t, 0, 0))
    w_spec = pl.BlockSpec((3, 3, Cp, Cp), lambda t: (0, 0, 0, 0))
    vec_spec = pl.BlockSpec((1, Cp), lambda t: (0, 0))
    mask_spec = pl.BlockSpec((Ly, 1), lambda t: (0, 0))

    act_shape = jax.ShapeDtypeStruct((N, Ly, Cp), compute_dtype)
    vec_shape = jax.ShapeDtypeStruct((1, Cp), jnp.float32)
    out_shape = jax.ShapeDtypeStruct((N, Ly, Cp), jnp.float32)

    # VMEM limit derived from the actual block footprint (double-buffered
    # in/out blocks + weights + halo scratch), with headroom.
    csz = cdt.itemsize
    est = max(
        2 * Bt * (Lx + Ly) * Cp * csz,                              # pass 1
        2 * Bt * 2 * Ly * Cp * csz + scratch_rows * Cp * csz,       # pass 2
        2 * Bt * Ly * Cp * (csz + 2 * 4),                           # pass 3
    ) + 2 * 9 * Cp * Cp * csz + 16 * Cp * 4 + 2 * Ly * 4
    vmem_limit = int(max(16 * 1024 * 1024, 2 * est))

    def cparams(sem):
        return pltpu.CompilerParams(dimension_semantics=(sem,),
                                    vmem_limit_bytes=vmem_limit)

    # Pass 1: conv1 + streaming BN1 statistics (serial grid: stats accumulators).
    y1, mean1, m2_1 = pl.pallas_call(
        pass1_kernel,
        grid=(T,),
        in_specs=[x_spec, w_spec, mask_spec],
        out_specs=[act_spec, vec_spec, vec_spec],
        out_shape=[act_shape, vec_shape, vec_shape],
        compiler_params=cparams("arbitrary"),
    )(xpad, w1p, col_mask)

    inv_count = 1.0 / float(N * H * W)
    s1 = g1p * lax.rsqrt(m2_1 * inv_count + EPS)      # fused BN1 scale
    t1 = b1p - mean1 * s1                             # fused BN1 offset

    # Pass 2: bn1 + relu + conv2 + streaming BN2 statistics.
    y2, mean2, m2_2 = pl.pallas_call(
        pass2_kernel,
        grid=(T,),
        in_specs=[act_spec, vec_spec, vec_spec, w_spec, mask_spec],
        out_specs=[act_spec, vec_spec, vec_spec],
        out_shape=[act_shape, vec_shape, vec_shape],
        scratch_shapes=[pltpu.VMEM((scratch_rows, Cp), compute_dtype)],
        compiler_params=cparams("arbitrary"),
    )(y1, s1, t1, w2p, col_mask)

    s2 = g2p * lax.rsqrt(m2_2 * inv_count + EPS)
    t2 = b2p - mean2 * s2

    # Pass 3: bn2 + identity residual + relu (independent steps -> parallel).
    out_flat = pl.pallas_call(
        pass3_kernel,
        grid=(T,),
        in_specs=[act_spec, vec_spec, vec_spec, act_spec],
        out_specs=act_spec,
        out_shape=out_shape,
        compiler_params=cparams("parallel"),
    )(y2, s2, t2, x_id)

    # Drop padded-width junk columns and channel padding, back to NCHW.
    out_nhwc = out_flat.reshape(N, H, Wp, Cp)[:, :, :W, :C]
    return jnp.transpose(out_nhwc, (0, 3, 1, 2))


# -------------------------------- reference ---------------------------------

def basic_block_reference(x, w1, w2, g1, b1, g2, b2):
    """Pure-JAX reference (NCHW), mirrors the PyTorch module in training mode."""
    def conv(x, w):
        return lax.conv_general_dilated(
            x, w, window_strides=(1, 1), padding=((1, 1), (1, 1)),
            dimension_numbers=('NCHW', 'OIHW', 'NCHW'))

    def bn(x, g, b):
        mean = jnp.mean(x, axis=(0, 2, 3), keepdims=True)
        var = jnp.mean((x - mean) ** 2, axis=(0, 2, 3), keepdims=True)
        return ((x - mean) * lax.rsqrt(var + EPS)
                * g.reshape(1, -1, 1, 1) + b.reshape(1, -1, 1, 1))

    out = jnp.maximum(bn(conv(x, w1), g1, b1), 0.0)
    out = bn(conv(out, w2), g2, b2)
    return jnp.maximum(out + x, 0.0)


if __name__ == "__main__":
    # Small shapes: inplanes = planes = 8 (stride=1, downsample=None -> C == P)
    N, C, H, W = 2, 8, 16, 16
    P = C

    key = jax.random.PRNGKey(0)
    kx, kw1, kw2, kg1, kb1, kg2, kb2 = jax.random.split(key, 7)

    x = jax.random.normal(kx, (N, C, H, W), dtype=jnp.float32)
    w1 = jax.random.normal(kw1, (P, C, 3, 3), dtype=jnp.float32) * 0.1
    w2 = jax.random.normal(kw2, (P, P, 3, 3), dtype=jnp.float32) * 0.1
    g1 = 1.0 + 0.1 * jax.random.normal(kg1, (P,), dtype=jnp.float32)
    b1 = 0.1 * jax.random.normal(kb1, (P,), dtype=jnp.float32)
    g2 = 1.0 + 0.1 * jax.random.normal(kg2, (P,), dtype=jnp.float32)
    b2 = 0.1 * jax.random.normal(kb2, (P,), dtype=jnp.float32)

    ref = jax.block_until_ready(basic_block_reference(x, w1, w2, g1, b1, g2, b2))

    # f32 path: tight tolerance vs the pure-JAX reference.
    out = jax.block_until_ready(basic_block(x, w1, w2, g1, b1, g2, b2))
    assert out.shape == (N, C, H, W)
    assert jnp.allclose(out, ref, rtol=2e-3, atol=2e-3), "f32 kernel mismatch vs reference"

    # bf16 matmul / bf16-activation path (MXU fast path): loose tolerance check.
    out_bf16 = jax.block_until_ready(
        basic_block(x, w1, w2, g1, b1, g2, b2, compute_dtype=jnp.bfloat16))
    assert out_bf16.shape == (N, C, H, W)
    assert bool(jnp.all(jnp.isfinite(out_bf16)))
    assert jnp.allclose(out_bf16, ref, rtol=1e-1, atol=1e-1), "bf16 kernel diverged from reference"

    print("KERNEL_OK")
</pallas_src>

<mosaic_0001>
module attributes {stable_mosaic.version = 11 : i64} {
  func.func @pass1_kernel(%arg0: i32, %arg1: memref<2x332x128xf32, #tpu.memory_space<vmem>>, %arg2: memref<3x3x128x128xf32, #tpu.memory_space<vmem>>, %arg3: memref<288x1xf32, #tpu.memory_space<vmem>>, %arg4: memref<2x288x128xf32, #tpu.memory_space<vmem>>, %arg5: memref<1x128xf32, #tpu.memory_space<vmem>>, %arg6: memref<1x128xf32, #tpu.memory_space<vmem>>) attributes {dimension_semantics = [#tpu.dimension_semantics<arbitrary>], iteration_bounds = array<i64: 1>, scalar_prefetch = 0 : i64, scratch_operands = 0 : i64, tpu.core_type = #tpu.core_type<tc>, window_params = [{transform_indices = @transform_0, window_bounds = array<i64: 2, 332, 128>}, {pipeline_mode = #tpu.pipeline_mode<synchronous>, transform_indices = @transform_1, window_bounds = array<i64: 3, 3, 128, 128>}, {pipeline_mode = #tpu.pipeline_mode<synchronous>, transform_indices = @transform_2, window_bounds = array<i64: 288, 1>}, {transform_indices = @transform_3, window_bounds = array<i64: 2, 288, 128>}, {pipeline_mode = #tpu.pipeline_mode<synchronous>, transform_indices = @transform_4, window_bounds = array<i64: 1, 128>}, {pipeline_mode = #tpu.pipeline_mode<synchronous>, transform_indices = @transform_5, window_bounds = array<i64: 1, 128>}]} {
    %c0_i32 = arith.constant 0 : i32
    %0 = arith.cmpi eq, %arg0, %c0_i32 : i32
    %1 = arith.extui %0 : i1 to i32
    %c0_i32_0 = arith.constant 0 : i32
    %2 = arith.cmpi ne, %1, %c0_i32_0 : i32
    scf.if %2 {
      %cst_181 = arith.constant 0.000000e+00 : f32
      %188 = vector.broadcast %cst_181 : f32 to vector<1x128xf32>
      %c0_182 = arith.constant 0 : index
      %c0_183 = arith.constant 0 : index
      %189 = vector.load %arg5[%c0_182, %c0_183] : memref<1x128xf32, #tpu.memory_space<vmem>>, vector<1x128xf32>
      tpu.vector_store %arg5[%c0_182, %c0_183], %188 {strides = array<i32>} : memref<1x128xf32, #tpu.memory_space<vmem>>, vector<1x128xf32>,
      %cst_184 = arith.constant 0.000000e+00 : f32
      %190 = vector.broadcast %cst_184 : f32 to vector<1x128xf32>
      %c0_185 = arith.constant 0 : index
      %c0_186 = arith.constant 0 : index
      %191 = vector.load %arg6[%c0_185, %c0_186] : memref<1x128xf32, #tpu.memory_space<vmem>>, vector<1x128xf32>
      tpu.vector_store %arg6[%c0_185, %c0_186], %190 {strides = array<i32>} : memref<1x128xf32, #tpu.memory_space<vmem>>, vector<1x128xf32>,
    } else {
    }
    %c0 = arith.constant 0 : index
    %c0_1 = arith.constant 0 : index
    %3 = vector.load %arg3[%c0, %c0_1] : memref<288x1xf32, #tpu.memory_space<vmem>>, vector<288x1xf32>
    %c0_2 = arith.constant 0 : index
    %c0_3 = arith.constant 0 : index
    %c0_4 = arith.constant 0 : index
    %4 = vector.load %arg1[%c0_2, %c0_3, %c0_4] : memref<2x332x128xf32, #tpu.memory_space<vmem>>, vector<1x288x128xf32>
    %5 = vector.shape_cast %4 : vector<1x288x128xf32> to vector<288x128xf32>
    %c0_5 = arith.constant 0 : index
    %c0_6 = arith.constant 0 : index
    %c0_7 = arith.constant 0 : index
    %c0_8 = arith.constant 0 : index
    %6 = vector.load %arg2[%c0_5, %c0_6, %c0_7, %c0_8] : memref<3x3x128x128xf32, #tpu.memory_space<vmem>>, vector<1x1x128x128xf32>
    %7 = vector.shape_cast %6 : vector<1x1x128x128xf32> to vector<128x128xf32>
    %cst = arith.constant dense<0.000000e+00> : vector<288x128xf32>
    %8 = tpu.matmul %5, %7, %cst {dimension_numbers = #tpu.dot_dimension_numbers<[1], [0], [0], [1], [0, 0, 1, 1], [], []>} : vector<288x128xf32>, vector<128x128xf32>, vector<288x128xf32> -> vector<288x128xf32>
    %c0_9 = arith.constant 0 : index
    %c1 = arith.constant 1 : index
    %c0_10 = arith.constant 0 : index
    %9 = vector.load %arg1[%c0_9, %c1, %c0_10] : memref<2x332x128xf32, #tpu.memory_space<vmem>>, vector<1x288x128xf32>
    %10 = vector.shape_cast %9 : vector<1x288x128xf32> to vector<288x128xf32>
    %c0_11 = arith.constant 0 : index
    %c1_12 = arith.constant 1 : index
    %c0_13 = arith.constant 0 : index
    %c0_14 = arith.constant 0 : index
    %11 = vector.load %arg2[%c0_11, %c1_12, %c0_13, %c0_14] : memref<3x3x128x128xf32, #tpu.memory_space<vmem>>, vector<1x1x128x128xf32>
    %12 = vector.shape_cast %11 : vector<1x1x128x128xf32> to vector<128x128xf32>
    %cst_15 = arith.constant dense<0.000000e+00> : vector<288x128xf32>
    %13 = tpu.matmul %10, %12, %cst_15 {dimension_numbers = #tpu.dot_dimension_numbers<[1], [0], [0], [1], [0, 0, 1, 1], [], []>} : vector<288x128xf32>, vector<128x128xf32>, vector<288x128xf32> -> vector<288x128xf32>
    %14 = arith.addf %8, %13 : vector<288x128xf32>
    %c0_16 = arith.constant 0 : index
    %c2 = arith.constant 2 : index
    %c0_17 = arith.constant 0 : index
    %15 = vector.load %arg1[%c0_16, %c2, %c0_17] : memref<2x332x128xf32, #tpu.memory_space<vmem>>, vector<1x288x128xf32>
    %16 = vector.shape_cast %15 : vector<1x288x128xf32> to vector<288x128xf32>
    %c0_18 = arith.constant 0 : index
    %c2_19 = arith.constant 2 : index
    %c0_20 = arith.constant 0 : index
    %c0_21 = arith.constant 0 : index
    %17 = vector.load %arg2[%c0_18, %c2_19, %c0_20, %c0_21] : memref<3x3x128x128xf32, #tpu.memory_space<vmem>>, vector<1x1x128x128xf32>
    %18 = vector.shape_cast %17 : vector<1x1x128x128xf32> to vector<128x128xf32>
    %cst_22 = arith.constant dense<0.000000e+00> : vector<288x128xf32>
    %19 = tpu.matmul %16, %18, %cst_22 {dimension_numbers = #tpu.dot_dimension_numbers<[1], [0], [0], [1], [0, 0, 1, 1], [], []>} : vector<288x128xf32>, vector<128x128xf32>, vector<288x128xf32> -> vector<288x128xf32>
    %20 = arith.addf %14, %19 : vector<288x128xf32>
    %c0_23 = arith.constant 0 : index
    %c18 = arith.constant 18 : index
    %c0_24 = arith.constant 0 : index
    %21 = vector.load %arg1[%c0_23, %c18, %c0_24] : memref<2x332x128xf32, #tpu.memory_space<vmem>>, vector<1x288x128xf32>
    %22 = vector.shape_cast %21 : vector<1x288x128xf32> to vector<288x128xf32>
    %c1_25 = arith.constant 1 : index
    %c0_26 = arith.constant 0 : index
    %c0_27 = arith.constant 0 : index
    %c0_28 = arith.constant 0 : index
    %23 = vector.load %arg2[%c1_25, %c0_26, %c0_27, %c0_28] : memref<3x3x128x128xf32, #tpu.memory_space<vmem>>, vector<1x1x128x128xf32>
    %24 = vector.shape_cast %23 : vector<1x1x128x128xf32> to vector<128x128xf32>
    %cst_29 = arith.constant dense<0.000000e+00> : vector<288x128xf32>
    %25 = tpu.matmul %22, %24, %cst_29 {dimension_numbers = #tpu.dot_dimension_numbers<[1], [0], [0], [1], [0, 0, 1, 1], [], []>} : vector<288x128xf32>, vector<128x128xf32>, vector<288x128xf32> -> vector<288x128xf32>
    %26 = arith.addf %20, %25 : vector<288x128xf32>
    %c0_30 = arith.constant 0 : index
    %c19 = arith.constant 19 : index
    %c0_31 = arith.constant 0 : index
    %27 = vector.load %arg1[%c0_30, %c19, %c0_31] : memref<2x332x128xf32, #tpu.memory_space<vmem>>, vector<1x288x128xf32>
    %28 = vector.shape_cast %27 : vector<1x288x128xf32> to vector<288x128xf32>
    %c1_32 = arith.constant 1 : index
    %c1_33 = arith.constant 1 : index
    %c0_34 = arith.constant 0 : index
    %c0_35 = arith.constant 0 : index
    %29 = vector.load %arg2[%c1_32, %c1_33, %c0_34, %c0_35] : memref<3x3x128x128xf32, #tpu.memory_space<vmem>>, vector<1x1x128x128xf32>
    %30 = vector.shape_cast %29 : vector<1x1x128x128xf32> to vector<128x128xf32>
    %cst_36 = arith.constant dense<0.000000e+00> : vector<288x128xf32>
    %31 = tpu.matmul %28, %30, %cst_36 {dimension_numbers = #tpu.dot_dimension_numbers<[1], [0], [0], [1], [0, 0, 1, 1], [], []>} : vector<288x128xf32>, vector<128x128xf32>, vector<288x128xf32> -> vector<288x128xf32>
    %32 = arith.addf %26, %31 : vector<288x128xf32>
    %c0_37 = arith.constant 0 : index
    %c20 = arith.constant 20 : index
    %c0_38 = arith.constant 0 : index
    %33 = vector.load %arg1[%c0_37, %c20, %c0_38] : memref<2x332x128xf32, #tpu.memory_space<vmem>>, vector<1x288x128xf32>
    %34 = vector.shape_cast %33 : vector<1x288x128xf32> to vector<288x128xf32>
    %c1_39 = arith.constant 1 : index
    %c2_40 = arith.constant 2 : index
    %c0_41 = arith.constant 0 : index
    %c0_42 = arith.constant 0 : index
    %35 = vector.load %arg2[%c1_39, %c2_40, %c0_41, %c0_42] : memref<3x3x128x128xf32, #tpu.memory_space<vmem>>, vector<1x1x128x128xf32>
    %36 = vector.shape_cast %35 : vector<1x1x128x128xf32> to vector<128x128xf32>
    %cst_43 = arith.constant dense<0.000000e+00> : vector<288x128xf32>
    %37 = tpu.matmul %34, %36, %cst_43 {dimension_numbers = #tpu.dot_dimension_numbers<[1], [0], [0], [1], [0, 0, 1, 1], [], []>} : vector<288x128xf32>, vector<128x128xf32>, vector<288x128xf32> -> vector<288x128xf32>
    %38 = arith.addf %32, %37 : vector<288x128xf32>
    %c0_44 = arith.constant 0 : index
    %c36 = arith.constant 36 : index
    %c0_45 = arith.constant 0 : index
    %39 = vector.load %arg1[%c0_44, %c36, %c0_45] : memref<2x332x128xf32, #tpu.memory_space<vmem>>, vector<1x288x128xf32>
    %40 = vector.shape_cast %39 : vector<1x288x128xf32> to vector<288x128xf32>
    %c2_46 = arith.constant 2 : index
    %c0_47 = arith.constant 0 : index
    %c0_48 = arith.constant 0 : index
    %c0_49 = arith.constant 0 : index
    %41 = vector.load %arg2[%c2_46, %c0_47, %c0_48, %c0_49] : memref<3x3x128x128xf32, #tpu.memory_space<vmem>>, vector<1x1x128x128xf32>
    %42 = vector.shape_cast %41 : vector<1x1x128x128xf32> to vector<128x128xf32>
    %cst_50 = arith.constant dense<0.000000e+00> : vector<288x128xf32>
    %43 = tpu.matmul %40, %42, %cst_50 {dimension_numbers = #tpu.dot_dimension_numbers<[1], [0], [0], [1], [0, 0, 1, 1], [], []>} : vector<288x128xf32>, vector<128x128xf32>, vector<288x128xf32> -> vector<288x128xf32>
    %44 = arith.addf %38, %43 : vector<288x128xf32>
    %c0_51 = arith.constant 0 : index
    %c37 = arith.constant 37 : index
    %c0_52 = arith.constant 0 : index
    %45 = vector.load %arg1[%c0_51, %c37, %c0_52] : memref<2x332x128xf32, #tpu.memory_space<vmem>>, vector<1x288x128xf32>
    %46 = vector.shape_cast %45 : vector<1x288x128xf32> to vector<288x128xf32>
    %c2_53 = arith.constant 2 : index
    %c1_54 = arith.constant 1 : index
    %c0_55 = arith.constant 0 : index
    %c0_56 = arith.constant 0 : index
    %47 = vector.load %arg2[%c2_53, %c1_54, %c0_55, %c0_56] : memref<3x3x128x128xf32, #tpu.memory_space<vmem>>, vector<1x1x128x128xf32>
    %48 = vector.shape_cast %47 : vector<1x1x128x128xf32> to vector<128x128xf32>
    %cst_57 = arith.constant dense<0.000000e+00> : vector<288x128xf32>
    %49 = tpu.matmul %46, %48, %cst_57 {dimension_numbers = #tpu.dot_dimension_numbers<[1], [0], [0], [1], [0, 0, 1, 1], [], []>} : vector<288x128xf32>, vector<128x128xf32>, vector<288x128xf32> -> vector<288x128xf32>
    %50 = arith.addf %44, %49 : vector<288x128xf32>
    %c0_58 = arith.constant 0 : index
    %c38 = arith.constant 38 : index
    %c0_59 = arith.constant 0 : index
    %51 = vector.load %arg1[%c0_58, %c38, %c0_59] : memref<2x332x128xf32, #tpu.memory_space<vmem>>, vector<1x288x128xf32>
    %52 = vector.shape_cast %51 : vector<1x288x128xf32> to vector<288x128xf32>
    %c2_60 = arith.constant 2 : index
    %c2_61 = arith.constant 2 : index
    %c0_62 = arith.constant 0 : index
    %c0_63 = arith.constant 0 : index
    %53 = vector.load %arg2[%c2_60, %c2_61, %c0_62, %c0_63] : memref<3x3x128x128xf32, #tpu.memory_space<vmem>>, vector<1x1x128x128xf32>
    %54 = vector.shape_cast %53 : vector<1x1x128x128xf32> to vector<128x128xf32>
    %cst_64 = arith.constant dense<0.000000e+00> : vector<288x128xf32>
    %55 = tpu.matmul %52, %54, %cst_64 {dimension_numbers = #tpu.dot_dimension_numbers<[1], [0], [0], [1], [0, 0, 1, 1], [], []>} : vector<288x128xf32>, vector<128x128xf32>, vector<288x128xf32> -> vector<288x128xf32>
    %56 = arith.addf %50, %55 : vector<288x128xf32>
    %c2_i32 = arith.constant 2 : i32
    %57 = arith.muli %arg0, %c2_i32 : i32
    %c0_i32_65 = arith.constant 0 : i32
    %58 = arith.addi %57, %c0_i32_65 : i32
    %59 = vector.broadcast %3 : vector<288x1xf32> to vector<288x128xf32>
    %60 = arith.mulf %56, %59 : vector<288x128xf32>
    %cst_66 = arith.constant dense<0.000000e+00> : vector<128xf32>
    %61 = vector.multi_reduction <add>, %60, %cst_66 [0] : vector<288x128xf32> to vector<128xf32>
    %62 = vector.shape_cast %61 : vector<128xf32> to vector<1x128xf32>
    %cst_67 = arith.constant 3.906250e-03 : f32
    %63 = vector.broadcast %cst_67 : f32 to vector<1x128xf32>
    %64 = arith.mulf %62, %63 : vector<1x128xf32>
    %65 = vector.broadcast %64 : vector<1x128xf32> to vector<288x128xf32>
    %66 = arith.subf %56, %65 : vector<288x128xf32>
    %67 = vector.broadcast %3 : vector<288x1xf32> to vector<288x128xf32>
    %68 = arith.mulf %66, %67 : vector<288x128xf32>
    %69 = arith.mulf %68, %68 : vector<288x128xf32>
    %cst_68 = arith.constant dense<0.000000e+00> : vector<128xf32>
    %70 = vector.multi_reduction <add>, %69, %cst_68 [0] : vector<288x128xf32> to vector<128xf32>
    %71 = vector.shape_cast %70 : vector<128xf32> to vector<1x128xf32>
    %72 = arith.sitofp %58 : i32 to f32
    %cst_69 = arith.constant 2.560000e+02 : f32
    %73 = arith.mulf %72, %cst_69 : f32
    %cst_70 = arith.constant 2.560000e+02 : f32
    %74 = arith.addf %73, %cst_70 : f32
    %cst_71 = arith.constant 1.000000e+00 : f32
    %75 = arith.divf %cst_71, %74 : f32
    %c0_72 = arith.constant 0 : index
    %c0_73 = arith.constant 0 : index
    %76 = vector.load %arg5[%c0_72, %c0_73] : memref<1x128xf32, #tpu.memory_space<vmem>>, vector<1x128xf32>
    %77 = arith.subf %64, %76 : vector<1x128xf32>
    %c0_74 = arith.constant 0 : index
    %c0_75 = arith.constant 0 : index
    %78 = vector.load %arg5[%c0_74, %c0_75] : memref<1x128xf32, #tpu.memory_space<vmem>>, vector<1x128xf32>
    %cst_76 = arith.constant 2.560000e+02 : f32
    %79 = arith.mulf %cst_76, %75 : f32
    %80 = vector.broadcast %79 : f32 to vector<1x128xf32>
    %81 = arith.mulf %77, %80 : vector<1x128xf32>
    %82 = arith.addf %78, %81 : vector<1x128xf32>
    %c0_77 = arith.constant 0 : index
    %c0_78 = arith.constant 0 : index
    %83 = vector.load %arg5[%c0_77, %c0_78] : memref<1x128xf32, #tpu.memory_space<vmem>>, vector<1x128xf32>
    tpu.vector_store %arg5[%c0_77, %c0_78], %82 {strides = array<i32>} : memref<1x128xf32, #tpu.memory_space<vmem>>, vector<1x128xf32>,
    %c0_79 = arith.constant 0 : index
    %c0_80 = arith.constant 0 : index
    %84 = vector.load %arg6[%c0_79, %c0_80] : memref<1x128xf32, #tpu.memory_space<vmem>>, vector<1x128xf32>
    %85 = arith.addf %84, %71 : vector<1x128xf32>
    %86 = arith.mulf %77, %77 : vector<1x128xf32>
    %cst_81 = arith.constant 2.560000e+02 : f32
    %87 = arith.mulf %73, %cst_81 : f32
    %88 = arith.mulf %87, %75 : f32
    %89 = vector.broadcast %88 : f32 to vector<1x128xf32>
    %90 = arith.mulf %86, %89 : vector<1x128xf32>
    %91 = arith.addf %85, %90 : vector<1x128xf32>
    %c0_82 = arith.constant 0 : index
    %c0_83 = arith.constant 0 : index
    %92 = vector.load %arg6[%c0_82, %c0_83] : memref<1x128xf32, #tpu.memory_space<vmem>>, vector<1x128xf32>
    tpu.vector_store %arg6[%c0_82, %c0_83], %91 {strides = array<i32>} : memref<1x128xf32, #tpu.memory_space<vmem>>, vector<1x128xf32>,
    %c0_84 = arith.constant 0 : index
    %c0_85 = arith.constant 0 : index
    %c0_86 = arith.constant 0 : index
    %93 = vector.load %arg4[%c0_84, %c0_85, %c0_86] : memref<2x288x128xf32, #tpu.memory_space<vmem>>, vector<1x288x128xf32>
    %94 = vector.shape_cast %93 : vector<1x288x128xf32> to vector<288x128xf32>
    %95 = vector.shape_cast %60 : vector<288x128xf32> to vector<1x288x128xf32>
    tpu.vector_store %arg4[%c0_84, %c0_85, %c0_86], %95 {strides = array<i32>} : memref<2x288x128xf32, #tpu.memory_space<vmem>>, vector<1x288x128xf32>,
    %c1_87 = arith.constant 1 : index
    %c0_88 = arith.constant 0 : index
    %c0_89 = arith.constant 0 : index
    %96 = vector.load %arg1[%c1_87, %c0_88, %c0_89] : memref<2x332x128xf32, #tpu.memory_space<vmem>>, vector<1x288x128xf32>
    %97 = vector.shape_cast %96 : vector<1x288x128xf32> to vector<288x128xf32>
    %c0_90 = arith.constant 0 : index
    %c0_91 = arith.constant 0 : index
    %c0_92 = arith.constant 0 : index
    %c0_93 = arith.constant 0 : index
    %98 = vector.load %arg2[%c0_90, %c0_91, %c0_92, %c0_93] : memref<3x3x128x128xf32, #tpu.memory_space<vmem>>, vector<1x1x128x128xf32>
    %99 = vector.shape_cast %98 : vector<1x1x128x128xf32> to vector<128x128xf32>
    %cst_94 = arith.constant dense<0.000000e+00> : vector<288x128xf32>
    %100 = tpu.matmul %97, %99, %cst_94 {dimension_numbers = #tpu.dot_dimension_numbers<[1], [0], [0], [1], [0, 0, 1, 1], [], []>} : vector<288x128xf32>, vector<128x128xf32>, vector<288x128xf32> -> vector<288x128xf32>
    %c1_95 = arith.constant 1 : index
    %c1_96 = arith.constant 1 : index
    %c0_97 = arith.constant 0 : index
    %101 = vector.load %arg1[%c1_95, %c1_96, %c0_97] : memref<2x332x128xf32, #tpu.memory_space<vmem>>, vector<1x288x128xf32>
    %102 = vector.shape_cast %101 : vector<1x288x128xf32> to vector<288x128xf32>
    %c0_98 = arith.constant 0 : index
    %c1_99 = arith.constant 1 : index
    %c0_100 = arith.constant 0 : index
    %c0_101 = arith.constant 0 : index
    %103 = vector.load %arg2[%c0_98, %c1_99, %c0_100, %c0_101] : memref<3x3x128x128xf32, #tpu.memory_space<vmem>>, vector<1x1x128x128xf32>
    %104 = vector.shape_cast %103 : vector<1x1x128x128xf32> to vector<128x128xf32>
    %cst_102 = arith.constant dense<0.000000e+00> : vector<288x128xf32>
    %105 = tpu.matmul %102, %104, %cst_102 {dimension_numbers = #tpu.dot_dimension_numbers<[1], [0], [0], [1], [0, 0, 1, 1], [], []>} : vector<288x128xf32>, vector<128x128xf32>, vector<288x128xf32> -> vector<288x128xf32>
    %106 = arith.addf %100, %105 : vector<288x128xf32>
    %c1_103 = arith.constant 1 : index
    %c2_104 = arith.constant 2 : index
    %c0_105 = arith.constant 0 : index
    %107 = vector.load %arg1[%c1_103, %c2_104, %c0_105] : memref<2x332x128xf32, #tpu.memory_space<vmem>>, vector<1x288x128xf32>
    %108 = vector.shape_cast %107 : vector<1x288x128xf32> to vector<288x128xf32>
    %c0_106 = arith.constant 0 : index
    %c2_107 = arith.constant 2 : index
    %c0_108 = arith.constant 0 : index
    %c0_109 = arith.constant 0 : index
    %109 = vector.load %arg2[%c0_106, %c2_107, %c0_108, %c0_109] : memref<3x3x128x128xf32, #tpu.memory_space<vmem>>, vector<1x1x128x128xf32>
    %110 = vector.shape_cast %109 : vector<1x1x128x128xf32> to vector<128x128xf32>
    %cst_110 = arith.constant dense<0.000000e+00> : vector<288x128xf32>
    %111 = tpu.matmul %108, %110, %cst_110 {dimension_numbers = #tpu.dot_dimension_numbers<[1], [0], [0], [1], [0, 0, 1, 1], [], []>} : vector<288x128xf32>, vector<128x128xf32>, vector<288x128xf32> -> vector<288x128xf32>
    %112 = arith.addf %106, %111 : vector<288x128xf32>
    %c1_111 = arith.constant 1 : index
    %c18_112 = arith.constant 18 : index
    %c0_113 = arith.constant 0 : index
    %113 = vector.load %arg1[%c1_111, %c18_112, %c0_113] : memref<2x332x128xf32, #tpu.memory_space<vmem>>, vector<1x288x128xf32>
    %114 = vector.shape_cast %113 : vector<1x288x128xf32> to vector<288x128xf32>
    %c1_114 = arith.constant 1 : index
    %c0_115 = arith.constant 0 : index
    %c0_116 = arith.constant 0 : index
    %c0_117 = arith.constant 0 : index
    %115 = vector.load %arg2[%c1_114, %c0_115, %c0_116, %c0_117] : memref<3x3x128x128xf32, #tpu.memory_space<vmem>>, vector<1x1x128x128xf32>
    %116 = vector.shape_cast %115 : vector<1x1x128x128xf32> to vector<128x128xf32>
    %cst_118 = arith.constant dense<0.000000e+00> : vector<288x128xf32>
    %117 = tpu.matmul %114, %116, %cst_118 {dimension_numbers = #tpu.dot_dimension_numbers<[1], [0], [0], [1], [0, 0, 1, 1], [], []>} : vector<288x128xf32>, vector<128x128xf32>, vector<288x128xf32> -> vector<288x128xf32>
    %118 = arith.addf %112, %117 : vector<288x128xf32>
    %c1_119 = arith.constant 1 : index
    %c19_120 = arith.constant 19 : index
    %c0_121 = arith.constant 0 : index
    %119 = vector.load %arg1[%c1_119, %c19_120, %c0_121] : memref<2x332x128xf32, #tpu.memory_space<vmem>>, vector<1x288x128xf32>
    %120 = vector.shape_cast %119 : vector<1x288x128xf32> to vector<288x128xf32>
    %c1_122 = arith.constant 1 : index
    %c1_123 = arith.constant 1 : index
    %c0_124 = arith.constant 0 : index
    %c0_125 = arith.constant 0 : index
    %121 = vector.load %arg2[%c1_122, %c1_123, %c0_124, %c0_125] : memref<3x3x128x128xf32, #tpu.memory_space<vmem>>, vector<1x1x128x128xf32>
    %122 = vector.shape_cast %121 : vector<1x1x128x128xf32> to vector<128x128xf32>
    %cst_126 = arith.constant dense<0.000000e+00> : vector<288x128xf32>
    %123 = tpu.matmul %120, %122, %cst_126 {dimension_numbers = #tpu.dot_dimension_numbers<[1], [0], [0], [1], [0, 0, 1, 1], [], []>} : vector<288x128xf32>, vector<128x128xf32>, vector<288x128xf32> -> vector<288x128xf32>
    %124 = arith.addf %118, %123 : vector<288x128xf32>
    %c1_127 = arith.constant 1 : index
    %c20_128 = arith.constant 20 : index
    %c0_129 = arith.constant 0 : index
    %125 = vector.load %arg1[%c1_127, %c20_128, %c0_129] : memref<2x332x128xf32, #tpu.memory_space<vmem>>, vector<1x288x128xf32>
    %126 = vector.shape_cast %125 : vector<1x288x128xf32> to vector<288x128xf32>
    %c1_130 = arith.constant 1 : index
    %c2_131 = arith.constant 2 : index
    %c0_132 = arith.constant 0 : index
    %c0_133 = arith.constant 0 : index
    %127 = vector.load %arg2[%c1_130, %c2_131, %c0_132, %c0_133] : memref<3x3x128x128xf32, #tpu.memory_space<vmem>>, vector<1x1x128x128xf32>
    %128 = vector.shape_cast %127 : vector<1x1x128x128xf32> to vector<128x128xf32>
    %cst_134 = arith.constant dense<0.000000e+00> : vector<288x128xf32>
    %129 = tpu.matmul %126, %128, %cst_134 {dimension_numbers = #tpu.dot_dimension_numbers<[1], [0], [0], [1], [0, 0, 1, 1], [], []>} : vector<288x128xf32>, vector<128x128xf32>, vector<288x128xf32> -> vector<288x128xf32>
    %130 = arith.addf %124, %129 : vector<288x128xf32>
    %c1_135 = arith.constant 1 : index
    %c36_136 = arith.constant 36 : index
    %c0_137 = arith.constant 0 : index
    %131 = vector.load %arg1[%c1_135, %c36_136, %c0_137] : memref<2x332x128xf32, #tpu.memory_space<vmem>>, vector<1x288x128xf32>
    %132 = vector.shape_cast %131 : vector<1x288x128xf32> to vector<288x128xf32>
    %c2_138 = arith.constant 2 : index
    %c0_139 = arith.constant 0 : index
    %c0_140 = arith.constant 0 : index
    %c0_141 = arith.constant 0 : index
    %133 = vector.load %arg2[%c2_138, %c0_139, %c0_140, %c0_141] : memref<3x3x128x128xf32, #tpu.memory_space<vmem>>, vector<1x1x128x128xf32>
    %134 = vector.shape_cast %133 : vector<1x1x128x128xf32> to vector<128x128xf32>
    %cst_142 = arith.constant dense<0.000000e+00> : vector<288x128xf32>
    %135 = tpu.matmul %132, %134, %cst_142 {dimension_numbers = #tpu.dot_dimension_numbers<[1], [0], [0], [1], [0, 0, 1, 1], [], []>} : vector<288x128xf32>, vector<128x128xf32>, vector<288x128xf32> -> vector<288x128xf32>
    %136 = arith.addf %130, %135 : vector<288x128xf32>
    %c1_143 = arith.constant 1 : index
    %c37_144 = arith.constant 37 : index
    %c0_145 = arith.constant 0 : index
    %137 = vector.load %arg1[%c1_143, %c37_144, %c0_145] : memref<2x332x128xf32, #tpu.memory_space<vmem>>, vector<1x288x128xf32>
    %138 = vector.shape_cast %137 : vector<1x288x128xf32> to vector<288x128xf32>
    %c2_146 = arith.constant 2 : index
    %c1_147 = arith.constant 1 : index
    %c0_148 = arith.constant 0 : index
    %c0_149 = arith.constant 0 : index
    %139 = vector.load %arg2[%c2_146, %c1_147, %c0_148, %c0_149] : memref<3x3x128x128xf32, #tpu.memory_space<vmem>>, vector<1x1x128x128xf32>
    %140 = vector.shape_cast %139 : vector<1x1x128x128xf32> to vector<128x128xf32>
    %cst_150 = arith.constant dense<0.000000e+00> : vector<288x128xf32>
    %141 = tpu.matmul %138, %140, %cst_150 {dimension_numbers = #tpu.dot_dimension_numbers<[1], [0], [0], [1], [0, 0, 1, 1], [], []>} : vector<288x128xf32>, vector<128x128xf32>, vector<288x128xf32> -> vector<288x128xf32>
    %142 = arith.addf %136, %141 : vector<288x128xf32>
    %c1_151 = arith.constant 1 : index
    %c38_152 = arith.constant 38 : index
    %c0_153 = arith.constant 0 : index
    %143 = vector.load %arg1[%c1_151, %c38_152, %c0_153] : memref<2x332x128xf32, #tpu.memory_space<vmem>>, vector<1x288x128xf32>
    %144 = vector.shape_cast %143 : vector<1x288x128xf32> to vector<288x128xf32>
    %c2_154 = arith.constant 2 : index
    %c2_155 = arith.constant 2 : index
    %c0_156 = arith.constant 0 : index
    %c0_157 = arith.constant 0 : index
    %145 = vector.load %arg2[%c2_154, %c2_155, %c0_156, %c0_157] : memref<3x3x128x128xf32, #tpu.memory_space<vmem>>, vector<1x1x128x128xf32>
    %146 = vector.shape_cast %145 : vector<1x1x128x128xf32> to vector<128x128xf32>
    %cst_158 = arith.constant dense<0.000000e+00> : vector<288x128xf32>
    %147 = tpu.matmul %144, %146, %cst_158 {dimension_numbers = #tpu.dot_dimension_numbers<[1], [0], [0], [1], [0, 0, 1, 1], [], []>} : vector<288x128xf32>, vector<128x128xf32>, vector<288x128xf32> -> vector<288x128xf32>
    %148 = arith.addf %142, %147 : vector<288x128xf32>
    %c2_i32_159 = arith.constant 2 : i32
    %149 = arith.muli %arg0, %c2_i32_159 : i32
    %c1_i32 = arith.constant 1 : i32
    %150 = arith.addi %149, %c1_i32 : i32
    %151 = vector.broadcast %3 : vector<288x1xf32> to vector<288x128xf32>
    %152 = arith.mulf %148, %151 : vector<288x128xf32>
    %cst_160 = arith.constant dense<0.000000e+00> : vector<128xf32>
    %153 = vector.multi_reduction <add>, %152, %cst_160 [0] : vector<288x128xf32> to vector<128xf32>
    %154 = vector.shape_cast %153 : vector<128xf32> to vector<1x128xf32>
    %cst_161 = arith.constant 3.906250e-03 : f32
    %155 = vector.broadcast %cst_161 : f32 to vector<1x128xf32>
    %156 = arith.mulf %154, %155 : vector<1x128xf32>
    %157 = vector.broadcast %156 : vector<1x128xf32> to vector<288x128xf32>
    %158 = arith.subf %148, %157 : vector<288x128xf32>
    %159 = vector.broadcast %3 : vector<288x1xf32> to vector<288x128xf32>
    %160 = arith.mulf %158, %159 : vector<288x128xf32>
    %161 = arith.mulf %160, %160 : vector<288x128xf32>
    %cst_162 = arith.constant dense<0.000000e+00> : vector<128xf32>
    %162 = vector.multi_reduction <add>, %161, %cst_162 [0] : vector<288x128xf32> to vector<128xf32>
    %163 = vector.shape_cast %162 : vector<128xf32> to vector<1x128xf32>
    %164 = arith.sitofp %150 : i32 to f32
    %cst_163 = arith.constant 2.560000e+02 : f32
    %165 = arith.mulf %164, %cst_163 : f32
    %cst_164 = arith.constant 2.560000e+02 : f32
    %166 = arith.addf %165, %cst_164 : f32
    %cst_165 = arith.constant 1.000000e+00 : f32
    %167 = arith.divf %cst_165, %166 : f32
    %c0_166 = arith.constant 0 : index
    %c0_167 = arith.constant 0 : index
    %168 = vector.load %arg5[%c0_166, %c0_167] : memref<1x128xf32, #tpu.memory_space<vmem>>, vector<1x128xf32>
    %169 = arith.subf %156, %168 : vector<1x128xf32>
    %c0_168 = arith.constant 0 : index
    %c0_169 = arith.constant 0 : index
    %170 = vector.load %arg5[%c0_168, %c0_169] : memref<1x128xf32, #tpu.memory_space<vmem>>, vector<1x128xf32>
    %cst_170 = arith.constant 2.560000e+02 : f32
    %171 = arith.mulf %cst_170, %167 : f32
    %172 = vector.broadcast %171 : f32 to vector<1x128xf32>
    %173 = arith.mulf %169, %172 : vector<1x128xf32>
    %174 = arith.addf %170, %173 : vector<1x128xf32>
    %c0_171 = arith.constant 0 : index
    %c0_172 = arith.constant 0 : index
    %175 = vector.load %arg5[%c0_171, %c0_172] : memref<1x128xf32, #tpu.memory_space<vmem>>, vector<1x128xf32>
    tpu.vector_store %arg5[%c0_171, %c0_172], %174 {strides = array<i32>} : memref<1x128xf32, #tpu.memory_space<vmem>>, vector<1x128xf32>,
    %c0_173 = arith.constant 0 : index
    %c0_174 = arith.constant 0 : index
    %176 = vector.load %arg6[%c0_173, %c0_174] : memref<1x128xf32, #tpu.memory_space<vmem>>, vector<1x128xf32>
    %177 = arith.addf %176, %163 : vector<1x128xf32>
    %178 = arith.mulf %169, %169 : vector<1x128xf32>
    %cst_175 = arith.constant 2.560000e+02 : f32
    %179 = arith.mulf %165, %cst_175 : f32
    %180 = arith.mulf %179, %167 : f32
    %181 = vector.broadcast %180 : f32 to vector<1x128xf32>
    %182 = arith.mulf %178, %181 : vector<1x128xf32>
    %183 = arith.addf %177, %182 : vector<1x128xf32>
    %c0_176 = arith.constant 0 : index
    %c0_177 = arith.constant 0 : index
    %184 = vector.load %arg6[%c0_176, %c0_177] : memref<1x128xf32, #tpu.memory_space<vmem>>, vector<1x128xf32>
    tpu.vector_store %arg6[%c0_176, %c0_177], %183 {strides = array<i32>} : memref<1x128xf32, #tpu.memory_space<vmem>>, vector<1x128xf32>,
    %c1_178 = arith.constant 1 : index
    %c0_179 = arith.constant 0 : index
    %c0_180 = arith.constant 0 : index
    %185 = vector.load %arg4[%c1_178, %c0_179, %c0_180] : memref<2x288x128xf32, #tpu.memory_space<vmem>>, vector<1x288x128xf32>
    %186 = vector.shape_cast %185 : vector<1x288x128xf32> to vector<288x128xf32>
    %187 = vector.shape_cast %152 : vector<288x128xf32> to vector<1x288x128xf32>
    tpu.vector_store %arg4[%c1_178, %c0_179, %c0_180], %187 {strides = array<i32>} : memref<2x288x128xf32, #tpu.memory_space<vmem>>, vector<1x288x128xf32>,
    return
  }
  func.func @transform_0(%arg0: i32) -> (i32, i32, i32) {
    %c0_i32 = arith.constant 0 : i32
    %c0_i32_0 = arith.constant 0 : i32
    %c0_i32_1 = arith.constant 0 : i32
    return %arg0, %c0_i32, %c0_i32_0 : i32, i32, i32
  }
  func.func @transform_1(%arg0: i32) -> (i32, i32, i32, i32) {
    %c0_i32 = arith.constant 0 : i32
    %c0_i32_0 = arith.constant 0 : i32
    %c0_i32_1 = arith.constant 0 : i32
    %c0_i32_2 = arith.constant 0 : i32
    %c0_i32_3 = arith.constant 0 : i32
    return %c0_i32, %c0_i32_0, %c0_i32_1, %c0_i32_2 : i32, i32, i32, i32
  }
  func.func @transform_2(%arg0: i32) -> (i32, i32) {
    %c0_i32 = arith.constant 0 : i32
    %c0_i32_0 = arith.constant 0 : i32
    %c0_i32_1 = arith.constant 0 : i32
    return %c0_i32, %c0_i32_0 : i32, i32
  }
  func.func @transform_3(%arg0: i32) -> (i32, i32, i32) {
    %c0_i32 = arith.constant 0 : i32
    %c0_i32_0 = arith.constant 0 : i32
    %c0_i32_1 = arith.constant 0 : i32
    return %arg0, %c0_i32, %c0_i32_0 : i32, i32, i32
  }
  func.func @transform_4(%arg0: i32) -> (i32, i32) {
    %c0_i32 = arith.constant 0 : i32
    %c0_i32_0 = arith.constant 0 : i32
    %c0_i32_1 = arith.constant 0 : i32
    return %c0_i32, %c0_i32_0 : i32, i32
  }
  func.func @transform_5(%arg0: i32) -> (i32, i32) {
    %c0_i32 = arith.constant 0 : i32
    %c0_i32_0 = arith.constant 0 : i32
    %c0_i32_1 = arith.constant 0 : i32
    return %c0_i32, %c0_i32_0 : i32, i32
  }
}

</mosaic_0001>

<bundles_post_ra>
// kernel: tpu_custom_call.1
= control target key start
LH: loop header
LB: loop body
LE: loop exit
PB: predicated region body
PF: predicated region fallthrough
CT: control target
= control target key end

     0   :  { %11 = vsyncpa [#allocation3], 0  ;;  %s14521_s0 = inlined_call_operand.vmem [shape: f32[2,332,128], index: 0, kind: input, shape index: {}]   ;;  %s14522_s1 = inlined_call_operand.vmem [shape: f32[3,3,128,128], index: 1, kind: input, shape index: {}]   ;;  %s14523_s2 = inlined_call_operand.vmem [shape: f32[288,1], index: 2, kind: input, shape index: {}]   ;;  %s14524_s3 = inlined_call_operand.hbm [shape: f32[2,288,128], index: 3, kind: output, shape index: {0}]   ;;  %s14525_s4 = inlined_call_operand.hbm [shape: f32[1,128], index: 4, kind: output, shape index: {1}]   ;;  %s14526_s5 = inlined_call_operand.hbm [shape: f32[1,128], index: 5, kind: output, shape index: {2}]  }
   0x1   :  { %v6716_v0 = vld [vmem:[%s14522_s1 + $0x80] sm:$0xff]  ;;  %v6717_v1 = vld [vmem:[%s14522_s1 + $0x88] sm:$0xff]  ;;  %v6718_v2 = vld [vmem:[%s14522_s1 + $0x90] sm:$0xff] }
   0x2   :  { %v9780_v3 = vpack.c.bf16 %v6717_v1, %v6716_v0  ;;  %v6719_v4 = vld [vmem:[%s14522_s1 + $0x98] sm:$0xff]  ;;  %v6720_v6 = vld [vmem:[%s14522_s1 + $0xa0] sm:$0xff]  ;;  %v6721_v7 = vld [vmem:[%s14522_s1 + $0xa8] sm:$0xff] }
   0x3   :  { %v9784_v5 = vpack.c.bf16 %v6719_v4, %v6718_v2  ;;  %v9788_v8 = vpack.c.bf16 %v6721_v7, %v6720_v6  ;;  %v113_v9 = vld [vmem:[%s14521_s0 + $0x1] sm:$0xff]  ;;  %v6880_v10 = vld [vmem:[%s14521_s0 + $0x151] sm:$0xff]  ;;  %v114_v31 = vld [vmem:[%s14521_s0 + $0x9] sm:$0xff] }
   0x4   :  { %9781 = vmatprep.subr.bf16.mxu0 %v9780_v3  ;;  %10069 = vmatprep.subr.bf16.mxu1 %v9780_v3  ;;  %v6722_v11 = vld [vmem:[%s14522_s1 + $0xb0] sm:$0xff]  ;;  %v6723_v12 = vld [vmem:[%s14522_s1 + $0xb8] sm:$0xff]  ;;  %v6724_v14 = vld [vmem:[%s14522_s1 + $0xc0] sm:$0xff] }
   0x5   :  { %9783 = vmatpush3.bf16.msra.mxu0 %v9780_v3  ;;  %10071 = vmatpush3.bf16.msra.mxu1 %v9780_v3  ;;  %v9792_v13 = vpack.c.bf16 %v6723_v12, %v6722_v11  ;;  %v6725_v15 = vld [vmem:[%s14522_s1 + $0xc8] sm:$0xff]  ;;  %v6726_v17 = vld [vmem:[%s14522_s1 + $0xd0] sm:$0xff]  ;;  %v6727_v18 = vld [vmem:[%s14522_s1 + $0xd8] sm:$0xff] }
   0x6   :  { %9785 = vmatprep.subr.bf16.mxu0 %v9784_v5  ;;  %10073 = vmatprep.subr.bf16.mxu1 %v9784_v5  ;;  %v9796_v16 = vpack.c.bf16 %v6725_v15, %v6724_v14  ;;  %v9800_v19 = vpack.c.bf16 %v6727_v18, %v6726_v17  ;;  %v6728_v20 = vld [vmem:[%s14522_s1 + $0xe0] sm:$0xff]  ;;  %v6729_v21 = vld [vmem:[%s14522_s1 + $0xe8] sm:$0xff]  ;;  %v6730_v23 = vld [vmem:[%s14522_s1 + $0xf0] sm:$0xff] }
   0x7   :  { %8264 = vmatprep.mubr.f32.mxu0 %v113_v9  ;;  %9038 = vmatprep.mubr.f32.mxu1 %v6880_v10  ;;  %v9804_v22 = vpack.c.bf16 %v6729_v21, %v6728_v20  ;;  %v6731_v24 = vld [vmem:[%s14522_s1 + $0xf8] sm:$0xff]  ;;  %v97_v26 = vld [vmem:[%s14522_s1] sm:$0xff]  ;;  %v98_v27 = vld [vmem:[%s14522_s1 + $0x8] sm:$0xff] }
   0x8   :  { %v9808_v25 = vpack.c.bf16 %v6731_v24, %v6730_v23  ;;  %v9812_v28 = vpack.c.bf16 %v98_v27, %v97_v26  ;;  %v99_v29 = vld [vmem:[%s14522_s1 + $0x10] sm:$0xff]  ;;  %v100_v30 = vld [vmem:[%s14522_s1 + $0x18] sm:$0xff]  ;;  %v6882_v35 = vld [vmem:[%s14521_s0 + $0x161] sm:$0xff] }
   0x9   :  { %9787 = vmatpush3.bf16.msra.mxu0 %v9784_v5  ;;  %10075 = vmatpush3.bf16.msra.mxu1 %v9784_v5  ;;  %v6881_v32 = vld [vmem:[%s14521_s0 + $0x159] sm:$0xff]  ;;  %v115_v33 = vld [vmem:[%s14521_s0 + $0x11] sm:$0xff]  ;;  %v9816_v34 = vpack.c.bf16 %v100_v30, %v99_v29  ;;  %v102_v37 = vld [vmem:[%s14522_s1 + $0x28] sm:$0xff] }
   0xa   :  { %9789 = vmatprep.subr.bf16.mxu0 %v9788_v8  ;;  %10077 = vmatprep.subr.bf16.mxu1 %v9788_v8  ;;  %v101_v36 = vld [vmem:[%s14522_s1 + $0x20] sm:$0xff]  ;;  %v6883_v39 = vld [vmem:[%s14521_s0 + $0x169] sm:$0xff]  ;;  %v6884_v41 = vld [vmem:[%s14521_s0 + $0x171] sm:$0xff] }
   0xb   :  { %v116_v38 = vld [vmem:[%s14521_s0 + $0x19] sm:$0xff]  ;;  %v117_v40 = vld [vmem:[%s14521_s0 + $0x21] sm:$0xff]  ;;  %v9820_v42 = vpack.c.bf16 %v102_v37, %v101_v36  ;;  %v103_v43 = vld [vmem:[%s14522_s1 + $0x30] sm:$0xff] }
   0xc   :  { %v104_v44 = vld [vmem:[%s14522_s1 + $0x38] sm:$0xff]  ;;  %v118_v45 = vld [vmem:[%s14521_s0 + $0x29] sm:$0xff]  ;;  %v6886_v48 = vld [vmem:[%s14521_s0 + $0x181] sm:$0xff] }
   0xd   :  { %9791 = vmatpush3.bf16.msra.mxu0 %v9788_v8  ;;  %10079 = vmatpush3.bf16.msra.mxu1 %v9788_v8  ;;  %v6885_v46 = vld [vmem:[%s14521_s0 + $0x179] sm:$0xff]  ;;  %v119_v47 = vld [vmem:[%s14521_s0 + $0x31] sm:$0xff]  ;;  %v9824_v49 = vpack.c.bf16 %v104_v44, %v103_v43  ;;  %v106_v51 = vld [vmem:[%s14522_s1 + $0x48] sm:$0xff] }
   0xe   :  { %9793 = vmatprep.subr.bf16.mxu0 %v9792_v13  ;;  %10081 = vmatprep.subr.bf16.mxu1 %v9792_v13  ;;  %v105_v50 = vld [vmem:[%s14522_s1 + $0x40] sm:$0xff]  ;;  %v6887_v53 = vld [vmem:[%s14521_s0 + $0x189] sm:$0xff]  ;;  %v6888_v55 = vld [vmem:[%s14521_s0 + $0x191] sm:$0xff] }
   0xf   :  { %v120_v52 = vld [vmem:[%s14521_s0 + $0x39] sm:$0xff]  ;;  %v121_v54 = vld [vmem:[%s14521_s0 + $0x41] sm:$0xff]  ;;  %v9828_v56 = vpack.c.bf16 %v106_v51, %v105_v50  ;;  %v107_v57 = vld [vmem:[%s14522_s1 + $0x50] sm:$0xff] }
  0x10   :  { %v108_v58 = vld [vmem:[%s14522_s1 + $0x58] sm:$0xff]  ;;  %v122_v59 = vld [vmem:[%s14521_s0 + $0x49] sm:$0xff]  ;;  %v6890_v62 = vld [vmem:[%s14521_s0 + $0x1a1] sm:$0xff] }
  0x11   :  { %9795 = vmatpush3.bf16.msra.mxu0 %v9792_v13  ;;  %10083 = vmatpush3.bf16.msra.mxu1 %v9792_v13  ;;  %v6889_v60 = vld [vmem:[%s14521_s0 + $0x199] sm:$0xff]  ;;  %v123_v61 = vld [vmem:[%s14521_s0 + $0x51] sm:$0xff]  ;;  %v9832_v63 = vpack.c.bf16 %v108_v58, %v107_v57  ;;  %v110_v1 = vld [vmem:[%s14522_s1 + $0x68] sm:$0xff] }
  0x12   :  { %9797 = vmatprep.subr.bf16.mxu0 %v9796_v16  ;;  %10085 = vmatprep.subr.bf16.mxu1 %v9796_v16  ;;  %v109_v0 = vld [vmem:[%s14522_s1 + $0x60] sm:$0xff]  ;;  %v6891_v3 = vld [vmem:[%s14521_s0 + $0x1a9] sm:$0xff]  ;;  %v6892_v5 = vld [vmem:[%s14521_s0 + $0x1b1] sm:$0xff] }
  0x13   :  { %v124_v2 = vld [vmem:[%s14521_s0 + $0x59] sm:$0xff]  ;;  %v125_v4 = vld [vmem:[%s14521_s0 + $0x61] sm:$0xff]  ;;  %v9836_v6 = vpack.c.bf16 %v110_v1, %v109_v0  ;;  %v111_v7 = vld [vmem:[%s14522_s1 + $0x70] sm:$0xff] }
  0x14   :  { %v112_v8 = vld [vmem:[%s14522_s1 + $0x78] sm:$0xff]  ;;  %v126_v9 = vld [vmem:[%s14521_s0 + $0x69] sm:$0xff]  ;;  %v6894_v12 = vld [vmem:[%s14521_s0 + $0x1c1] sm:$0xff] }
  0x15   :  { %9799 = vmatpush3.bf16.msra.mxu0 %v9796_v16  ;;  %10087 = vmatpush3.bf16.msra.mxu1 %v9796_v16  ;;  %v6893_v10 = vld [vmem:[%s14521_s0 + $0x1b9] sm:$0xff]  ;;  %v127_v11 = vld [vmem:[%s14521_s0 + $0x71] sm:$0xff]  ;;  %v9840_v13 = vpack.c.bf16 %v112_v8, %v111_v7  ;;  %v6733_v15 = vld [vmem:[%s14522_s1 + $0x108] sm:$0xff] }
  0x16   :  { %9801 = vmatprep.subr.bf16.mxu0 %v9800_v19  ;;  %10089 = vmatprep.subr.bf16.mxu1 %v9800_v19  ;;  %v6732_v14 = vld [vmem:[%s14522_s1 + $0x100] sm:$0xff]  ;;  %v6895_v17 = vld [vmem:[%s14521_s0 + $0x1c9] sm:$0xff]  ;;  %v131_v23 = vld [vmem:[%s14521_s0 + $0x91] sm:$0xff] }
  0x17   :  { %v128_v16 = vld [vmem:[%s14521_s0 + $0x79] sm:$0xff]  ;;  %v129_v18 = vld [vmem:[%s14521_s0 + $0x81] sm:$0xff]  ;;  %v11252_v20 = vpack.c.bf16 %v6733_v15, %v6732_v14  ;;  %v130_v21 = vld [vmem:[%s14521_s0 + $0x89] sm:$0xff] }
  0x18   :  { %v6898_v24 = vld [vmem:[%s14521_s0 + $0x1e1] sm:$0xff]  ;;  %v6899_v26 = vld [vmem:[%s14521_s0 + $0x1e9] sm:$0xff]  ;;  %v6901_v30 = vld [vmem:[%s14521_s0 + $0x1f9] sm:$0xff] }
  0x19   :  { %9803 = vmatpush3.bf16.msra.mxu0 %v9800_v19  ;;  %10091 = vmatpush3.bf16.msra.mxu1 %v9800_v19  ;;  %v6896_v19 = vld [vmem:[%s14521_s0 + $0x1d1] sm:$0xff]  ;;  %v133_v27 = vld [vmem:[%s14521_s0 + $0xa1] sm:$0xff]  ;;  %v134_v29 = vld [vmem:[%s14521_s0 + $0xa9] sm:$0xff] }
  0x1a   :  { %9805 = vmatprep.subr.bf16.mxu0 %v9804_v22  ;;  %10093 = vmatprep.subr.bf16.mxu1 %v9804_v22 }
  0x1d   :  { %9807 = vmatpush3.bf16.msra.mxu0 %v9804_v22  ;;  %10095 = vmatpush3.bf16.msra.mxu1 %v9804_v22  ;;  %v6897_v22 = vld [vmem:[%s14521_s0 + $0x1d9] sm:$0xff] }
  0x1e   :  { %9809 = vmatprep.subr.bf16.mxu0 %v9808_v25  ;;  %10097 = vmatprep.subr.bf16.mxu1 %v9808_v25 }
  0x21   :  { %9811 = vmatpush3.bf16.msra.mxu0 %v9808_v25  ;;  %10099 = vmatpush3.bf16.msra.mxu1 %v9808_v25  ;;  %v132_v25 = vld [vmem:[%s14521_s0 + $0x99] sm:$0xff] }
  0x22   :  { %9813 = vmatprep.subr.bf16.mxu0 %v9812_v28  ;;  %10101 = vmatprep.subr.bf16.mxu1 %v9812_v28 }
  0x24   :  { %8265 = vmatmul.mubr.f32.vlgmr.msra.gmra.mrb[0].mxu0 %v114_v31  ;;  %9039 = vmatmul.mubr.f32.vlgmr.msra.gmra.mrb[0].mxu1 %v6881_v32  ;;  %v135_v31 = vld [vmem:[%s14521_s0 + $0xb1] sm:$0xff]  ;;  %v6902_v32 = vld [vmem:[%s14521_s0 + $0x201] sm:$0xff] }
  0x25   :  { %9815 = vmatpush3.bf16.msra.mxu0 %v9812_v28  ;;  %8267 = vmatprep.mubr.f32.mxu0 %v115_v33 }
  0x26   :  { %9041 = vmatprep.mubr.f32.mxu1 %v6882_v35  ;;  %9817 = vmatprep.subr.bf16.mxu0 %v9816_v34 }
  0x27   :  { %10103 = vmatpush3.bf16.msra.mxu1 %v9812_v28  ;;  %v6900_v28 = vld [vmem:[%s14521_s0 + $0x1f1] sm:$0xff] }
  0x28   :  { %8268 = vmatmul.mubr.f32.gmra.mrb[2].mxu0 %v116_v38  ;;  %9042 = vmatmul.mubr.f32.gmra.mrb[2].mxu1 %v6883_v39 }
  0x29   :  { %8270 = vmatprep.mubr.f32.mxu0 %v117_v40  ;;  %9044 = vmatprep.mubr.f32.mxu1 %v6884_v41 }
  0x2a   :  { %9819 = vmatpush3.bf16.msra.mxu0 %v9816_v34  ;;  %10105 = vmatprep.subr.bf16.mxu1 %v9816_v34 }
  0x2b   :  { %9821 = vmatprep.subr.bf16.mxu0 %v9820_v42  ;;  %10107 = vmatpush3.bf16.msra.mxu1 %v9816_v34 }
  0x2c   :  { %8271 = vmatmul.mubr.f32.gmra.mrb[4].mxu0 %v118_v45  ;;  %9045 = vmatmul.mubr.f32.gmra.mrb[4].mxu1 %v6885_v46 }
  0x2d   :  { %8273 = vmatprep.mubr.f32.mxu0 %v119_v47  ;;  %9047 = vmatprep.mubr.f32.mxu1 %v6886_v48 }
  0x2e   :  { %9823 = vmatpush3.bf16.msra.mxu0 %v9820_v42  ;;  %10109 = vmatprep.subr.bf16.mxu1 %v9820_v42 }
  0x2f   :  { %9825 = vmatprep.subr.bf16.mxu0 %v9824_v49  ;;  %10111 = vmatpush3.bf16.msra.mxu1 %v9820_v42 }
  0x30   :  { %8274 = vmatmul.mubr.f32.gmra.mrb[6].mxu0 %v120_v52  ;;  %9048 = vmatmul.mubr.f32.gmra.mrb[6].mxu1 %v6887_v53 }
  0x31   :  { %8276 = vmatprep.mubr.f32.mxu0 %v121_v54  ;;  %9050 = vmatprep.mubr.f32.mxu1 %v6888_v55 }
  0x32   :  { %9827 = vmatpush3.bf16.msra.mxu0 %v9824_v49  ;;  %10113 = vmatprep.subr.bf16.mxu1 %v9824_v49 }
  0x33   :  { %9829 = vmatprep.subr.bf16.mxu0 %v9828_v56  ;;  %10115 = vmatpush3.bf16.msra.mxu1 %v9824_v49 }
  0x34   :  { %8277 = vmatmul.mubr.f32.gmra.mrb[8].mxu0 %v122_v59  ;;  %9051 = vmatmul.mubr.f32.gmra.mrb[8].mxu1 %v6889_v60 }
  0x35   :  { %8279 = vmatprep.mubr.f32.mxu0 %v123_v61  ;;  %9053 = vmatprep.mubr.f32.mxu1 %v6890_v62 }
  0x36   :  { %9831 = vmatpush3.bf16.msra.mxu0 %v9828_v56  ;;  %10117 = vmatprep.subr.bf16.mxu1 %v9828_v56 }
  0x37   :  { %9833 = vmatprep.subr.bf16.mxu0 %v9832_v63  ;;  %10119 = vmatpush3.bf16.msra.mxu1 %v9828_v56 }
  0x38   :  { %8280 = vmatmul.mubr.f32.gmra.mrb[10].mxu0 %v124_v2  ;;  %9054 = vmatmul.mubr.f32.gmra.mrb[10].mxu1 %v6891_v3 }
  0x39   :  { %8282 = vmatprep.mubr.f32.mxu0 %v125_v4  ;;  %9056 = vmatprep.mubr.f32.mxu1 %v6892_v5 }
  0x3a   :  { %9835 = vmatpush3.bf16.msra.mxu0 %v9832_v63  ;;  %10121 = vmatprep.subr.bf16.mxu1 %v9832_v63 }
  0x3b   :  { %9837 = vmatprep.subr.bf16.mxu0 %v9836_v6  ;;  %10123 = vmatpush3.bf16.msra.mxu1 %v9832_v63 }
  0x3c   :  { %8283 = vmatmul.mubr.f32.gmra.mrb[12].mxu0 %v126_v9  ;;  %9057 = vmatmul.mubr.f32.gmra.mrb[12].mxu1 %v6893_v10 }
  0x3d   :  { %8285 = vmatprep.mubr.f32.mxu0 %v127_v11  ;;  %9059 = vmatprep.mubr.f32.mxu1 %v6894_v12 }
  0x3e   :  { %9839 = vmatpush3.bf16.msra.mxu0 %v9836_v6  ;;  %10125 = vmatprep.subr.bf16.mxu1 %v9836_v6 }
  0x3f   :  { %9841 = vmatprep.subr.bf16.mxu0 %v9840_v13  ;;  %10127 = vmatpush3.bf16.msra.mxu1 %v9836_v6 }
  0x40   :  { %8286 = vmatmul.mubr.f32.gmra.mrb[14].mxu0 %v128_v16  ;;  %9060 = vmatmul.mubr.f32.gmra.mrb[14].mxu1 %v6895_v17 }
  0x41   :  { %8288 = vmatprep.mubr.f32.mxu0 %v129_v18  ;;  %9062 = vmatprep.mubr.f32.mxu1 %v6896_v19 }
  0x42   :  { %9843 = vmatpush3.bf16.msra.mxu0 %v9840_v13  ;;  %10129 = vmatprep.subr.bf16.mxu1 %v9840_v13 }
  0x43   :  { %10131 = vmatpush3.bf16.msra.mxu1 %v9840_v13  ;;  %9845 = vmatprep.subr.bf16.mxu0 %v11252_v20 }
  0x44   :  { %8289 = vmatmul.mubr.f32.gmra.mrb[16].mxu0 %v130_v21  ;;  %9063 = vmatmul.mubr.f32.gmra.mrb[16].mxu1 %v6897_v22 }
  0x45   :  { %8291 = vmatprep.mubr.f32.mxu0 %v131_v23  ;;  %9065 = vmatprep.mubr.f32.mxu1 %v6898_v24 }
  0x46   :  { %10133 = vmatprep.subr.bf16.mxu1 %v11252_v20 }
  0x48   :  { %8292 = vmatmul.mubr.f32.gmra.mrb[18].mxu0 %v132_v25  ;;  %9066 = vmatmul.mubr.f32.gmra.mrb[18].mxu1 %v6899_v26 }
  0x49   :  { %8294 = vmatprep.mubr.f32.mxu0 %v133_v27  ;;  %9068 = vmatprep.mubr.f32.mxu1 %v6900_v28 }
  0x4c   :  { %8295 = vmatmul.mubr.f32.gmra.mrb[20].mxu0 %v134_v29  ;;  %9069 = vmatmul.mubr.f32.gmra.mrb[20].mxu1 %v6901_v30 }
  0x4d   :  { %12 = vsyncpa [#allocation5], 0  ;;  %8297 = vmatprep.mubr.f32.mxu0 %v135_v31  ;;  %9071 = vmatprep.mubr.f32.mxu1 %v6902_v32  ;;  %v136_v33 = vld [vmem:[%s14521_s0 + $0xb9] sm:$0xff]  ;;  %v6903_v34 = vld [vmem:[%s14521_s0 + $0x209] sm:$0xff] }
  0x4e   :  { %v137_v35 = vld [vmem:[%s14521_s0 + $0xc1] sm:$0xff]  ;;  %v6904_v36 = vld [vmem:[%s14521_s0 + $0x211] sm:$0xff]  ;;  %v138_v37 = vld [vmem:[%s14521_s0 + $0xc9] sm:$0xff] }
  0x4f   :  { %v6905_v38 = vld [vmem:[%s14521_s0 + $0x219] sm:$0xff]  ;;  %v139_v39 = vld [vmem:[%s14521_s0 + $0xd1] sm:$0xff]  ;;  %v6906_v40 = vld [vmem:[%s14521_s0 + $0x221] sm:$0xff] }
  0x50   :  { %8298 = vmatmul.mubr.f32.gmra.mrb[22].mxu0 %v136_v33  ;;  %9072 = vmatmul.mubr.f32.gmra.mrb[22].mxu1 %v6903_v34  ;;  %v140_v41 = vld [vmem:[%s14521_s0 + $0xd9] sm:$0xff]  ;;  %v6907_v42 = vld [vmem:[%s14521_s0 + $0x229] sm:$0xff]  ;;  %v141_v43 = vld [vmem:[%s14521_s0 + $0xe1] sm:$0xff] }
  0x51   :  { %8300 = vmatprep.mubr.f32.mxu0 %v137_v35  ;;  %9074 = vmatprep.mubr.f32.mxu1 %v6904_v36  ;;  %v6908_v44 = vld [vmem:[%s14521_s0 + $0x231] sm:$0xff]  ;;  %v142_v45 = vld [vmem:[%s14521_s0 + $0xe9] sm:$0xff]  ;;  %v6909_v46 = vld [vmem:[%s14521_s0 + $0x239] sm:$0xff] }
  0x52   :  { %v143_v47 = vld [vmem:[%s14521_s0 + $0xf1] sm:$0xff]  ;;  %v6910_v48 = vld [vmem:[%s14521_s0 + $0x241] sm:$0xff]  ;;  %v144_v49 = vld [vmem:[%s14521_s0 + $0xf9] sm:$0xff] }
  0x53   :  { %v6911_v50 = vld [vmem:[%s14521_s0 + $0x249] sm:$0xff]  ;;  %v145_v51 = vld [vmem:[%s14521_s0 + $0x101] sm:$0xff]  ;;  %v6912_v52 = vld [vmem:[%s14521_s0 + $0x251] sm:$0xff] }
  0x54   :  { %8301 = vmatmul.mubr.f32.gmra.mrb[24].mxu0 %v138_v37  ;;  %9075 = vmatmul.mubr.f32.gmra.mrb[24].mxu1 %v6905_v38  ;;  %v146_v53 = vld [vmem:[%s14521_s0 + $0x109] sm:$0xff]  ;;  %v6913_v54 = vld [vmem:[%s14521_s0 + $0x259] sm:$0xff]  ;;  %v147_v55 = vld [vmem:[%s14521_s0 + $0x111] sm:$0xff] }
  0x55   :  { %8303 = vmatprep.mubr.f32.mxu0 %v139_v39  ;;  %9077 = vmatprep.mubr.f32.mxu1 %v6906_v40  ;;  %v6914_v56 = vld [vmem:[%s14521_s0 + $0x261] sm:$0xff]  ;;  %v148_v57 = vld [vmem:[%s14521_s0 + $0x119] sm:$0xff]  ;;  %v6915_v58 = vld [vmem:[%s14521_s0 + $0x269] sm:$0xff] }
  0x56   :  { %v61_v59 = vld [vmem:[%s14521_s0] sm:$0xff]  ;;  %v6844_v60 = vld [vmem:[%s14521_s0 + $0x150] sm:$0xff]  ;;  %v6735_v62 = vld [vmem:[%s14522_s1 + $0x118] sm:$0xff] }
  0x57   :  { %v6734_v61 = vld [vmem:[%s14522_s1 + $0x110] sm:$0xff]  ;;  %v62_v63 = vld [vmem:[%s14521_s0 + $0x8] sm:$0xff]  ;;  %v6845_v0 = vld [vmem:[%s14521_s0 + $0x158] sm:$0xff] }
  0x58   :  { %8304 = vmatmul.mubr.f32.gmra.mrb[26].mxu0 %v140_v41  ;;  %9078 = vmatmul.mubr.f32.gmra.mrb[26].mxu1 %v6907_v42  ;;  %v63_v1 = vld [vmem:[%s14521_s0 + $0x10] sm:$0xff]  ;;  %v9848_v2 = vpack.c.bf16 %v6735_v62, %v6734_v61  ;;  %v6846_v3 = vld [vmem:[%s14521_s0 + $0x160] sm:$0xff]  ;;  %v6737_v5 = vld [vmem:[%s14522_s1 + $0x128] sm:$0xff] }
  0x59   :  { %8306 = vmatprep.mubr.f32.mxu0 %v141_v43  ;;  %9080 = vmatprep.mubr.f32.mxu1 %v6908_v44  ;;  %v6736_v4 = vld [vmem:[%s14522_s1 + $0x120] sm:$0xff]  ;;  %v64_v6 = vld [vmem:[%s14521_s0 + $0x18] sm:$0xff]  ;;  %v6847_v7 = vld [vmem:[%s14521_s0 + $0x168] sm:$0xff] }
  0x5a   :  { %v65_v8 = vld [vmem:[%s14521_s0 + $0x20] sm:$0xff]  ;;  %v6848_v9 = vld [vmem:[%s14521_s0 + $0x170] sm:$0xff]  ;;  %v9852_v10 = vpack.c.bf16 %v6737_v5, %v6736_v4  ;;  %v6739_v12 = vld [vmem:[%s14522_s1 + $0x138] sm:$0xff] }
  0x5b   :  { %v6738_v11 = vld [vmem:[%s14522_s1 + $0x130] sm:$0xff]  ;;  %v66_v13 = vld [vmem:[%s14521_s0 + $0x28] sm:$0xff]  ;;  %v6849_v14 = vld [vmem:[%s14521_s0 + $0x178] sm:$0xff] }
  0x5c   :  { %8307 = vmatmul.mubr.f32.gmra.mrb[28].mxu0 %v142_v45  ;;  %9081 = vmatmul.mubr.f32.gmra.mrb[28].mxu1 %v6909_v46  ;;  %v67_v15 = vld [vmem:[%s14521_s0 + $0x30] sm:$0xff]  ;;  %v6850_v16 = vld [vmem:[%s14521_s0 + $0x180] sm:$0xff]  ;;  %v9856_v17 = vpack.c.bf16 %v6739_v12, %v6738_v11  ;;  %v6741_v19 = vld [vmem:[%s14522_s1 + $0x148] sm:$0xff] }
  0x5d   :  { %8309 = vmatprep.mubr.f32.mxu0 %v143_v47  ;;  %9083 = vmatprep.mubr.f32.mxu1 %v6910_v48  ;;  %v6740_v18 = vld [vmem:[%s14522_s1 + $0x140] sm:$0xff]  ;;  %v6851_v21 = vld [vmem:[%s14521_s0 + $0x188] sm:$0xff]  ;;  %v6852_v23 = vld [vmem:[%s14521_s0 + $0x190] sm:$0xff] }
  0x5e   :  { %v69_v22 = vld [vmem:[%s14521_s0 + $0x40] sm:$0xff]  ;;  %v9860_v24 = vpack.c.bf16 %v6741_v19, %v6740_v18  ;;  %v6742_v25 = vld [vmem:[%s14522_s1 + $0x150] sm:$0xff]  ;;  %v6743_v26 = vld [vmem:[%s14522_s1 + $0x158] sm:$0xff] }
  0x5f   :  { %v70_v27 = vld [vmem:[%s14521_s0 + $0x48] sm:$0xff]  ;;  %v6853_v28 = vld [vmem:[%s14521_s0 + $0x198] sm:$0xff]  ;;  %v71_v29 = vld [vmem:[%s14521_s0 + $0x50] sm:$0xff]  ;;  %v9864_v31 = vpack.c.bf16 %v6743_v26, %v6742_v25 }
  0x60   :  { %8310 = vmatmul.mubr.f32.gmra.mrb[30].mxu0 %v144_v49  ;;  %9084 = vmatmul.mubr.f32.gmra.mrb[30].mxu1 %v6911_v50  ;;  %v6854_v30 = vld [vmem:[%s14521_s0 + $0x1a0] sm:$0xff]  ;;  %v6745_v33 = vld [vmem:[%s14522_s1 + $0x168] sm:$0xff]  ;;  %v72_v34 = vld [vmem:[%s14521_s0 + $0x58] sm:$0xff] }
  0x61   :  { %8312 = vmatprep.mubr.f32.mxu0 %v145_v51  ;;  %9086 = vmatprep.mubr.f32.mxu1 %v6912_v52  ;;  %v6744_v32 = vld [vmem:[%s14522_s1 + $0x160] sm:$0xff]  ;;  %v6855_v35 = vld [vmem:[%s14521_s0 + $0x1a8] sm:$0xff]  ;;  %v6856_v37 = vld [vmem:[%s14521_s0 + $0x1b0] sm:$0xff] }
  0x62   :  { %v73_v36 = vld [vmem:[%s14521_s0 + $0x60] sm:$0xff]  ;;  %v9868_v38 = vpack.c.bf16 %v6745_v33, %v6744_v32  ;;  %v6746_v39 = vld [vmem:[%s14522_s1 + $0x170] sm:$0xff]  ;;  %v6747_v40 = vld [vmem:[%s14522_s1 + $0x178] sm:$0xff] }
  0x63   :  { %v74_v41 = vld [vmem:[%s14521_s0 + $0x68] sm:$0xff]  ;;  %v6857_v42 = vld [vmem:[%s14521_s0 + $0x1b8] sm:$0xff]  ;;  %v75_v43 = vld [vmem:[%s14521_s0 + $0x70] sm:$0xff]  ;;  %v9872_v45 = vpack.c.bf16 %v6747_v40, %v6746_v39 }
  0x64   :  { %8313 = vmatmul.mubr.f32.gmra.mrb[32].mxu0 %v146_v53  ;;  %9087 = vmatmul.mubr.f32.gmra.mrb[32].mxu1 %v6913_v54  ;;  %v6858_v44 = vld [vmem:[%s14521_s0 + $0x1c0] sm:$0xff]  ;;  %v6749_v47 = vld [vmem:[%s14522_s1 + $0x188] sm:$0xff]  ;;  %v76_v48 = vld [vmem:[%s14521_s0 + $0x78] sm:$0xff] }
  0x65   :  { %8315 = vmatprep.mubr.f32.mxu0 %v147_v55  ;;  %9089 = vmatprep.mubr.f32.mxu1 %v6914_v56  ;;  %v6748_v46 = vld [vmem:[%s14522_s1 + $0x180] sm:$0xff]  ;;  %v6859_v49 = vld [vmem:[%s14521_s0 + $0x1c8] sm:$0xff]  ;;  %v6860_v51 = vld [vmem:[%s14521_s0 + $0x1d0] sm:$0xff] }
  0x66   :  { %v77_v50 = vld [vmem:[%s14521_s0 + $0x80] sm:$0xff]  ;;  %v11522_v52 = vpack.c.bf16 %v6749_v47, %v6748_v46  ;;  %v78_v53 = vld [vmem:[%s14521_s0 + $0x88] sm:$0xff]  ;;  %v6861_v54 = vld [vmem:[%s14521_s0 + $0x1d8] sm:$0xff] }
  0x67   :  { %v79_v55 = vld [vmem:[%s14521_s0 + $0x90] sm:$0xff]  ;;  %v6862_v56 = vld [vmem:[%s14521_s0 + $0x1e0] sm:$0xff]  ;;  %v82_v61 = vld [vmem:[%s14521_s0 + $0xa8] sm:$0xff] }
  0x68   :  { %8316 = vmatmul.mubr.f32.gmra.mrb[34].mxu0 %v148_v57  ;;  %9090 = vmatmul.mubr.f32.gmra.mrb[34].mxu1 %v6915_v58  ;;  %v80_v57 = vld [vmem:[%s14521_s0 + $0x98] sm:$0xff]  ;;  %v6863_v58 = vld [vmem:[%s14521_s0 + $0x1e8] sm:$0xff]  ;;  %v6868_v4 = vld [vmem:[%s14521_s0 + $0x210] sm:$0xff] }
  0x69   :  { %8350 = vmatprep.mubr.f32.mxu0 %v61_v59  ;;  %9124 = vmatprep.mubr.f32.mxu1 %v6844_v60  ;;  %v81_v59 = vld [vmem:[%s14521_s0 + $0xa0] sm:$0xff]  ;;  %v6864_v60 = vld [vmem:[%s14521_s0 + $0x1f0] sm:$0xff]  ;;  %v6865_v62 = vld [vmem:[%s14521_s0 + $0x1f8] sm:$0xff] }
  0x6a   :  { %v86_v5 = vld [vmem:[%s14521_s0 + $0xc8] sm:$0xff]  ;;  %v89_v11 = vld [vmem:[%s14521_s0 + $0xe0] sm:$0xff]  ;;  %v6872_v12 = vld [vmem:[%s14521_s0 + $0x230] sm:$0xff] }
  0x6b   :  { %v6875_v18 = vld [vmem:[%s14521_s0 + $0x248] sm:$0xff]  ;;  %v93_v19 = vld [vmem:[%s14521_s0 + $0x100] sm:$0xff]  ;;  %v96_v25 = vld [vmem:[%s14521_s0 + $0x118] sm:$0xff] }
  0x6c   :  { %8351 = vmatmul.mubr.f32.vlgmr.msra.gmra.mrb[0].mxu0 %v62_v63  ;;  %9125 = vmatmul.mubr.f32.vlgmr.msra.gmra.mrb[0].mxu1 %v6845_v0  ;;  %v83_v63 = vld [vmem:[%s14521_s0 + $0xb0] sm:$0xff]  ;;  %v6866_v0 = vld [vmem:[%s14521_s0 + $0x200] sm:$0xff]  ;;  %v6879_v26 = vld [vmem:[%s14521_s0 + $0x268] sm:$0xff] }
  0x6d   :  { %9847 = vmatpush3.bf16.msra.mxu0 %v11252_v20  ;;  %8353 = vmatprep.mubr.f32.mxu0 %v63_v1  ;;  %v84_v1 = vld [vmem:[%s14521_s0 + $0xb8] sm:$0xff]  ;;  %v11684_v39 = vld [vmem:[%s14521_s0 + $0x16a] sm:$0xff]  ;;  %v11690_v40 = vld [vmem:[%s14521_s0 + $0x22] sm:$0xff] }
  0x6e   :  { %9127 = vmatprep.mubr.f32.mxu1 %v6846_v3  ;;  %9849 = vmatprep.subr.bf16.mxu0 %v9848_v2  ;;  %v85_v3 = vld [vmem:[%s14521_s0 + $0xc0] sm:$0xff]  ;;  %v11661_v33 = vld [vmem:[%s14521_s0 + $0x12] sm:$0xff] }
  0x6f   :  { %10135 = vmatpush3.bf16.msra.mxu1 %v11252_v20  ;;  %v68_v20 = vld [vmem:[%s14521_s0 + $0x38] sm:$0xff] }
  0x70   :  { %8354 = vmatmul.mubr.f32.gmra.mrb[2].mxu0 %v64_v6  ;;  %9128 = vmatmul.mubr.f32.gmra.mrb[2].mxu1 %v6847_v7  ;;  %v6869_v6 = vld [vmem:[%s14521_s0 + $0x218] sm:$0xff]  ;;  %v87_v7 = vld [vmem:[%s14521_s0 + $0xd0] sm:$0xff] }
  0x71   :  { %8356 = vmatprep.mubr.f32.mxu0 %v65_v8  ;;  %9130 = vmatprep.mubr.f32.mxu1 %v6848_v9  ;;  %v6870_v8 = vld [vmem:[%s14521_s0 + $0x220] sm:$0xff]  ;;  %v88_v9 = vld [vmem:[%s14521_s0 + $0xd8] sm:$0xff] }
  0x72   :  { %9851 = vmatpush3.bf16.msra.mxu0 %v9848_v2  ;;  %10137 = vmatprep.subr.bf16.mxu1 %v9848_v2  ;;  %v6933_v32 = vld [vmem:[%s14521_s0 + $0x15a] sm:$0xff]  ;;  %v11721_v47 = vld [vmem:[%s14521_s0 + $0x32] sm:$0xff] }
  0x73   :  { %9853 = vmatprep.subr.bf16.mxu0 %v9852_v10  ;;  %10139 = vmatpush3.bf16.msra.mxu1 %v9848_v2  ;;  %v6867_v2 = vld [vmem:[%s14521_s0 + $0x208] sm:$0xff]  ;;  %v11716_v46 = vld [vmem:[%s14521_s0 + $0x17a] sm:$0xff] }
  0x74   :  { %8357 = vmatmul.mubr.f32.gmra.mrb[4].mxu0 %v66_v13  ;;  %9131 = vmatmul.mubr.f32.gmra.mrb[4].mxu1 %v6849_v14  ;;  %v90_v13 = vld [vmem:[%s14521_s0 + $0xe8] sm:$0xff]  ;;  %v6873_v14 = vld [vmem:[%s14521_s0 + $0x238] sm:$0xff] }
  0x75   :  { %8359 = vmatprep.mubr.f32.mxu0 %v67_v15  ;;  %9133 = vmatprep.mubr.f32.mxu1 %v6850_v16  ;;  %v91_v15 = vld [vmem:[%s14521_s0 + $0xf0] sm:$0xff]  ;;  %v6874_v16 = vld [vmem:[%s14521_s0 + $0x240] sm:$0xff] }
  0x76   :  { %9855 = vmatpush3.bf16.msra.mxu0 %v9852_v10  ;;  %10141 = vmatprep.subr.bf16.mxu1 %v9852_v10 }
  0x77   :  { %9857 = vmatprep.subr.bf16.mxu0 %v9856_v17  ;;  %10143 = vmatpush3.bf16.msra.mxu1 %v9852_v10  ;;  %v6871_v10 = vld [vmem:[%s14521_s0 + $0x228] sm:$0xff] }
  0x78   :  { %8360 = vmatmul.mubr.f32.gmra.mrb[6].mxu0 %v68_v20  ;;  %9134 = vmatmul.mubr.f32.gmra.mrb[6].mxu1 %v6851_v21  ;;  %v6876_v20 = vld [vmem:[%s14521_s0 + $0x250] sm:$0xff]  ;;  %v94_v21 = vld [vmem:[%s14521_s0 + $0x108] sm:$0xff] }
  0x79   :  { %8362 = vmatprep.mubr.f32.mxu0 %v69_v22  ;;  %9136 = vmatprep.mubr.f32.mxu1 %v6852_v23  ;;  %v6877_v22 = vld [vmem:[%s14521_s0 + $0x258] sm:$0xff]  ;;  %v95_v23 = vld [vmem:[%s14521_s0 + $0x110] sm:$0xff] }
  0x7a   :  { %9859 = vmatpush3.bf16.msra.mxu0 %v9856_v17  ;;  %10145 = vmatprep.subr.bf16.mxu1 %v9856_v17 }
  0x7b   :  { %9861 = vmatprep.subr.bf16.mxu0 %v9860_v24  ;;  %10147 = vmatpush3.bf16.msra.mxu1 %v9856_v17  ;;  %v92_v17 = vld [vmem:[%s14521_s0 + $0xf8] sm:$0xff] }
  0x7c   :  { %8363 = vmatmul.mubr.f32.gmra.mrb[8].mxu0 %v70_v27  ;;  %9137 = vmatmul.mubr.f32.gmra.mrb[8].mxu1 %v6853_v28  ;;  %v656_v27 = vld [vmem:[%s14521_s0 + $0x2] sm:$0xff]  ;;  %v6932_v28 = vld [vmem:[%s14521_s0 + $0x152] sm:$0xff] }
  0x7d   :  { %8365 = vmatprep.mubr.f32.mxu0 %v71_v29  ;;  %9139 = vmatprep.mubr.f32.mxu1 %v6854_v30  ;;  %v6750_v29 = vld [vmem:[%s14522_s1 + $0x190] sm:$0xff]  ;;  %v6751_v30 = vld [vmem:[%s14522_s1 + $0x198] sm:$0xff] }
  0x7e   :  { %9863 = vmatpush3.bf16.msra.mxu0 %v9860_v24  ;;  %10149 = vmatprep.subr.bf16.mxu1 %v9860_v24 }
  0x7f   :  { %9865 = vmatprep.subr.bf16.mxu0 %v9864_v31  ;;  %10151 = vmatpush3.bf16.msra.mxu1 %v9860_v24  ;;  %v6878_v24 = vld [vmem:[%s14521_s0 + $0x260] sm:$0xff] }
  0x80   :  { %8366 = vmatmul.mubr.f32.gmra.mrb[10].mxu0 %v72_v34  ;;  %9140 = vmatmul.mubr.f32.gmra.mrb[10].mxu1 %v6855_v35  ;;  %v9880_v34 = vpack.c.bf16 %v6751_v30, %v6750_v29  ;;  %v11666_v35 = vld [vmem:[%s14521_s0 + $0x162] sm:$0xff]  ;;  %v11937_v29 = vld [vmem:[%s14521_s0 + $0xaa] sm:$0xff]  ;;  %v11942_v30 = vld [vmem:[%s14521_s0 + $0x1fa] sm:$0xff] }
  0x81   :  { %8368 = vmatprep.mubr.f32.mxu0 %v73_v36  ;;  %9142 = vmatprep.mubr.f32.mxu1 %v6856_v37  ;;  %v6752_v36 = vld [vmem:[%s14522_s1 + $0x1a0] sm:$0xff]  ;;  %v6753_v37 = vld [vmem:[%s14522_s1 + $0x1a8] sm:$0xff] }
  0x82   :  { %9867 = vmatpush3.bf16.msra.mxu0 %v9864_v31  ;;  %10153 = vmatprep.subr.bf16.mxu1 %v9864_v31 }
  0x83   :  { %9869 = vmatprep.subr.bf16.mxu0 %v9868_v38  ;;  %10155 = vmatpush3.bf16.msra.mxu1 %v9864_v31  ;;  %v657_v31 = vld [vmem:[%s14521_s0 + $0xa] sm:$0xff] }
  0x84   :  { %8369 = vmatmul.mubr.f32.gmra.mrb[12].mxu0 %v74_v41  ;;  %9143 = vmatmul.mubr.f32.gmra.mrb[12].mxu1 %v6857_v42  ;;  %v11695_v41 = vld [vmem:[%s14521_s0 + $0x172] sm:$0xff]  ;;  %v9884_v42 = vpack.c.bf16 %v6753_v37, %v6752_v36  ;;  %v11966_v36 = vld [vmem:[%s14521_s0 + $0x20a] sm:$0xff]  ;;  %v11971_v37 = vld [vmem:[%s14521_s0 + $0xc2] sm:$0xff] }
  0x85   :  { %8371 = vmatprep.mubr.f32.mxu0 %v75_v43  ;;  %9145 = vmatprep.mubr.f32.mxu1 %v6858_v44  ;;  %v6754_v43 = vld [vmem:[%s14522_s1 + $0x1b0] sm:$0xff]  ;;  %v6755_v44 = vld [vmem:[%s14522_s1 + $0x1b8] sm:$0xff] }
  0x86   :  { %9871 = vmatpush3.bf16.msra.mxu0 %v9868_v38  ;;  %10157 = vmatprep.subr.bf16.mxu1 %v9868_v38 }
  0x87   :  { %9873 = vmatprep.subr.bf16.mxu0 %v9872_v45  ;;  %10159 = vmatpush3.bf16.msra.mxu1 %v9868_v38  ;;  %v11679_v38 = vld [vmem:[%s14521_s0 + $0x1a] sm:$0xff] }
  0x88   :  { %8372 = vmatmul.mubr.f32.gmra.mrb[14].mxu0 %v76_v48  ;;  %9146 = vmatmul.mubr.f32.gmra.mrb[14].mxu1 %v6859_v49  ;;  %v11726_v48 = vld [vmem:[%s14521_s0 + $0x182] sm:$0xff]  ;;  %v9888_v49 = vpack.c.bf16 %v6755_v44, %v6754_v43  ;;  %v11985_v43 = vld [vmem:[%s14521_s0 + $0xca] sm:$0xff]  ;;  %v11990_v44 = vld [vmem:[%s14521_s0 + $0x21a] sm:$0xff] }
  0x89   :  { %8374 = vmatprep.mubr.f32.mxu0 %v77_v50  ;;  %9148 = vmatprep.mubr.f32.mxu1 %v6860_v51  ;;  %v6756_v50 = vld [vmem:[%s14522_s1 + $0x1c0] sm:$0xff]  ;;  %v6757_v51 = vld [vmem:[%s14522_s1 + $0x1c8] sm:$0xff] }
  0x8a   :  { %9875 = vmatpush3.bf16.msra.mxu0 %v9872_v45  ;;  %10161 = vmatprep.subr.bf16.mxu1 %v9872_v45 }
  0x8b   :  { %10163 = vmatpush3.bf16.msra.mxu1 %v9872_v45  ;;  %9877 = vmatprep.subr.bf16.mxu0 %v11522_v52  ;;  %v11711_v45 = vld [vmem:[%s14521_s0 + $0x2a] sm:$0xff] }
  0x8c   :  { %8375 = vmatmul.mubr.f32.gmra.mrb[16].mxu0 %v78_v53  ;;  %9149 = vmatmul.mubr.f32.gmra.mrb[16].mxu1 %v6861_v54  ;;  %v11746_v53 = vld [vmem:[%s14521_s0 + $0x18a] sm:$0xff]  ;;  %v11751_v54 = vld [vmem:[%s14521_s0 + $0x42] sm:$0xff] }
  0x8d   :  { %8377 = vmatprep.mubr.f32.mxu0 %v79_v55  ;;  %9151 = vmatprep.mubr.f32.mxu1 %v6862_v56  ;;  %v11756_v55 = vld [vmem:[%s14521_s0 + $0x192] sm:$0xff]  ;;  %v9892_v56 = vpack.c.bf16 %v6757_v51, %v6756_v50  ;;  %v12000_v50 = vld [vmem:[%s14521_s0 + $0x222] sm:$0xff]  ;;  %v12009_v51 = vld [vmem:[%s14521_s0 + $0xda] sm:$0xff] }
  0x8e   :  { %10165 = vmatprep.subr.bf16.mxu1 %v11522_v52 }
  0x90   :  { %8378 = vmatmul.mubr.f32.gmra.mrb[18].mxu0 %v80_v57  ;;  %9152 = vmatmul.mubr.f32.gmra.mrb[18].mxu1 %v6863_v58  ;;  %v6758_v57 = vld [vmem:[%s14522_s1 + $0x1d0] sm:$0xff]  ;;  %v6759_v58 = vld [vmem:[%s14522_s1 + $0x1d8] sm:$0xff] }
  0x91   :  { %8380 = vmatprep.mubr.f32.mxu0 %v81_v59  ;;  %9154 = vmatprep.mubr.f32.mxu1 %v6864_v60  ;;  %v11771_v59 = vld [vmem:[%s14521_s0 + $0x4a] sm:$0xff]  ;;  %v11776_v60 = vld [vmem:[%s14521_s0 + $0x19a] sm:$0xff] }
  0x94   :  { %8381 = vmatmul.mubr.f32.gmra.mrb[20].mxu0 %v82_v61  ;;  %9155 = vmatmul.mubr.f32.gmra.mrb[20].mxu1 %v6865_v62  ;;  %v11781_v61 = vld [vmem:[%s14521_s0 + $0x52] sm:$0xff]  ;;  %v11786_v62 = vld [vmem:[%s14521_s0 + $0x1a2] sm:$0xff] }
  0x95   :  { %8383 = vmatprep.mubr.f32.mxu0 %v83_v63  ;;  %9157 = vmatprep.mubr.f32.mxu1 %v6866_v0  ;;  %v9896_v63 = vpack.c.bf16 %v6759_v58, %v6758_v57  ;;  %v6760_v0 = vld [vmem:[%s14522_s1 + $0x1e0] sm:$0xff]  ;;  %v12024_v58 = vld [vmem:[%s14521_s0 + $0x232] sm:$0xff] }
  0x96   :  { %v12019_v57 = vld [vmem:[%s14521_s0 + $0xe2] sm:$0xff] }
  0x98   :  { %8384 = vmatmul.mubr.f32.gmra.mrb[22].mxu0 %v84_v1  ;;  %9158 = vmatmul.mubr.f32.gmra.mrb[22].mxu1 %v6867_v2  ;;  %v6761_v1 = vld [vmem:[%s14522_s1 + $0x1e8] sm:$0xff]  ;;  %v11801_v2 = vld [vmem:[%s14521_s0 + $0x5a] sm:$0xff] }
  0x99   :  { %8386 = vmatprep.mubr.f32.mxu0 %v85_v3  ;;  %9160 = vmatprep.mubr.f32.mxu1 %v6868_v4  ;;  %v11806_v3 = vld [vmem:[%s14521_s0 + $0x1aa] sm:$0xff]  ;;  %v11811_v4 = vld [vmem:[%s14521_s0 + $0x62] sm:$0xff] }
  0x9c   :  { %8387 = vmatmul.mubr.f32.gmra.mrb[24].mxu0 %v86_v5  ;;  %9161 = vmatmul.mubr.f32.gmra.mrb[24].mxu1 %v6869_v6  ;;  %v11816_v5 = vld [vmem:[%s14521_s0 + $0x1b2] sm:$0xff]  ;;  %v9900_v6 = vpack.c.bf16 %v6761_v1, %v6760_v0  ;;  %v12038_v0 = vld [vmem:[%s14521_s0 + $0x23a] sm:$0xff] }
  0x9d   :  { %8389 = vmatprep.mubr.f32.mxu0 %v87_v7  ;;  %9163 = vmatprep.mubr.f32.mxu1 %v6870_v8  ;;  %v6762_v7 = vld [vmem:[%s14522_s1 + $0x1f0] sm:$0xff]  ;;  %v6763_v8 = vld [vmem:[%s14522_s1 + $0x1f8] sm:$0xff] }
  0x9e   :  { %v12043_v1 = vld [vmem:[%s14521_s0 + $0xf2] sm:$0xff] }
  0x9f   :  { %14687 = vst [vmem:[#allocation9_spill] sm:$0xff] %v12043_v1 }
  0xa0   :  { %8390 = vmatmul.mubr.f32.gmra.mrb[26].mxu0 %v88_v9  ;;  %9164 = vmatmul.mubr.f32.gmra.mrb[26].mxu1 %v6871_v10  ;;  %v11831_v9 = vld [vmem:[%s14521_s0 + $0x6a] sm:$0xff]  ;;  %v11836_v10 = vld [vmem:[%s14521_s0 + $0x1ba] sm:$0xff] }
  0xa1   :  { %8392 = vmatprep.mubr.f32.mxu0 %v89_v11  ;;  %9166 = vmatprep.mubr.f32.mxu1 %v6872_v12  ;;  %v11841_v11 = vld [vmem:[%s14521_s0 + $0x72] sm:$0xff]  ;;  %v11846_v12 = vld [vmem:[%s14521_s0 + $0x1c2] sm:$0xff] }
  0xa4   :  { %8393 = vmatmul.mubr.f32.gmra.mrb[28].mxu0 %v90_v13  ;;  %9167 = vmatmul.mubr.f32.gmra.mrb[28].mxu1 %v6873_v14  ;;  %v9904_v13 = vpack.c.bf16 %v6763_v8, %v6762_v7  ;;  %v6764_v14 = vld [vmem:[%s14522_s1 + $0x200] sm:$0xff]  ;;  %v12062_v8 = vld [vmem:[%s14521_s0 + $0x24a] sm:$0xff] }
  0xa5   :  { %8395 = vmatprep.mubr.f32.mxu0 %v91_v15  ;;  %9169 = vmatprep.mubr.f32.mxu1 %v6874_v16  ;;  %v6765_v15 = vld [vmem:[%s14522_s1 + $0x208] sm:$0xff]  ;;  %v11861_v16 = vld [vmem:[%s14521_s0 + $0x7a] sm:$0xff]  ;;  %14690 = vst [vmem:[#allocation12_spill] sm:$0xff] %v12062_v8 }
  0xa6   :  { %v12057_v7 = vld [vmem:[%s14521_s0 + $0xfa] sm:$0xff] }
  0xa7   :  { %14689 = vst [vmem:[#allocation11_spill] sm:$0xff] %v12057_v7 }
  0xa8   :  { %8396 = vmatmul.mubr.f32.gmra.mrb[30].mxu0 %v92_v17  ;;  %9170 = vmatmul.mubr.f32.gmra.mrb[30].mxu1 %v6875_v18  ;;  %v11866_v17 = vld [vmem:[%s14521_s0 + $0x1ca] sm:$0xff]  ;;  %v11871_v18 = vld [vmem:[%s14521_s0 + $0x82] sm:$0xff] }
  0xa9   :  { %8398 = vmatprep.mubr.f32.mxu0 %v93_v19  ;;  %9172 = vmatprep.mubr.f32.mxu1 %v6876_v20  ;;  %v11876_v19 = vld [vmem:[%s14521_s0 + $0x1d2] sm:$0xff]  ;;  %v11878_v20 = vpack.c.bf16 %v6765_v15, %v6764_v14  ;;  %v12081_v15 = vld [vmem:[%s14521_s0 + $0x10a] sm:$0xff] }
  0xaa   :  { %v12072_v14 = vld [vmem:[%s14521_s0 + $0x252] sm:$0xff]  ;;  %14693 = vst [vmem:[#allocation15_spill] sm:$0xff] %v12081_v15 }
  0xab   :  { %14692 = vst [vmem:[#allocation14_spill] sm:$0xff] %v12072_v14 }
  0xac   :  { %8399 = vmatmul.mubr.f32.gmra.mrb[32].mxu0 %v94_v21  ;;  %9173 = vmatmul.mubr.f32.gmra.mrb[32].mxu1 %v6877_v22  ;;  %v11887_v21 = vld [vmem:[%s14521_s0 + $0x8a] sm:$0xff]  ;;  %v11892_v22 = vld [vmem:[%s14521_s0 + $0x1da] sm:$0xff] }
  0xad   :  { %8401 = vmatprep.mubr.f32.mxu0 %v95_v23  ;;  %9175 = vmatprep.mubr.f32.mxu1 %v6878_v24  ;;  %v11897_v23 = vld [vmem:[%s14521_s0 + $0x92] sm:$0xff]  ;;  %v11902_v24 = vld [vmem:[%s14521_s0 + $0x1e2] sm:$0xff] }
  0xb0   :  { %8402 = vmatmul.mubr.f32.gmra.mrb[34].mxu0 %v96_v25  ;;  %9176 = vmatmul.mubr.f32.gmra.mrb[34].mxu1 %v6879_v26  ;;  %v11912_v25 = vld [vmem:[%s14521_s0 + $0x9a] sm:$0xff]  ;;  %v11917_v26 = vld [vmem:[%s14521_s0 + $0x1ea] sm:$0xff] }
  0xb1   :  { %8436 = vmatprep.mubr.f32.mxu0 %v656_v27  ;;  %9210 = vmatprep.mubr.f32.mxu1 %v6932_v28  ;;  %v11922_v27 = vld [vmem:[%s14521_s0 + $0xa2] sm:$0xff]  ;;  %v11927_v28 = vld [vmem:[%s14521_s0 + $0x1f2] sm:$0xff] }
  0xb4   :  { %8437 = vmatmul.mubr.f32.vlgmr.msra.gmra.mrb[0].mxu0 %v657_v31  ;;  %9211 = vmatmul.mubr.f32.vlgmr.msra.gmra.mrb[0].mxu1 %v6933_v32  ;;  %v11947_v31 = vld [vmem:[%s14521_s0 + $0xb2] sm:$0xff]  ;;  %v11952_v32 = vld [vmem:[%s14521_s0 + $0x202] sm:$0xff] }
  0xb5   :  { %9879 = vmatpush3.bf16.msra.mxu0 %v11522_v52  ;;  %8439 = vmatprep.mubr.f32.mxu0 %v11661_v33 }
  0xb6   :  { %9213 = vmatprep.mubr.f32.mxu1 %v11666_v35  ;;  %9881 = vmatprep.subr.bf16.mxu0 %v9880_v34 }
  0xb7   :  { %10167 = vmatpush3.bf16.msra.mxu1 %v11522_v52  ;;  %v11741_v52 = vld [vmem:[%s14521_s0 + $0x3a] sm:$0xff] }
  0xb8   :  { %8440 = vmatmul.mubr.f32.gmra.mrb[2].mxu0 %v11679_v38  ;;  %9214 = vmatmul.mubr.f32.gmra.mrb[2].mxu1 %v11684_v39 }
  0xb9   :  { %8442 = vmatprep.mubr.f32.mxu0 %v11690_v40  ;;  %9216 = vmatprep.mubr.f32.mxu1 %v11695_v41 }
  0xba   :  { %9883 = vmatpush3.bf16.msra.mxu0 %v9880_v34  ;;  %10169 = vmatprep.subr.bf16.mxu1 %v9880_v34 }
  0xbb   :  { %9885 = vmatprep.subr.bf16.mxu0 %v9884_v42  ;;  %10171 = vmatpush3.bf16.msra.mxu1 %v9880_v34  ;;  %v11961_v34 = vld [vmem:[%s14521_s0 + $0xba] sm:$0xff] }
  0xbc   :  { %8443 = vmatmul.mubr.f32.gmra.mrb[4].mxu0 %v11711_v45  ;;  %9217 = vmatmul.mubr.f32.gmra.mrb[4].mxu1 %v11716_v46 }
  0xbd   :  { %8445 = vmatprep.mubr.f32.mxu0 %v11721_v47  ;;  %9219 = vmatprep.mubr.f32.mxu1 %v11726_v48 }
  0xbe   :  { %9887 = vmatpush3.bf16.msra.mxu0 %v9884_v42  ;;  %10173 = vmatprep.subr.bf16.mxu1 %v9884_v42 }
  0xbf   :  { %9889 = vmatprep.subr.bf16.mxu0 %v9888_v49  ;;  %10175 = vmatpush3.bf16.msra.mxu1 %v9884_v42  ;;  %v11976_v42 = vld [vmem:[%s14521_s0 + $0x212] sm:$0xff] }
  0xc0   :  { %8446 = vmatmul.mubr.f32.gmra.mrb[6].mxu0 %v11741_v52  ;;  %9220 = vmatmul.mubr.f32.gmra.mrb[6].mxu1 %v11746_v53 }
  0xc1   :  { %8448 = vmatprep.mubr.f32.mxu0 %v11751_v54  ;;  %9222 = vmatprep.mubr.f32.mxu1 %v11756_v55 }
  0xc2   :  { %9891 = vmatpush3.bf16.msra.mxu0 %v9888_v49  ;;  %10177 = vmatprep.subr.bf16.mxu1 %v9888_v49 }
  0xc3   :  { %9893 = vmatprep.subr.bf16.mxu0 %v9892_v56  ;;  %10179 = vmatpush3.bf16.msra.mxu1 %v9888_v49  ;;  %v11995_v49 = vld [vmem:[%s14521_s0 + $0xd2] sm:$0xff] }
  0xc4   :  { %8449 = vmatmul.mubr.f32.gmra.mrb[8].mxu0 %v11771_v59  ;;  %9223 = vmatmul.mubr.f32.gmra.mrb[8].mxu1 %v11776_v60 }
  0xc5   :  { %8451 = vmatprep.mubr.f32.mxu0 %v11781_v61  ;;  %9225 = vmatprep.mubr.f32.mxu1 %v11786_v62 }
  0xc6   :  { %9895 = vmatpush3.bf16.msra.mxu0 %v9892_v56  ;;  %10181 = vmatprep.subr.bf16.mxu1 %v9892_v56 }
  0xc7   :  { %9897 = vmatprep.subr.bf16.mxu0 %v9896_v63  ;;  %10183 = vmatpush3.bf16.msra.mxu1 %v9892_v56  ;;  %v12014_v56 = vld [vmem:[%s14521_s0 + $0x22a] sm:$0xff] }
  0xc8   :  { %8452 = vmatmul.mubr.f32.gmra.mrb[10].mxu0 %v11801_v2  ;;  %9226 = vmatmul.mubr.f32.gmra.mrb[10].mxu1 %v11806_v3 }
  0xc9   :  { %8454 = vmatprep.mubr.f32.mxu0 %v11811_v4  ;;  %9228 = vmatprep.mubr.f32.mxu1 %v11816_v5 }
  0xca   :  { %9899 = vmatpush3.bf16.msra.mxu0 %v9896_v63  ;;  %10185 = vmatprep.subr.bf16.mxu1 %v9896_v63 }
  0xcb   :  { %9901 = vmatprep.subr.bf16.mxu0 %v9900_v6  ;;  %10187 = vmatpush3.bf16.msra.mxu1 %v9896_v63  ;;  %v12033_v63 = vld [vmem:[%s14521_s0 + $0xea] sm:$0xff] }
  0xcc   :  { %8455 = vmatmul.mubr.f32.gmra.mrb[12].mxu0 %v11831_v9  ;;  %9229 = vmatmul.mubr.f32.gmra.mrb[12].mxu1 %v11836_v10 }
  0xcd   :  { %8457 = vmatprep.mubr.f32.mxu0 %v11841_v11  ;;  %9231 = vmatprep.mubr.f32.mxu1 %v11846_v12 }
  0xce   :  { %9903 = vmatpush3.bf16.msra.mxu0 %v9900_v6  ;;  %10189 = vmatprep.subr.bf16.mxu1 %v9900_v6 }
  0xcf   :  { %9905 = vmatprep.subr.bf16.mxu0 %v9904_v13  ;;  %10191 = vmatpush3.bf16.msra.mxu1 %v9900_v6  ;;  %v12048_v6 = vld [vmem:[%s14521_s0 + $0x242] sm:$0xff] }
  0xd0   :  { %8458 = vmatmul.mubr.f32.gmra.mrb[14].mxu0 %v11861_v16  ;;  %9232 = vmatmul.mubr.f32.gmra.mrb[14].mxu1 %v11866_v17  ;;  %14688 = vst [vmem:[#allocation10_spill] sm:$0xff] %v12048_v6 }
  0xd1   :  { %8460 = vmatprep.mubr.f32.mxu0 %v11871_v18  ;;  %9234 = vmatprep.mubr.f32.mxu1 %v11876_v19 }
  0xd2   :  { %9907 = vmatpush3.bf16.msra.mxu0 %v9904_v13  ;;  %10193 = vmatprep.subr.bf16.mxu1 %v9904_v13 }
  0xd3   :  { %10195 = vmatpush3.bf16.msra.mxu1 %v9904_v13  ;;  %9909 = vmatprep.subr.bf16.mxu0 %v11878_v20  ;;  %v12067_v13 = vld [vmem:[%s14521_s0 + $0x102] sm:$0xff] }
  0xd4   :  { %8461 = vmatmul.mubr.f32.gmra.mrb[16].mxu0 %v11887_v21  ;;  %9235 = vmatmul.mubr.f32.gmra.mrb[16].mxu1 %v11892_v22  ;;  %14691 = vst [vmem:[#allocation13_spill] sm:$0xff] %v12067_v13 }
  0xd5   :  { %8463 = vmatprep.mubr.f32.mxu0 %v11897_v23  ;;  %9237 = vmatprep.mubr.f32.mxu1 %v11902_v24 }
  0xd6   :  { %10197 = vmatprep.subr.bf16.mxu1 %v11878_v20 }
  0xd8   :  { %8464 = vmatmul.mubr.f32.gmra.mrb[18].mxu0 %v11912_v25  ;;  %9238 = vmatmul.mubr.f32.gmra.mrb[18].mxu1 %v11917_v26 }
  0xd9   :  { %8466 = vmatprep.mubr.f32.mxu0 %v11922_v27  ;;  %9240 = vmatprep.mubr.f32.mxu1 %v11927_v28 }
  0xdc   :  { %8467 = vmatmul.mubr.f32.gmra.mrb[20].mxu0 %v11937_v29  ;;  %9241 = vmatmul.mubr.f32.gmra.mrb[20].mxu1 %v11942_v30 }
  0xdd   :  { %8469 = vmatprep.mubr.f32.mxu0 %v11947_v31  ;;  %9243 = vmatprep.mubr.f32.mxu1 %v11952_v32 }
  0xe0   :  { %8470 = vmatmul.mubr.f32.gmra.mrb[22].mxu0 %v11961_v34  ;;  %9244 = vmatmul.mubr.f32.gmra.mrb[22].mxu1 %v11966_v36 }
  0xe1   :  { %8472 = vmatprep.mubr.f32.mxu0 %v11971_v37  ;;  %9246 = vmatprep.mubr.f32.mxu1 %v11976_v42 }
  0xe4   :  { %8473 = vmatmul.mubr.f32.gmra.mrb[24].mxu0 %v11985_v43  ;;  %9247 = vmatmul.mubr.f32.gmra.mrb[24].mxu1 %v11990_v44 }
  0xe5   :  { %8475 = vmatprep.mubr.f32.mxu0 %v11995_v49  ;;  %9249 = vmatprep.mubr.f32.mxu1 %v12000_v50 }
  0xe8   :  { %8476 = vmatmul.mubr.f32.gmra.mrb[26].mxu0 %v12009_v51  ;;  %9250 = vmatmul.mubr.f32.gmra.mrb[26].mxu1 %v12014_v56 }
  0xe9   :  { %8478 = vmatprep.mubr.f32.mxu0 %v12019_v57  ;;  %9252 = vmatprep.mubr.f32.mxu1 %v12024_v58 }
  0xec   :  { %8479 = vmatmul.mubr.f32.gmra.mrb[28].mxu0 %v12033_v63  ;;  %9253 = vmatmul.mubr.f32.gmra.mrb[28].mxu1 %v12038_v0 }
  0xed   :  { %8481 = vmatprep.mubr.f32.mxu0 %v12043_v1  ;;  %9255 = vmatprep.mubr.f32.mxu1 %v12048_v6  ;;  %v12086_v6 = vld [vmem:[%s14521_s0 + $0x25a] sm:$0xff]  ;;  %v6769_v1 = vld [vmem:[%s14522_s1 + $0x228] sm:$0xff] }
  0xee   :  { %14694 = vst [vmem:[#allocation16_spill] sm:$0xff] %v12086_v6 }
  0xf0   :  { %8482 = vmatmul.mubr.f32.gmra.mrb[30].mxu0 %v12057_v7  ;;  %9256 = vmatmul.mubr.f32.gmra.mrb[30].mxu1 %v12062_v8  ;;  %v12091_v7 = vld [vmem:[%s14521_s0 + $0x112] sm:$0xff]  ;;  %v12110_v8 = vld [vmem:[%s14521_s0 + $0x26a] sm:$0xff] }
  0xf1   :  { %8484 = vmatprep.mubr.f32.mxu0 %v12067_v13  ;;  %9258 = vmatprep.mubr.f32.mxu1 %v12072_v14  ;;  %14695 = vst [vmem:[#allocation17_spill] sm:$0xff] %v12091_v7  ;;  %v12096_v13 = vld [vmem:[%s14521_s0 + $0x262] sm:$0xff]  ;;  %v12105_v14 = vld [vmem:[%s14521_s0 + $0x11a] sm:$0xff] }
  0xf2   :  { %14696 = vst [vmem:[#allocation18_spill] sm:$0xff] %v12096_v13 }
  0xf4   :  { %8485 = vmatmul.mubr.f32.gmra.mrb[32].mxu0 %v12081_v15  ;;  %9259 = vmatmul.mubr.f32.gmra.mrb[32].mxu1 %v12086_v6  ;;  %v6766_v15 = vld [vmem:[%s14522_s1 + $0x210] sm:$0xff]  ;;  %v6768_v6 = vld [vmem:[%s14522_s1 + $0x220] sm:$0xff] }
  0xf5   :  { %8487 = vmatprep.mubr.f32.mxu0 %v12091_v7  ;;  %9261 = vmatprep.mubr.f32.mxu1 %v12096_v13  ;;  %v6767_v7 = vld [vmem:[%s14522_s1 + $0x218] sm:$0xff] }
  0xf6   :  { %v9912_v13 = vpack.c.bf16 %v6767_v7, %v6766_v15  ;;  %v7043_v7 = vld [vmem:[%s14521_s0 + $0x19b] sm:$0xff]  ;;  %v6790_v15 = vld [vmem:[%s14522_s1 + $0x2d0] sm:$0xff] }
  0xf8   :  { %8488 = vmatmul.mubr.f32.gmra.mrb[34].mxu0 %v12105_v14  ;;  %9262 = vmatmul.mubr.f32.gmra.mrb[34].mxu1 %v12110_v8 }
  0xf9   :  { %8522 = vmatprep.mubr.f32.mxu0 %v11661_v33  ;;  %9296 = vmatprep.mubr.f32.mxu1 %v11666_v35  ;;  %v9916_v33 = vpack.c.bf16 %v6769_v1, %v6768_v6  ;;  %v6770_v35 = vld [vmem:[%s14522_s1 + $0x230] sm:$0xff]  ;;  %v6789_v1 = vld [vmem:[%s14522_s1 + $0x2c8] sm:$0xff] }
  0xfa   :  { %v1331_v6 = vld [vmem:[%s14521_s0 + $0x4b] sm:$0xff] }
  0xfc   :  { %8523 = vmatmul.mubr.f32.vlgmr.msra.gmra.mrb[0].mxu0 %v11679_v38  ;;  %9297 = vmatmul.mubr.f32.vlgmr.msra.gmra.mrb[0].mxu1 %v11684_v39  ;;  %v6771_v38 = vld [vmem:[%s14522_s1 + $0x238] sm:$0xff] }
  0xfd   :  { %9911 = vmatpush3.bf16.msra.mxu0 %v11878_v20  ;;  %8525 = vmatprep.mubr.f32.mxu0 %v11690_v40  ;;  %v9920_v39 = vpack.c.bf16 %v6771_v38, %v6770_v35  ;;  %v6772_v40 = vld [vmem:[%s14522_s1 + $0x240] sm:$0xff]  ;;  %v7045_v38 = vld [vmem:[%s14521_s0 + $0x1ab] sm:$0xff] }
  0xfe   :  { %9299 = vmatprep.mubr.f32.mxu1 %v11695_v41  ;;  %9913 = vmatprep.subr.bf16.mxu0 %v9912_v13  ;;  %v6773_v41 = vld [vmem:[%s14522_s1 + $0x248] sm:$0xff]  ;;  %v1333_v35 = vld [vmem:[%s14521_s0 + $0x5b] sm:$0xff] }
  0xff   :  { %10199 = vmatpush3.bf16.msra.mxu1 %v11878_v20  ;;  %v7018_v20 = vld [vmem:[%s14521_s0 + $0x272] sm:$0xff] }
 0x100   :  { %8526 = vmatmul.mubr.f32.gmra.mrb[2].mxu0 %v11711_v45  ;;  %9300 = vmatmul.mubr.f32.gmra.mrb[2].mxu1 %v11716_v46  ;;  %v9924_v45 = vpack.c.bf16 %v6773_v41, %v6772_v40  ;;  %v6774_v46 = vld [vmem:[%s14522_s1 + $0x250] sm:$0xff] }
 0x101   :  { %8528 = vmatprep.mubr.f32.mxu0 %v11721_v47  ;;  %9302 = vmatprep.mubr.f32.mxu1 %v11726_v48  ;;  %v6775_v47 = vld [vmem:[%s14522_s1 + $0x258] sm:$0xff] }
 0x102   :  { %9915 = vmatpush3.bf16.msra.mxu0 %v9912_v13  ;;  %10201 = vmatprep.subr.bf16.mxu1 %v9912_v13  ;;  %v9928_v48 = vpack.c.bf16 %v6775_v47, %v6774_v46  ;;  %v7046_v40 = vld [vmem:[%s14521_s0 + $0x1b3] sm:$0xff]  ;;  %v6793_v46 = vld [vmem:[%s14522_s1 + $0x2e8] sm:$0xff] }
 0x103   :  { %9917 = vmatprep.subr.bf16.mxu0 %v9916_v33  ;;  %10203 = vmatpush3.bf16.msra.mxu1 %v9912_v13  ;;  %v7044_v13 = vld [vmem:[%s14521_s0 + $0x1a3] sm:$0xff]  ;;  %v1335_v47 = vld [vmem:[%s14521_s0 + $0x6b] sm:$0xff] }
 0x104   :  { %8529 = vmatmul.mubr.f32.gmra.mrb[4].mxu0 %v11741_v52  ;;  %9303 = vmatmul.mubr.f32.gmra.mrb[4].mxu1 %v11746_v53  ;;  %v6776_v52 = vld [vmem:[%s14522_s1 + $0x260] sm:$0xff]  ;;  %v6777_v53 = vld [vmem:[%s14522_s1 + $0x268] sm:$0xff] }
 0x105   :  { %8531 = vmatprep.mubr.f32.mxu0 %v11751_v54  ;;  %9305 = vmatprep.mubr.f32.mxu1 %v11756_v55  ;;  %v9932_v54 = vpack.c.bf16 %v6777_v53, %v6776_v52  ;;  %v6778_v55 = vld [vmem:[%s14522_s1 + $0x270] sm:$0xff]  ;;  %v7048_v53 = vld [vmem:[%s14521_s0 + $0x1c3] sm:$0xff] }
 0x106   :  { %9919 = vmatpush3.bf16.msra.mxu0 %v9916_v33  ;;  %10205 = vmatprep.subr.bf16.mxu1 %v9916_v33  ;;  %v1336_v52 = vld [vmem:[%s14521_s0 + $0x73] sm:$0xff] }
 0x107   :  { %9921 = vmatprep.subr.bf16.mxu0 %v9920_v39  ;;  %10207 = vmatpush3.bf16.msra.mxu1 %v9916_v33  ;;  %v6791_v33 = vld [vmem:[%s14522_s1 + $0x2d8] sm:$0xff] }
 0x108   :  { %8532 = vmatmul.mubr.f32.gmra.mrb[6].mxu0 %v11771_v59  ;;  %9306 = vmatmul.mubr.f32.gmra.mrb[6].mxu1 %v11776_v60  ;;  %v6779_v59 = vld [vmem:[%s14522_s1 + $0x278] sm:$0xff]  ;;  %v9960_v41 = vpack.c.bf16 %v6791_v33, %v6790_v15  ;;  %v1359_v15 = vld [vmem:[%s14521_s0 + $0x12b] sm:$0xff] }
 0x109   :  { %8534 = vmatprep.mubr.f32.mxu0 %v11781_v61  ;;  %9308 = vmatprep.mubr.f32.mxu1 %v11786_v62  ;;  %v9936_v60 = vpack.c.bf16 %v6779_v59, %v6778_v55  ;;  %v6780_v61 = vld [vmem:[%s14522_s1 + $0x280] sm:$0xff]  ;;  %v6781_v62 = vld [vmem:[%s14522_s1 + $0x288] sm:$0xff]  ;;  %v6794_v55 = vld [vmem:[%s14522_s1 + $0x2f0] sm:$0xff] }
 0x10a   :  { %9923 = vmatpush3.bf16.msra.mxu0 %v9920_v39  ;;  %10209 = vmatprep.subr.bf16.mxu1 %v9920_v39  ;;  %v6795_v59 = vld [vmem:[%s14522_s1 + $0x2f8] sm:$0xff] }
 0x10b   :  { %9925 = vmatprep.subr.bf16.mxu0 %v9924_v45  ;;  %10211 = vmatpush3.bf16.msra.mxu1 %v9920_v39  ;;  %v1334_v39 = vld [vmem:[%s14521_s0 + $0x63] sm:$0xff]  ;;  %v7071_v33 = vld [vmem:[%s14521_s0 + $0x27b] sm:$0xff] }
 0x10c   :  { %8535 = vmatmul.mubr.f32.gmra.mrb[8].mxu0 %v11801_v2  ;;  %9309 = vmatmul.mubr.f32.gmra.mrb[8].mxu1 %v11806_v3  ;;  %v12194_v2 = vpack.c.bf16 %v6781_v62, %v6780_v61  ;;  %v14697_v3 = vld [vmem:[#allocation9_spill] sm:$0xff] }
 0x10d   :  { %8537 = vmatprep.mubr.f32.mxu0 %v11811_v4  ;;  %9311 = vmatprep.mubr.f32.mxu1 %v11816_v5  ;;  %v14698_v4 = vld [vmem:[#allocation10_spill] sm:$0xff]  ;;  %v14699_v5 = vld [vmem:[#allocation11_spill] sm:$0xff]  ;;  %v1338_v62 = vld [vmem:[%s14521_s0 + $0x83] sm:$0xff] }
 0x10e   :  { %9927 = vmatpush3.bf16.msra.mxu0 %v9924_v45  ;;  %10213 = vmatprep.subr.bf16.mxu1 %v9924_v45  ;;  %v7049_v61 = vld [vmem:[%s14521_s0 + $0x1cb] sm:$0xff] }
 0x10f   :  { %9929 = vmatprep.subr.bf16.mxu0 %v9928_v48  ;;  %10215 = vmatpush3.bf16.msra.mxu1 %v9924_v45  ;;  %v6792_v45 = vld [vmem:[%s14522_s1 + $0x2e0] sm:$0xff] }
 0x110   :  { %8538 = vmatmul.mubr.f32.gmra.mrb[10].mxu0 %v11831_v9  ;;  %9312 = vmatmul.mubr.f32.gmra.mrb[10].mxu1 %v11836_v10  ;;  %v14700_v9 = vld [vmem:[#allocation12_spill] sm:$0xff]  ;;  %v14701_v10 = vld [vmem:[#allocation13_spill] sm:$0xff] }
 0x111   :  { %8540 = vmatprep.mubr.f32.mxu0 %v11841_v11  ;;  %9314 = vmatprep.mubr.f32.mxu1 %v11846_v12  ;;  %v14702_v11 = vld [vmem:[#allocation14_spill] sm:$0xff]  ;;  %v14703_v12 = vld [vmem:[#allocation15_spill] sm:$0xff] }
 0x112   :  { %9931 = vmatpush3.bf16.msra.mxu0 %v9928_v48  ;;  %10217 = vmatprep.subr.bf16.mxu1 %v9928_v48 }
 0x113   :  { %9933 = vmatprep.subr.bf16.mxu0 %v9932_v54  ;;  %10219 = vmatpush3.bf16.msra.mxu1 %v9928_v48  ;;  %v7047_v48 = vld [vmem:[%s14521_s0 + $0x1bb] sm:$0xff] }
 0x114   :  { %8541 = vmatmul.mubr.f32.gmra.mrb[12].mxu0 %v11861_v16  ;;  %9315 = vmatmul.mubr.f32.gmra.mrb[12].mxu1 %v11866_v17  ;;  %v14704_v16 = vld [vmem:[#allocation16_spill] sm:$0xff]  ;;  %v14705_v17 = vld [vmem:[#allocation17_spill] sm:$0xff] }
 0x115   :  { %8543 = vmatprep.mubr.f32.mxu0 %v11871_v18  ;;  %9317 = vmatprep.mubr.f32.mxu1 %v11876_v19  ;;  %v14706_v18 = vld [vmem:[#allocation18_spill] sm:$0xff]  ;;  %v1024_v19 = vld [vmem:[%s14521_s0 + $0x122] sm:$0xff] }
 0x116   :  { %9935 = vmatpush3.bf16.msra.mxu0 %v9932_v54  ;;  %10221 = vmatprep.subr.bf16.mxu1 %v9932_v54 }
 0x117   :  { %9937 = vmatprep.subr.bf16.mxu0 %v9936_v60  ;;  %10223 = vmatpush3.bf16.msra.mxu1 %v9932_v54  ;;  %v9964_v54 = vpack.c.bf16 %v6793_v46, %v6792_v45  ;;  %v7089_v45 = vld [vmem:[%s14521_s0 + $0x16c] sm:$0xff]  ;;  %v12539_v46 = vld [vmem:[%s14521_s0 + $0x24] sm:$0xff] }
 0x118   :  { %8544 = vmatmul.mubr.f32.gmra.mrb[14].mxu0 %v11887_v21  ;;  %9318 = vmatmul.mubr.f32.gmra.mrb[14].mxu1 %v11892_v22  ;;  %v1025_v21 = vld [vmem:[%s14521_s0 + $0x12a] sm:$0xff]  ;;  %v7019_v22 = vld [vmem:[%s14521_s0 + $0x27a] sm:$0xff] }
 0x119   :  { %8546 = vmatprep.mubr.f32.mxu0 %v11897_v23  ;;  %9320 = vmatprep.mubr.f32.mxu1 %v11902_v24  ;;  %v1324_v23 = vld [vmem:[%s14521_s0 + $0x13] sm:$0xff]  ;;  %v7036_v24 = vld [vmem:[%s14521_s0 + $0x163] sm:$0xff] }
 0x11a   :  { %9939 = vmatpush3.bf16.msra.mxu0 %v9936_v60  ;;  %10225 = vmatprep.subr.bf16.mxu1 %v9936_v60 }
 0x11b   :  { %10227 = vmatpush3.bf16.msra.mxu1 %v9936_v60  ;;  %9941 = vmatprep.subr.bf16.mxu0 %v12194_v2  ;;  %v1337_v60 = vld [vmem:[%s14521_s0 + $0x7b] sm:$0xff] }
 0x11c   :  { %8547 = vmatmul.mubr.f32.gmra.mrb[16].mxu0 %v11912_v25  ;;  %9321 = vmatmul.mubr.f32.gmra.mrb[16].mxu1 %v11917_v26  ;;  %v6782_v25 = vld [vmem:[%s14522_s1 + $0x290] sm:$0xff]  ;;  %v6783_v26 = vld [vmem:[%s14522_s1 + $0x298] sm:$0xff] }
 0x11d   :  { %8549 = vmatprep.mubr.f32.mxu0 %v11922_v27  ;;  %9323 = vmatprep.mubr.f32.mxu1 %v11927_v28  ;;  %v1325_v27 = vld [vmem:[%s14521_s0 + $0x1b] sm:$0xff]  ;;  %v7037_v28 = vld [vmem:[%s14521_s0 + $0x16b] sm:$0xff] }
 0x11e   :  { %10229 = vmatprep.subr.bf16.mxu1 %v12194_v2 }
 0x120   :  { %8550 = vmatmul.mubr.f32.gmra.mrb[18].mxu0 %v11937_v29  ;;  %9324 = vmatmul.mubr.f32.gmra.mrb[18].mxu1 %v11942_v30  ;;  %v1326_v29 = vld [vmem:[%s14521_s0 + $0x23] sm:$0xff]  ;;  %v9944_v30 = vpack.c.bf16 %v6783_v26, %v6782_v25  ;;  %v1345_v25 = vld [vmem:[%s14521_s0 + $0xbb] sm:$0xff]  ;;  %v7057_v26 = vld [vmem:[%s14521_s0 + $0x20b] sm:$0xff] }
 0x121   :  { %8552 = vmatprep.mubr.f32.mxu0 %v11947_v31  ;;  %9326 = vmatprep.mubr.f32.mxu1 %v11952_v32  ;;  %v7038_v31 = vld [vmem:[%s14521_s0 + $0x173] sm:$0xff]  ;;  %v6784_v32 = vld [vmem:[%s14522_s1 + $0x2a0] sm:$0xff] }
 0x124   :  { %8553 = vmatmul.mubr.f32.gmra.mrb[20].mxu0 %v11961_v34  ;;  %9327 = vmatmul.mubr.f32.gmra.mrb[20].mxu1 %v11966_v36  ;;  %v6785_v34 = vld [vmem:[%s14522_s1 + $0x2a8] sm:$0xff] }
 0x125   :  { %8555 = vmatprep.mubr.f32.mxu0 %v11971_v37  ;;  %9329 = vmatprep.mubr.f32.mxu1 %v11976_v42  ;;  %v1327_v36 = vld [vmem:[%s14521_s0 + $0x2b] sm:$0xff]  ;;  %v7039_v37 = vld [vmem:[%s14521_s0 + $0x17b] sm:$0xff]  ;;  %v1328_v42 = vld [vmem:[%s14521_s0 + $0x33] sm:$0xff] }
 0x128   :  { %8556 = vmatmul.mubr.f32.gmra.mrb[22].mxu0 %v11985_v43  ;;  %9330 = vmatmul.mubr.f32.gmra.mrb[22].mxu1 %v11990_v44  ;;  %v7040_v43 = vld [vmem:[%s14521_s0 + $0x183] sm:$0xff]  ;;  %v9948_v44 = vpack.c.bf16 %v6785_v34, %v6784_v32  ;;  %v1349_v34 = vld [vmem:[%s14521_s0 + $0xdb] sm:$0xff] }
 0x129   :  { %8558 = vmatprep.mubr.f32.mxu0 %v11995_v49  ;;  %9332 = vmatprep.mubr.f32.mxu1 %v12000_v50  ;;  %v6786_v49 = vld [vmem:[%s14522_s1 + $0x2b0] sm:$0xff]  ;;  %v6787_v50 = vld [vmem:[%s14522_s1 + $0x2b8] sm:$0xff]  ;;  %v7060_v32 = vld [vmem:[%s14521_s0 + $0x223] sm:$0xff] }
 0x12c   :  { %8559 = vmatmul.mubr.f32.gmra.mrb[24].mxu0 %v12009_v51  ;;  %9333 = vmatmul.mubr.f32.gmra.mrb[24].mxu1 %v12014_v56  ;;  %v1329_v51 = vld [vmem:[%s14521_s0 + $0x3b] sm:$0xff]  ;;  %v7041_v56 = vld [vmem:[%s14521_s0 + $0x18b] sm:$0xff] }
 0x12d   :  { %8561 = vmatprep.mubr.f32.mxu0 %v12019_v57  ;;  %9335 = vmatprep.mubr.f32.mxu1 %v12024_v58  ;;  %v1330_v57 = vld [vmem:[%s14521_s0 + $0x43] sm:$0xff]  ;;  %v7042_v58 = vld [vmem:[%s14521_s0 + $0x193] sm:$0xff] }
 0x130   :  { %8562 = vmatmul.mubr.f32.gmra.mrb[26].mxu0 %v12033_v63  ;;  %9336 = vmatmul.mubr.f32.gmra.mrb[26].mxu1 %v12038_v0  ;;  %v9952_v63 = vpack.c.bf16 %v6787_v50, %v6786_v49  ;;  %v6788_v0 = vld [vmem:[%s14522_s1 + $0x2c0] sm:$0xff]  ;;  %v1352_v49 = vld [vmem:[%s14521_s0 + $0xf3] sm:$0xff] }
 0x131   :  { %8564 = vmatprep.mubr.f32.mxu0 %v14697_v3  ;;  %9338 = vmatprep.mubr.f32.mxu1 %v14698_v4  ;;  %v9968_v3 = vpack.c.bf16 %v6795_v59, %v6794_v55  ;;  %v6796_v4 = vld [vmem:[%s14522_s1 + $0x300] sm:$0xff]  ;;  %v12568_v59 = vld [vmem:[%s14521_s0 + $0x34] sm:$0xff] }
 0x132   :  { %v7064_v50 = vld [vmem:[%s14521_s0 + $0x243] sm:$0xff] }
 0x133   :  { %v12562_v55 = vld [vmem:[%s14521_s0 + $0x17c] sm:$0xff] }
 0x134   :  { %8565 = vmatmul.mubr.f32.gmra.mrb[28].mxu0 %v14699_v5  ;;  %9339 = vmatmul.mubr.f32.gmra.mrb[28].mxu1 %v14700_v9  ;;  %v6797_v5 = vld [vmem:[%s14522_s1 + $0x308] sm:$0xff] }
 0x135   :  { %8567 = vmatprep.mubr.f32.mxu0 %v14701_v10  ;;  %9341 = vmatprep.mubr.f32.mxu1 %v14702_v11  ;;  %v1339_v9 = vld [vmem:[%s14521_s0 + $0x8b] sm:$0xff]  ;;  %v7051_v10 = vld [vmem:[%s14521_s0 + $0x1db] sm:$0xff]  ;;  %v1340_v11 = vld [vmem:[%s14521_s0 + $0x93] sm:$0xff] }
 0x138   :  { %8568 = vmatmul.mubr.f32.gmra.mrb[30].mxu0 %v14703_v12  ;;  %9342 = vmatmul.mubr.f32.gmra.mrb[30].mxu1 %v14704_v16  ;;  %v7052_v12 = vld [vmem:[%s14521_s0 + $0x1e3] sm:$0xff]  ;;  %v12400_v16 = vpack.c.bf16 %v6797_v5, %v6796_v4  ;;  %v12594_v4 = vld [vmem:[%s14521_s0 + $0x18c] sm:$0xff] }
 0x139   :  { %8570 = vmatprep.mubr.f32.mxu0 %v14705_v17  ;;  %9344 = vmatprep.mubr.f32.mxu1 %v14706_v18  ;;  %v1341_v17 = vld [vmem:[%s14521_s0 + $0x9b] sm:$0xff]  ;;  %v7053_v18 = vld [vmem:[%s14521_s0 + $0x1eb] sm:$0xff] }
 0x13a   :  { %v12599_v5 = vld [vmem:[%s14521_s0 + $0x44] sm:$0xff] }
 0x13c   :  { %8571 = vmatmul.mubr.f32.gmra.mrb[32].mxu0 %v12105_v14  ;;  %9345 = vmatmul.mubr.f32.gmra.mrb[32].mxu1 %v12110_v8  ;;  %v1332_v8 = vld [vmem:[%s14521_s0 + $0x53] sm:$0xff]  ;;  %v9956_v14 = vpack.c.bf16 %v6789_v1, %v6788_v0  ;;  %v7067_v0 = vld [vmem:[%s14521_s0 + $0x25b] sm:$0xff] }
 0x13d   :  { %8573 = vmatprep.mubr.f32.mxu0 %v1024_v19  ;;  %9347 = vmatprep.mubr.f32.mxu1 %v7018_v20  ;;  %v1342_v19 = vld [vmem:[%s14521_s0 + $0xa3] sm:$0xff]  ;;  %v7054_v20 = vld [vmem:[%s14521_s0 + $0x1f3] sm:$0xff] }
 0x13e   :  { %v1356_v1 = vld [vmem:[%s14521_s0 + $0x113] sm:$0xff] }
 0x140   :  { %8574 = vmatmul.mubr.f32.gmra.mrb[34].mxu0 %v1025_v21  ;;  %9348 = vmatmul.mubr.f32.gmra.mrb[34].mxu1 %v7019_v22  ;;  %v1343_v21 = vld [vmem:[%s14521_s0 + $0xab] sm:$0xff]  ;;  %v7055_v22 = vld [vmem:[%s14521_s0 + $0x1fb] sm:$0xff] }
 0x141   :  { %8608 = vmatprep.mubr.f32.mxu0 %v1324_v23  ;;  %9382 = vmatprep.mubr.f32.mxu1 %v7036_v24  ;;  %v1344_v23 = vld [vmem:[%s14521_s0 + $0xb3] sm:$0xff]  ;;  %v7056_v24 = vld [vmem:[%s14521_s0 + $0x203] sm:$0xff] }
 0x144   :  { %8609 = vmatmul.mubr.f32.vlgmr.msra.gmra.mrb[0].mxu0 %v1325_v27  ;;  %9383 = vmatmul.mubr.f32.vlgmr.msra.gmra.mrb[0].mxu1 %v7037_v28  ;;  %v1346_v27 = vld [vmem:[%s14521_s0 + $0xc3] sm:$0xff]  ;;  %v7058_v28 = vld [vmem:[%s14521_s0 + $0x213] sm:$0xff] }
 0x145   :  { %9943 = vmatpush3.bf16.msra.mxu0 %v12194_v2  ;;  %8611 = vmatprep.mubr.f32.mxu0 %v1326_v29  ;;  %v1347_v29 = vld [vmem:[%s14521_s0 + $0xcb] sm:$0xff] }
 0x146   :  { %9385 = vmatprep.mubr.f32.mxu1 %v7038_v31  ;;  %9945 = vmatprep.subr.bf16.mxu0 %v9944_v30  ;;  %v1348_v31 = vld [vmem:[%s14521_s0 + $0xd3] sm:$0xff] }
 0x147   :  { %10231 = vmatpush3.bf16.msra.mxu1 %v12194_v2  ;;  %v7050_v2 = vld [vmem:[%s14521_s0 + $0x1d3] sm:$0xff] }
 0x148   :  { %8612 = vmatmul.mubr.f32.gmra.mrb[2].mxu0 %v1327_v36  ;;  %9386 = vmatmul.mubr.f32.gmra.mrb[2].mxu1 %v7039_v37  ;;  %v7061_v36 = vld [vmem:[%s14521_s0 + $0x22b] sm:$0xff]  ;;  %v1350_v37 = vld [vmem:[%s14521_s0 + $0xe3] sm:$0xff] }
 0x149   :  { %8614 = vmatprep.mubr.f32.mxu0 %v1328_v42  ;;  %9388 = vmatprep.mubr.f32.mxu1 %v7040_v43  ;;  %v7062_v42 = vld [vmem:[%s14521_s0 + $0x233] sm:$0xff]  ;;  %v1351_v43 = vld [vmem:[%s14521_s0 + $0xeb] sm:$0xff] }
 0x14a   :  { %9947 = vmatpush3.bf16.msra.mxu0 %v9944_v30  ;;  %10233 = vmatprep.subr.bf16.mxu1 %v9944_v30 }
 0x14b   :  { %9949 = vmatprep.subr.bf16.mxu0 %v9948_v44  ;;  %10235 = vmatpush3.bf16.msra.mxu1 %v9944_v30  ;;  %v7059_v30 = vld [vmem:[%s14521_s0 + $0x21b] sm:$0xff] }
 0x14c   :  { %8615 = vmatmul.mubr.f32.gmra.mrb[4].mxu0 %v1329_v51  ;;  %9389 = vmatmul.mubr.f32.gmra.mrb[4].mxu1 %v7041_v56  ;;  %v1353_v51 = vld [vmem:[%s14521_s0 + $0xfb] sm:$0xff]  ;;  %v7065_v56 = vld [vmem:[%s14521_s0 + $0x24b] sm:$0xff] }
 0x14d   :  { %8617 = vmatprep.mubr.f32.mxu0 %v1330_v57  ;;  %9391 = vmatprep.mubr.f32.mxu1 %v7042_v58  ;;  %v1354_v57 = vld [vmem:[%s14521_s0 + $0x103] sm:$0xff]  ;;  %v7066_v58 = vld [vmem:[%s14521_s0 + $0x253] sm:$0xff] }
 0x14e   :  { %9951 = vmatpush3.bf16.msra.mxu0 %v9948_v44  ;;  %10237 = vmatprep.subr.bf16.mxu1 %v9948_v44 }
 0x14f   :  { %9953 = vmatprep.subr.bf16.mxu0 %v9952_v63  ;;  %10239 = vmatpush3.bf16.msra.mxu1 %v9948_v44  ;;  %v7063_v44 = vld [vmem:[%s14521_s0 + $0x23b] sm:$0xff] }
 0x150   :  { %8618 = vmatmul.mubr.f32.gmra.mrb[6].mxu0 %v1331_v6  ;;  %9392 = vmatmul.mubr.f32.gmra.mrb[6].mxu1 %v7043_v7  ;;  %v7068_v6 = vld [vmem:[%s14521_s0 + $0x263] sm:$0xff]  ;;  %v1357_v7 = vld [vmem:[%s14521_s0 + $0x11b] sm:$0xff] }
 0x151   :  { %8620 = vmatprep.mubr.f32.mxu0 %v1332_v8  ;;  %9394 = vmatprep.mubr.f32.mxu1 %v7044_v13  ;;  %v7069_v8 = vld [vmem:[%s14521_s0 + $0x26b] sm:$0xff]  ;;  %v1358_v13 = vld [vmem:[%s14521_s0 + $0x123] sm:$0xff] }
 0x152   :  { %9955 = vmatpush3.bf16.msra.mxu0 %v9952_v63  ;;  %10241 = vmatprep.subr.bf16.mxu1 %v9952_v63 }
 0x153   :  { %9957 = vmatprep.subr.bf16.mxu0 %v9956_v14  ;;  %10243 = vmatpush3.bf16.msra.mxu1 %v9952_v63  ;;  %v1355_v63 = vld [vmem:[%s14521_s0 + $0x10b] sm:$0xff] }
 0x154   :  { %8621 = vmatmul.mubr.f32.gmra.mrb[8].mxu0 %v1333_v35  ;;  %9395 = vmatmul.mubr.f32.gmra.mrb[8].mxu1 %v7045_v38  ;;  %v1658_v35 = vld [vmem:[%s14521_s0 + $0x14] sm:$0xff]  ;;  %v7088_v38 = vld [vmem:[%s14521_s0 + $0x164] sm:$0xff] }
 0x155   :  { %8623 = vmatprep.mubr.f32.mxu0 %v1334_v39  ;;  %9397 = vmatprep.mubr.f32.mxu1 %v7046_v40  ;;  %v6798_v39 = vld [vmem:[%s14522_s1 + $0x310] sm:$0xff]  ;;  %v6799_v40 = vld [vmem:[%s14522_s1 + $0x318] sm:$0xff] }
 0x156   :  { %9959 = vmatpush3.bf16.msra.mxu0 %v9956_v14  ;;  %10245 = vmatprep.subr.bf16.mxu1 %v9956_v14 }
 0x157   :  { %9961 = vmatprep.subr.bf16.mxu0 %v9960_v41  ;;  %10247 = vmatpush3.bf16.msra.mxu1 %v9956_v14  ;;  %v7070_v14 = vld [vmem:[%s14521_s0 + $0x273] sm:$0xff] }
 0x158   :  { %8624 = vmatmul.mubr.f32.gmra.mrb[10].mxu0 %v1335_v47  ;;  %9398 = vmatmul.mubr.f32.gmra.mrb[10].mxu1 %v7047_v48  ;;  %v9976_v47 = vpack.c.bf16 %v6799_v40, %v6798_v39  ;;  %v12544_v48 = vld [vmem:[%s14521_s0 + $0x174] sm:$0xff]  ;;  %v12815_v39 = vld [vmem:[%s14521_s0 + $0xbc] sm:$0xff]  ;;  %v12820_v40 = vld [vmem:[%s14521_s0 + $0x20c] sm:$0xff] }
 0x159   :  { %8626 = vmatprep.mubr.f32.mxu0 %v1336_v52  ;;  %9400 = vmatprep.mubr.f32.mxu1 %v7048_v53  ;;  %v6800_v52 = vld [vmem:[%s14522_s1 + $0x320] sm:$0xff]  ;;  %v6801_v53 = vld [vmem:[%s14522_s1 + $0x328] sm:$0xff] }
 0x15a   :  { %9963 = vmatpush3.bf16.msra.mxu0 %v9960_v41  ;;  %10249 = vmatprep.subr.bf16.mxu1 %v9960_v41 }
 0x15b   :  { %9965 = vmatprep.subr.bf16.mxu0 %v9964_v54  ;;  %10251 = vmatpush3.bf16.msra.mxu1 %v9960_v41  ;;  %v1659_v41 = vld [vmem:[%s14521_s0 + $0x1c] sm:$0xff] }
 0x15c   :  { %8627 = vmatmul.mubr.f32.gmra.mrb[12].mxu0 %v1337_v60  ;;  %9401 = vmatmul.mubr.f32.gmra.mrb[12].mxu1 %v7049_v61  ;;  %v12573_v60 = vld [vmem:[%s14521_s0 + $0x184] sm:$0xff]  ;;  %v9980_v61 = vpack.c.bf16 %v6801_v53, %v6800_v52  ;;  %v12844_v52 = vld [vmem:[%s14521_s0 + $0x21c] sm:$0xff]  ;;  %v12849_v53 = vld [vmem:[%s14521_s0 + $0xd4] sm:$0xff] }
 0x15d   :  { %8629 = vmatprep.mubr.f32.mxu0 %v1338_v62  ;;  %9403 = vmatprep.mubr.f32.mxu1 %v7050_v2  ;;  %v6802_v62 = vld [vmem:[%s14522_s1 + $0x330] sm:$0xff]  ;;  %v6803_v2 = vld [vmem:[%s14522_s1 + $0x338] sm:$0xff] }
 0x15e   :  { %9967 = vmatpush3.bf16.msra.mxu0 %v9964_v54  ;;  %10253 = vmatprep.subr.bf16.mxu1 %v9964_v54 }
 0x15f   :  { %9969 = vmatprep.subr.bf16.mxu0 %v9968_v3  ;;  %10255 = vmatpush3.bf16.msra.mxu1 %v9964_v54  ;;  %v12557_v54 = vld [vmem:[%s14521_s0 + $0x2c] sm:$0xff] }
 0x160   :  { %8630 = vmatmul.mubr.f32.gmra.mrb[14].mxu0 %v1339_v9  ;;  %9404 = vmatmul.mubr.f32.gmra.mrb[14].mxu1 %v7051_v10  ;;  %v12604_v9 = vld [vmem:[%s14521_s0 + $0x194] sm:$0xff]  ;;  %v9984_v10 = vpack.c.bf16 %v6803_v2, %v6802_v62  ;;  %v12863_v62 = vld [vmem:[%s14521_s0 + $0xdc] sm:$0xff]  ;;  %v12868_v2 = vld [vmem:[%s14521_s0 + $0x22c] sm:$0xff] }
 0x161   :  { %8632 = vmatprep.mubr.f32.mxu0 %v1340_v11  ;;  %9406 = vmatprep.mubr.f32.mxu1 %v7052_v12  ;;  %v6804_v11 = vld [vmem:[%s14522_s1 + $0x340] sm:$0xff]  ;;  %v6805_v12 = vld [vmem:[%s14522_s1 + $0x348] sm:$0xff] }
 0x162   :  { %9971 = vmatpush3.bf16.msra.mxu0 %v9968_v3  ;;  %10257 = vmatprep.subr.bf16.mxu1 %v9968_v3 }
 0x163   :  { %10259 = vmatpush3.bf16.msra.mxu1 %v9968_v3  ;;  %9973 = vmatprep.subr.bf16.mxu0 %v12400_v16  ;;  %v12589_v3 = vld [vmem:[%s14521_s0 + $0x3c] sm:$0xff] }
 0x164   :  { %8633 = vmatmul.mubr.f32.gmra.mrb[16].mxu0 %v1341_v17  ;;  %9407 = vmatmul.mubr.f32.gmra.mrb[16].mxu1 %v7053_v18  ;;  %v12624_v17 = vld [vmem:[%s14521_s0 + $0x19c] sm:$0xff]  ;;  %v12629_v18 = vld [vmem:[%s14521_s0 + $0x54] sm:$0xff] }
 0x165   :  { %8635 = vmatprep.mubr.f32.mxu0 %v1342_v19  ;;  %9409 = vmatprep.mubr.f32.mxu1 %v7054_v20  ;;  %v12634_v19 = vld [vmem:[%s14521_s0 + $0x1a4] sm:$0xff]  ;;  %v9988_v20 = vpack.c.bf16 %v6805_v12, %v6804_v11  ;;  %v12878_v11 = vld [vmem:[%s14521_s0 + $0x234] sm:$0xff]  ;;  %v12887_v12 = vld [vmem:[%s14521_s0 + $0xec] sm:$0xff] }
 0x166   :  { %10261 = vmatprep.subr.bf16.mxu1 %v12400_v16 }
 0x168   :  { %8636 = vmatmul.mubr.f32.gmra.mrb[18].mxu0 %v1343_v21  ;;  %9410 = vmatmul.mubr.f32.gmra.mrb[18].mxu1 %v7055_v22  ;;  %v6806_v21 = vld [vmem:[%s14522_s1 + $0x350] sm:$0xff]  ;;  %v6807_v22 = vld [vmem:[%s14522_s1 + $0x358] sm:$0xff] }
 0x169   :  { %8638 = vmatprep.mubr.f32.mxu0 %v1344_v23  ;;  %9412 = vmatprep.mubr.f32.mxu1 %v7056_v24  ;;  %v12649_v23 = vld [vmem:[%s14521_s0 + $0x5c] sm:$0xff]  ;;  %v12654_v24 = vld [vmem:[%s14521_s0 + $0x1ac] sm:$0xff] }
 0x16c   :  { %8639 = vmatmul.mubr.f32.gmra.mrb[20].mxu0 %v1345_v25  ;;  %9413 = vmatmul.mubr.f32.gmra.mrb[20].mxu1 %v7057_v26  ;;  %v12659_v25 = vld [vmem:[%s14521_s0 + $0x64] sm:$0xff]  ;;  %v12664_v26 = vld [vmem:[%s14521_s0 + $0x1b4] sm:$0xff] }
 0x16d   :  { %8641 = vmatprep.mubr.f32.mxu0 %v1346_v27  ;;  %9415 = vmatprep.mubr.f32.mxu1 %v7058_v28  ;;  %v9992_v27 = vpack.c.bf16 %v6807_v22, %v6806_v21  ;;  %v6808_v28 = vld [vmem:[%s14522_s1 + $0x360] sm:$0xff]  ;;  %v12897_v21 = vld [vmem:[%s14521_s0 + $0xf4] sm:$0xff] }
 0x16e   :  { %v12902_v22 = vld [vmem:[%s14521_s0 + $0x244] sm:$0xff] }
 0x170   :  { %8642 = vmatmul.mubr.f32.gmra.mrb[22].mxu0 %v1347_v29  ;;  %9416 = vmatmul.mubr.f32.gmra.mrb[22].mxu1 %v7059_v30  ;;  %v6809_v29 = vld [vmem:[%s14522_s1 + $0x368] sm:$0xff] }
 0x171   :  { %8644 = vmatprep.mubr.f32.mxu0 %v1348_v31  ;;  %9418 = vmatprep.mubr.f32.mxu1 %v7060_v32  ;;  %v12679_v30 = vld [vmem:[%s14521_s0 + $0x6c] sm:$0xff]  ;;  %v12684_v31 = vld [vmem:[%s14521_s0 + $0x1bc] sm:$0xff]  ;;  %v12689_v32 = vld [vmem:[%s14521_s0 + $0x74] sm:$0xff] }
 0x174   :  { %8645 = vmatmul.mubr.f32.gmra.mrb[24].mxu0 %v1349_v34  ;;  %9419 = vmatmul.mubr.f32.gmra.mrb[24].mxu1 %v7061_v36  ;;  %v12694_v34 = vld [vmem:[%s14521_s0 + $0x1c4] sm:$0xff]  ;;  %v9996_v36 = vpack.c.bf16 %v6809_v29, %v6808_v28  ;;  %v12916_v28 = vld [vmem:[%s14521_s0 + $0x24c] sm:$0xff] }
 0x175   :  { %8647 = vmatprep.mubr.f32.mxu0 %v1350_v37  ;;  %9421 = vmatprep.mubr.f32.mxu1 %v7062_v42  ;;  %v6810_v37 = vld [vmem:[%s14522_s1 + $0x370] sm:$0xff]  ;;  %v6811_v42 = vld [vmem:[%s14522_s1 + $0x378] sm:$0xff]  ;;  %v12921_v29 = vld [vmem:[%s14521_s0 + $0x104] sm:$0xff] }
 0x176   :  { %14707 = vst [vmem:[#allocation9_spill] sm:$0xff] %v12921_v29 }
 0x178   :  { %8648 = vmatmul.mubr.f32.gmra.mrb[26].mxu0 %v1351_v43  ;;  %9422 = vmatmul.mubr.f32.gmra.mrb[26].mxu1 %v7063_v44  ;;  %v12709_v43 = vld [vmem:[%s14521_s0 + $0x7c] sm:$0xff]  ;;  %v12714_v44 = vld [vmem:[%s14521_s0 + $0x1cc] sm:$0xff] }
 0x179   :  { %8650 = vmatprep.mubr.f32.mxu0 %v1352_v49  ;;  %9424 = vmatprep.mubr.f32.mxu1 %v7064_v50  ;;  %v12719_v49 = vld [vmem:[%s14521_s0 + $0x84] sm:$0xff]  ;;  %v12724_v50 = vld [vmem:[%s14521_s0 + $0x1d4] sm:$0xff] }
 0x17c   :  { %8651 = vmatmul.mubr.f32.gmra.mrb[28].mxu0 %v1353_v51  ;;  %9425 = vmatmul.mubr.f32.gmra.mrb[28].mxu1 %v7065_v56  ;;  %v10000_v51 = vpack.c.bf16 %v6811_v42, %v6810_v37  ;;  %v6812_v56 = vld [vmem:[%s14522_s1 + $0x380] sm:$0xff]  ;;  %v12935_v37 = vld [vmem:[%s14521_s0 + $0x10c] sm:$0xff] }
 0x17d   :  { %8653 = vmatprep.mubr.f32.mxu0 %v1354_v57  ;;  %9427 = vmatprep.mubr.f32.mxu1 %v7066_v58  ;;  %v6813_v57 = vld [vmem:[%s14522_s1 + $0x388] sm:$0xff]  ;;  %14709 = vst [vmem:[#allocation11_spill] sm:$0xff] %v12935_v37  ;;  %v12940_v42 = vld [vmem:[%s14521_s0 + $0x25c] sm:$0xff] }
 0x17e   :  { %v12739_v58 = vld [vmem:[%s14521_s0 + $0x8c] sm:$0xff]  ;;  %14710 = vst [vmem:[#allocation12_spill] sm:$0xff] %v12940_v42 }
 0x180   :  { %8654 = vmatmul.mubr.f32.gmra.mrb[30].mxu0 %v1355_v63  ;;  %9428 = vmatmul.mubr.f32.gmra.mrb[30].mxu1 %v7067_v0  ;;  %v12744_v63 = vld [vmem:[%s14521_s0 + $0x1dc] sm:$0xff]  ;;  %v12749_v0 = vld [vmem:[%s14521_s0 + $0x94] sm:$0xff] }
 0x181   :  { %8656 = vmatprep.mubr.f32.mxu0 %v1356_v1  ;;  %9430 = vmatprep.mubr.f32.mxu1 %v7068_v6  ;;  %v12754_v1 = vld [vmem:[%s14521_s0 + $0x1e4] sm:$0xff]  ;;  %v12756_v6 = vpack.c.bf16 %v6813_v57, %v6812_v56  ;;  %v12959_v57 = vld [vmem:[%s14521_s0 + $0x11c] sm:$0xff] }
 0x182   :  { %v12950_v56 = vld [vmem:[%s14521_s0 + $0x264] sm:$0xff]  ;;  %14713 = vst [vmem:[#allocation15_spill] sm:$0xff] %v12959_v57 }
 0x183   :  { %14712 = vst [vmem:[#allocation14_spill] sm:$0xff] %v12950_v56 }
 0x184   :  { %8657 = vmatmul.mubr.f32.gmra.mrb[32].mxu0 %v1357_v7  ;;  %9431 = vmatmul.mubr.f32.gmra.mrb[32].mxu1 %v7069_v8  ;;  %v12765_v7 = vld [vmem:[%s14521_s0 + $0x9c] sm:$0xff]  ;;  %v12770_v8 = vld [vmem:[%s14521_s0 + $0x1ec] sm:$0xff] }
 0x185   :  { %8659 = vmatprep.mubr.f32.mxu0 %v1358_v13  ;;  %9433 = vmatprep.mubr.f32.mxu1 %v7070_v14  ;;  %v12775_v13 = vld [vmem:[%s14521_s0 + $0xa4] sm:$0xff]  ;;  %v12780_v14 = vld [vmem:[%s14521_s0 + $0x1f4] sm:$0xff] }
 0x188   :  { %8660 = vmatmul.mubr.f32.gmra.mrb[34].mxu0 %v1359_v15  ;;  %9434 = vmatmul.mubr.f32.gmra.mrb[34].mxu1 %v7071_v33  ;;  %v12790_v15 = vld [vmem:[%s14521_s0 + $0xac] sm:$0xff]  ;;  %v12795_v33 = vld [vmem:[%s14521_s0 + $0x1fc] sm:$0xff] }
 0x189   :  { %8694 = vmatprep.mubr.f32.mxu0 %v1658_v35  ;;  %9468 = vmatprep.mubr.f32.mxu1 %v7088_v38  ;;  %v12800_v35 = vld [vmem:[%s14521_s0 + $0xb4] sm:$0xff]  ;;  %v12805_v38 = vld [vmem:[%s14521_s0 + $0x204] sm:$0xff] }
 0x18c   :  { %8695 = vmatmul.mubr.f32.vlgmr.msra.gmra.mrb[0].mxu0 %v1659_v41  ;;  %9469 = vmatmul.mubr.f32.vlgmr.msra.gmra.mrb[0].mxu1 %v7089_v45  ;;  %v12825_v41 = vld [vmem:[%s14521_s0 + $0xc4] sm:$0xff]  ;;  %v12830_v45 = vld [vmem:[%s14521_s0 + $0x214] sm:$0xff] }
 0x18d   :  { %9975 = vmatpush3.bf16.msra.mxu0 %v12400_v16  ;;  %8697 = vmatprep.mubr.f32.mxu0 %v12539_v46 }
 0x18e   :  { %9471 = vmatprep.mubr.f32.mxu1 %v12544_v48  ;;  %9977 = vmatprep.subr.bf16.mxu0 %v9976_v47 }
 0x18f   :  { %10263 = vmatpush3.bf16.msra.mxu1 %v12400_v16  ;;  %v12619_v16 = vld [vmem:[%s14521_s0 + $0x4c] sm:$0xff] }
 0x190   :  { %8698 = vmatmul.mubr.f32.gmra.mrb[2].mxu0 %v12557_v54  ;;  %9472 = vmatmul.mubr.f32.gmra.mrb[2].mxu1 %v12562_v55 }
 0x191   :  { %8700 = vmatprep.mubr.f32.mxu0 %v12568_v59  ;;  %9474 = vmatprep.mubr.f32.mxu1 %v12573_v60 }
 0x192   :  { %9979 = vmatpush3.bf16.msra.mxu0 %v9976_v47  ;;  %10265 = vmatprep.subr.bf16.mxu1 %v9976_v47 }
 0x193   :  { %9981 = vmatprep.subr.bf16.mxu0 %v9980_v61  ;;  %10267 = vmatpush3.bf16.msra.mxu1 %v9976_v47  ;;  %v12839_v47 = vld [vmem:[%s14521_s0 + $0xcc] sm:$0xff] }
 0x194   :  { %8701 = vmatmul.mubr.f32.gmra.mrb[4].mxu0 %v12589_v3  ;;  %9475 = vmatmul.mubr.f32.gmra.mrb[4].mxu1 %v12594_v4 }
 0x195   :  { %8703 = vmatprep.mubr.f32.mxu0 %v12599_v5  ;;  %9477 = vmatprep.mubr.f32.mxu1 %v12604_v9 }
 0x196   :  { %9983 = vmatpush3.bf16.msra.mxu0 %v9980_v61  ;;  %10269 = vmatprep.subr.bf16.mxu1 %v9980_v61 }
 0x197   :  { %9985 = vmatprep.subr.bf16.mxu0 %v9984_v10  ;;  %10271 = vmatpush3.bf16.msra.mxu1 %v9980_v61  ;;  %v12854_v61 = vld [vmem:[%s14521_s0 + $0x224] sm:$0xff] }
 0x198   :  { %8704 = vmatmul.mubr.f32.gmra.mrb[6].mxu0 %v12619_v16  ;;  %9478 = vmatmul.mubr.f32.gmra.mrb[6].mxu1 %v12624_v17 }
 0x199   :  { %8706 = vmatprep.mubr.f32.mxu0 %v12629_v18  ;;  %9480 = vmatprep.mubr.f32.mxu1 %v12634_v19 }
 0x19a   :  { %9987 = vmatpush3.bf16.msra.mxu0 %v9984_v10  ;;  %10273 = vmatprep.subr.bf16.mxu1 %v9984_v10 }
 0x19b   :  { %9989 = vmatprep.subr.bf16.mxu0 %v9988_v20  ;;  %10275 = vmatpush3.bf16.msra.mxu1 %v9984_v10  ;;  %v12873_v10 = vld [vmem:[%s14521_s0 + $0xe4] sm:$0xff] }
 0x19c   :  { %8707 = vmatmul.mubr.f32.gmra.mrb[8].mxu0 %v12649_v23  ;;  %9481 = vmatmul.mubr.f32.gmra.mrb[8].mxu1 %v12654_v24 }
 0x19d   :  { %8709 = vmatprep.mubr.f32.mxu0 %v12659_v25  ;;  %9483 = vmatprep.mubr.f32.mxu1 %v12664_v26 }
 0x19e   :  { %9991 = vmatpush3.bf16.msra.mxu0 %v9988_v20  ;;  %10277 = vmatprep.subr.bf16.mxu1 %v9988_v20 }
 0x19f   :  { %9993 = vmatprep.subr.bf16.mxu0 %v9992_v27  ;;  %10279 = vmatpush3.bf16.msra.mxu1 %v9988_v20  ;;  %v12892_v20 = vld [vmem:[%s14521_s0 + $0x23c] sm:$0xff] }
 0x1a0   :  { %8710 = vmatmul.mubr.f32.gmra.mrb[10].mxu0 %v12679_v30  ;;  %9484 = vmatmul.mubr.f32.gmra.mrb[10].mxu1 %v12684_v31 }
 0x1a1   :  { %8712 = vmatprep.mubr.f32.mxu0 %v12689_v32  ;;  %9486 = vmatprep.mubr.f32.mxu1 %v12694_v34 }
 0x1a2   :  { %9995 = vmatpush3.bf16.msra.mxu0 %v9992_v27  ;;  %10281 = vmatprep.subr.bf16.mxu1 %v9992_v27 }
 0x1a3   :  { %9997 = vmatprep.subr.bf16.mxu0 %v9996_v36  ;;  %10283 = vmatpush3.bf16.msra.mxu1 %v9992_v27  ;;  %v12911_v27 = vld [vmem:[%s14521_s0 + $0xfc] sm:$0xff] }
 0x1a4   :  { %8713 = vmatmul.mubr.f32.gmra.mrb[12].mxu0 %v12709_v43  ;;  %9487 = vmatmul.mubr.f32.gmra.mrb[12].mxu1 %v12714_v44 }
 0x1a5   :  { %8715 = vmatprep.mubr.f32.mxu0 %v12719_v49  ;;  %9489 = vmatprep.mubr.f32.mxu1 %v12724_v50 }
 0x1a6   :  { %9999 = vmatpush3.bf16.msra.mxu0 %v9996_v36  ;;  %10285 = vmatprep.subr.bf16.mxu1 %v9996_v36 }
 0x1a7   :  { %10001 = vmatprep.subr.bf16.mxu0 %v10000_v51  ;;  %10287 = vmatpush3.bf16.msra.mxu1 %v9996_v36  ;;  %v12926_v36 = vld [vmem:[%s14521_s0 + $0x254] sm:$0xff] }
 0x1a8   :  { %8716 = vmatmul.mubr.f32.gmra.mrb[14].mxu0 %v12739_v58  ;;  %9490 = vmatmul.mubr.f32.gmra.mrb[14].mxu1 %v12744_v63  ;;  %14708 = vst [vmem:[#allocation10_spill] sm:$0xff] %v12926_v36 }
 0x1a9   :  { %8718 = vmatprep.mubr.f32.mxu0 %v12749_v0  ;;  %9492 = vmatprep.mubr.f32.mxu1 %v12754_v1 }
 0x1aa   :  { %10003 = vmatpush3.bf16.msra.mxu0 %v10000_v51  ;;  %10289 = vmatprep.subr.bf16.mxu1 %v10000_v51 }
 0x1ab   :  { %10291 = vmatpush3.bf16.msra.mxu1 %v10000_v51  ;;  %10005 = vmatprep.subr.bf16.mxu0 %v12756_v6  ;;  %v12945_v51 = vld [vmem:[%s14521_s0 + $0x114] sm:$0xff] }
 0x1ac   :  { %8719 = vmatmul.mubr.f32.gmra.mrb[16].mxu0 %v12765_v7  ;;  %9493 = vmatmul.mubr.f32.gmra.mrb[16].mxu1 %v12770_v8  ;;  %14711 = vst [vmem:[#allocation13_spill] sm:$0xff] %v12945_v51 }
 0x1ad   :  { %8721 = vmatprep.mubr.f32.mxu0 %v12775_v13  ;;  %9495 = vmatprep.mubr.f32.mxu1 %v12780_v14 }
 0x1ae   :  { %10293 = vmatprep.subr.bf16.mxu1 %v12756_v6 }
 0x1b0   :  { %8722 = vmatmul.mubr.f32.gmra.mrb[18].mxu0 %v12790_v15  ;;  %9496 = vmatmul.mubr.f32.gmra.mrb[18].mxu1 %v12795_v33 }
 0x1b1   :  { %8724 = vmatprep.mubr.f32.mxu0 %v12800_v35  ;;  %9498 = vmatprep.mubr.f32.mxu1 %v12805_v38 }
 0x1b4   :  { %8725 = vmatmul.mubr.f32.gmra.mrb[20].mxu0 %v12815_v39  ;;  %9499 = vmatmul.mubr.f32.gmra.mrb[20].mxu1 %v12820_v40 }
 0x1b5   :  { %8727 = vmatprep.mubr.f32.mxu0 %v12825_v41  ;;  %9501 = vmatprep.mubr.f32.mxu1 %v12830_v45 }
 0x1b8   :  { %8728 = vmatmul.mubr.f32.gmra.mrb[22].mxu0 %v12839_v47  ;;  %9502 = vmatmul.mubr.f32.gmra.mrb[22].mxu1 %v12844_v52 }
 0x1b9   :  { %8730 = vmatprep.mubr.f32.mxu0 %v12849_v53  ;;  %9504 = vmatprep.mubr.f32.mxu1 %v12854_v61 }
 0x1bc   :  { %8731 = vmatmul.mubr.f32.gmra.mrb[24].mxu0 %v12863_v62  ;;  %9505 = vmatmul.mubr.f32.gmra.mrb[24].mxu1 %v12868_v2 }
 0x1bd   :  { %8733 = vmatprep.mubr.f32.mxu0 %v12873_v10  ;;  %9507 = vmatprep.mubr.f32.mxu1 %v12878_v11 }
 0x1c0   :  { %8734 = vmatmul.mubr.f32.gmra.mrb[26].mxu0 %v12887_v12  ;;  %9508 = vmatmul.mubr.f32.gmra.mrb[26].mxu1 %v12892_v20 }
 0x1c1   :  { %8736 = vmatprep.mubr.f32.mxu0 %v12897_v21  ;;  %9510 = vmatprep.mubr.f32.mxu1 %v12902_v22 }
 0x1c4   :  { %8737 = vmatmul.mubr.f32.gmra.mrb[28].mxu0 %v12911_v27  ;;  %9511 = vmatmul.mubr.f32.gmra.mrb[28].mxu1 %v12916_v28 }
 0x1c5   :  { %8739 = vmatprep.mubr.f32.mxu0 %v12921_v29  ;;  %9513 = vmatprep.mubr.f32.mxu1 %v12926_v36  ;;  %v12964_v36 = vld [vmem:[%s14521_s0 + $0x26c] sm:$0xff] }
 0x1c6   :  { %14714 = vst [vmem:[#allocation16_spill] sm:$0xff] %v12964_v36  ;;  %v6817_v29 = vld [vmem:[%s14522_s1 + $0x3a8] sm:$0xff] }
 0x1c8   :  { %8740 = vmatmul.mubr.f32.gmra.mrb[30].mxu0 %v12935_v37  ;;  %9514 = vmatmul.mubr.f32.gmra.mrb[30].mxu1 %v12940_v42  ;;  %v12969_v37 = vld [vmem:[%s14521_s0 + $0x124] sm:$0xff]  ;;  %v12988_v42 = vld [vmem:[%s14521_s0 + $0x27c] sm:$0xff] }
 0x1c9   :  { %8742 = vmatprep.mubr.f32.mxu0 %v12945_v51  ;;  %9516 = vmatprep.mubr.f32.mxu1 %v12950_v56  ;;  %14715 = vst [vmem:[#allocation17_spill] sm:$0xff] %v12969_v37  ;;  %v12974_v51 = vld [vmem:[%s14521_s0 + $0x274] sm:$0xff]  ;;  %v12983_v56 = vld [vmem:[%s14521_s0 + $0x12c] sm:$0xff] }
 0x1ca   :  { %14716 = vst [vmem:[#allocation18_spill] sm:$0xff] %v12974_v51 }
 0x1cc   :  { %8743 = vmatmul.mubr.f32.gmra.mrb[32].mxu0 %v12959_v57  ;;  %9517 = vmatmul.mubr.f32.gmra.mrb[32].mxu1 %v12964_v36  ;;  %v6814_v57 = vld [vmem:[%s14522_s1 + $0x390] sm:$0xff]  ;;  %v6816_v36 = vld [vmem:[%s14522_s1 + $0x3a0] sm:$0xff] }
 0x1cd   :  { %8745 = vmatprep.mubr.f32.mxu0 %v12969_v37  ;;  %9519 = vmatprep.mubr.f32.mxu1 %v12974_v51  ;;  %v6815_v37 = vld [vmem:[%s14522_s1 + $0x398] sm:$0xff] }
 0x1ce   :  { %v10008_v51 = vpack.c.bf16 %v6815_v37, %v6814_v57  ;;  %v2328_v37 = vld [vmem:[%s14521_s0 + $0x35] sm:$0xff]  ;;  %v6833_v57 = vld [vmem:[%s14522_s1 + $0x428] sm:$0xff] }
 0x1d0   :  { %8746 = vmatmul.mubr.f32.gmra.mrb[34].mxu0 %v12983_v56  ;;  %9520 = vmatmul.mubr.f32.gmra.mrb[34].mxu1 %v12988_v42 }
 0x1d1   :  { %8780 = vmatprep.mubr.f32.mxu0 %v12539_v46  ;;  %9554 = vmatprep.mubr.f32.mxu1 %v12544_v48  ;;  %v10012_v46 = vpack.c.bf16 %v6817_v29, %v6816_v36  ;;  %v6818_v48 = vld [vmem:[%s14522_s1 + $0x3b0] sm:$0xff]  ;;  %v7193_v36 = vld [vmem:[%s14521_s0 + $0x17d] sm:$0xff] }
 0x1d2   :  { %v2327_v29 = vld [vmem:[%s14521_s0 + $0x2d] sm:$0xff] }
 0x1d4   :  { %8781 = vmatmul.mubr.f32.vlgmr.msra.gmra.mrb[0].mxu0 %v12557_v54  ;;  %9555 = vmatmul.mubr.f32.vlgmr.msra.gmra.mrb[0].mxu1 %v12562_v55  ;;  %v6819_v54 = vld [vmem:[%s14522_s1 + $0x3b8] sm:$0xff] }
 0x1d5   :  { %10007 = vmatpush3.bf16.msra.mxu0 %v12756_v6  ;;  %8783 = vmatprep.mubr.f32.mxu0 %v12568_v59  ;;  %v10016_v55 = vpack.c.bf16 %v6819_v54, %v6818_v48  ;;  %v6820_v59 = vld [vmem:[%s14522_s1 + $0x3c0] sm:$0xff]  ;;  %v7195_v54 = vld [vmem:[%s14521_s0 + $0x18d] sm:$0xff] }
 0x1d6   :  { %9557 = vmatprep.mubr.f32.mxu1 %v12573_v60  ;;  %10009 = vmatprep.subr.bf16.mxu0 %v10008_v51  ;;  %v6821_v60 = vld [vmem:[%s14522_s1 + $0x3c8] sm:$0xff]  ;;  %v2329_v48 = vld [vmem:[%s14521_s0 + $0x3d] sm:$0xff] }
 0x1d7   :  { %10295 = vmatpush3.bf16.msra.mxu1 %v12756_v6  ;;  %v35_v6 = vld [vmem:[%s14523_s2 + $0x50] sm:$0xff] }
 0x1d8   :  { %8784 = vmatmul.mubr.f32.gmra.mrb[2].mxu0 %v12589_v3  ;;  %9558 = vmatmul.mubr.f32.gmra.mrb[2].mxu1 %v12594_v4  ;;  %v10020_v3 = vpack.c.bf16 %v6821_v60, %v6820_v59  ;;  %v6822_v4 = vld [vmem:[%s14522_s1 + $0x3d0] sm:$0xff] }
 0x1d9   :  { %8786 = vmatprep.mubr.f32.mxu0 %v12599_v5  ;;  %9560 = vmatprep.mubr.f32.mxu1 %v12604_v9  ;;  %v6823_v5 = vld [vmem:[%s14522_s1 + $0x3d8] sm:$0xff] }
 0x1da   :  { %10011 = vmatpush3.bf16.msra.mxu0 %v10008_v51  ;;  %10297 = vmatprep.subr.bf16.mxu1 %v10008_v51  ;;  %v10024_v9 = vpack.c.bf16 %v6823_v5, %v6822_v4  ;;  %v7196_v59 = vld [vmem:[%s14521_s0 + $0x195] sm:$0xff]  ;;  %v2331_v5 = vld [vmem:[%s14521_s0 + $0x4d] sm:$0xff] }
 0x1db   :  { %10013 = vmatprep.subr.bf16.mxu0 %v10012_v46  ;;  %10299 = vmatpush3.bf16.msra.mxu1 %v10008_v51  ;;  %v7194_v51 = vld [vmem:[%s14521_s0 + $0x185] sm:$0xff]  ;;  %v6835_v4 = vld [vmem:[%s14522_s1 + $0x438] sm:$0xff] }
 0x1dc   :  { %8787 = vmatmul.mubr.f32.gmra.mrb[4].mxu0 %v12619_v16  ;;  %9561 = vmatmul.mubr.f32.gmra.mrb[4].mxu1 %v12624_v17  ;;  %v6824_v16 = vld [vmem:[%s14522_s1 + $0x3e0] sm:$0xff]  ;;  %v6825_v17 = vld [vmem:[%s14522_s1 + $0x3e8] sm:$0xff] }
 0x1dd   :  { %8789 = vmatprep.mubr.f32.mxu0 %v12629_v18  ;;  %9563 = vmatprep.mubr.f32.mxu1 %v12634_v19  ;;  %v10028_v18 = vpack.c.bf16 %v6825_v17, %v6824_v16  ;;  %v6826_v19 = vld [vmem:[%s14522_s1 + $0x3f0] sm:$0xff]  ;;  %v7198_v17 = vld [vmem:[%s14521_s0 + $0x1a5] sm:$0xff] }
 0x1de   :  { %10015 = vmatpush3.bf16.msra.mxu0 %v10012_v46  ;;  %10301 = vmatprep.subr.bf16.mxu1 %v10012_v46  ;;  %v2332_v16 = vld [vmem:[%s14521_s0 + $0x55] sm:$0xff] }
 0x1df   :  { %10017 = vmatprep.subr.bf16.mxu0 %v10016_v55  ;;  %10303 = vmatpush3.bf16.msra.mxu1 %v10012_v46  ;;  %v44_v46 = vld [vmem:[%s14523_s2 + $0x98] sm:$0xff] }
 0x1e0   :  { %8790 = vmatmul.mubr.f32.gmra.mrb[6].mxu0 %v12649_v23  ;;  %9564 = vmatmul.mubr.f32.gmra.mrb[6].mxu1 %v12654_v24  ;;  %v6827_v23 = vld [vmem:[%s14522_s1 + $0x3f8] sm:$0xff] }
 0x1e1   :  { %8792 = vmatprep.mubr.f32.mxu0 %v12659_v25  ;;  %9566 = vmatprep.mubr.f32.mxu1 %v12664_v26  ;;  %v10032_v24 = vpack.c.bf16 %v6827_v23, %v6826_v19  ;;  %v6828_v25 = vld [vmem:[%s14522_s1 + $0x400] sm:$0xff]  ;;  %v6829_v26 = vld [vmem:[%s14522_s1 + $0x408] sm:$0xff] }
 0x1e2   :  { %10019 = vmatpush3.bf16.msra.mxu0 %v10016_v55  ;;  %10305 = vmatprep.subr.bf16.mxu1 %v10016_v55  ;;  %v6836_v19 = vld [vmem:[%s14522_s1 + $0x440] sm:$0xff]  ;;  %v6837_v23 = vld [vmem:[%s14522_s1 + $0x448] sm:$0xff] }
 0x1e3   :  { %10021 = vmatprep.subr.bf16.mxu0 %v10020_v3  ;;  %10307 = vmatpush3.bf16.msra.mxu1 %v10016_v55  ;;  %v2330_v55 = vld [vmem:[%s14521_s0 + $0x45] sm:$0xff] }
 0x1e4   :  { %8793 = vmatmul.mubr.f32.gmra.mrb[8].mxu0 %v12679_v30  ;;  %9567 = vmatmul.mubr.f32.gmra.mrb[8].mxu1 %v12684_v31  ;;  %v13072_v30 = vpack.c.bf16 %v6829_v26, %v6828_v25  ;;  %v25_v31 = vld [vmem:[%s14523_s2] sm:$0xff]  ;;  %v7199_v25 = vld [vmem:[%s14521_s0 + $0x1ad] sm:$0xff] }
 0x1e5   :  { %8795 = vmatprep.mubr.f32.mxu0 %v12689_v32  ;;  %9569 = vmatprep.mubr.f32.mxu1 %v12694_v34  ;;  %v11011_v32 = vmov 0   ;;  %v27_v34 = vld [vmem:[%s14523_s2 + $0x10] sm:$0xff]  ;;  %v2334_v26 = vld [vmem:[%s14521_s0 + $0x65] sm:$0xff] }
 0x1e6   :  { %10023 = vmatpush3.bf16.msra.mxu0 %v10020_v3  ;;  %10309 = vmatprep.subr.bf16.mxu1 %v10020_v3 }
 0x1e7   :  { %10025 = vmatprep.subr.bf16.mxu0 %v10024_v9  ;;  %10311 = vmatpush3.bf16.msra.mxu1 %v10020_v3  ;;  %v6834_v3 = vld [vmem:[%s14522_s1 + $0x430] sm:$0xff] }
 0x1e8   :  { %8796 = vmatmul.mubr.f32.gmra.mrb[10].mxu0 %v12709_v43  ;;  %9570 = vmatmul.mubr.f32.gmra.mrb[10].mxu1 %v12714_v44  ;;  %v26_v43 = vld [vmem:[%s14523_s2 + $0x8] sm:$0xff]  ;;  %v28_v44 = vld [vmem:[%s14523_s2 + $0x18] sm:$0xff] }
 0x1e9   :  { %8798 = vmatprep.mubr.f32.mxu0 %v12719_v49  ;;  %9572 = vmatprep.mubr.f32.mxu1 %v12724_v50  ;;  %v29_v49 = vld [vmem:[%s14523_s2 + $0x20] sm:$0xff]  ;;  %v30_v50 = vld [vmem:[%s14523_s2 + $0x28] sm:$0xff] }
 0x1ea   :  { %10027 = vmatpush3.bf16.msra.mxu0 %v10024_v9  ;;  %10313 = vmatprep.subr.bf16.mxu1 %v10024_v9 }
 0x1eb   :  { %10029 = vmatprep.subr.bf16.mxu0 %v10028_v18  ;;  %10315 = vmatpush3.bf16.msra.mxu1 %v10024_v9  ;;  %v7197_v9 = vld [vmem:[%s14521_s0 + $0x19d] sm:$0xff] }
 0x1ec   :  { %8799 = vmatmul.mubr.f32.gmra.mrb[12].mxu0 %v12739_v58  ;;  %9573 = vmatmul.mubr.f32.gmra.mrb[12].mxu1 %v12744_v63  ;;  %v31_v58 = vld [vmem:[%s14523_s2 + $0x30] sm:$0xff]  ;;  %v32_v63 = vld [vmem:[%s14523_s2 + $0x38] sm:$0xff] }
 0x1ed   :  { %8801 = vmatprep.mubr.f32.mxu0 %v12749_v0  ;;  %9575 = vmatprep.mubr.f32.mxu1 %v12754_v1  ;;  %v33_v0 = vld [vmem:[%s14523_s2 + $0x40] sm:$0xff]  ;;  %v34_v1 = vld [vmem:[%s14523_s2 + $0x48] sm:$0xff] }
 0x1ee   :  { %10031 = vmatpush3.bf16.msra.mxu0 %v10028_v18  ;;  %10317 = vmatprep.subr.bf16.mxu1 %v10028_v18 }
 0x1ef   :  { %10033 = vmatprep.subr.bf16.mxu0 %v10032_v24  ;;  %10319 = vmatpush3.bf16.msra.mxu1 %v10028_v18  ;;  %v10048_v18 = vpack.c.bf16 %v6835_v4, %v6834_v3  ;;  %v2351_v3 = vld [vmem:[%s14521_s0 + $0xed] sm:$0xff]  ;;  %v7217_v4 = vld [vmem:[%s14521_s0 + $0x23d] sm:$0xff] }
 0x1f0   :  { %8802 = vmatmul.mubr.f32.gmra.mrb[14].mxu0 %v12765_v7  ;;  %9576 = vmatmul.mubr.f32.gmra.mrb[14].mxu1 %v12770_v8  ;;  %v14717_v7 = vld [vmem:[#allocation9_spill] sm:$0xff]  ;;  %v14718_v8 = vld [vmem:[#allocation10_spill] sm:$0xff] }
 0x1f1   :  { %8804 = vmatprep.mubr.f32.mxu0 %v12775_v13  ;;  %9578 = vmatprep.mubr.f32.mxu1 %v12780_v14  ;;  %v36_v13 = vld [vmem:[%s14523_s2 + $0x58] sm:$0xff] }
 0x1f2   :  { %10035 = vmatpush3.bf16.msra.mxu0 %v10032_v24  ;;  %10321 = vmatprep.subr.bf16.mxu1 %v10032_v24  ;;  %v14719_v14 = vld [vmem:[#allocation11_spill] sm:$0xff] }
 0x1f3   :  { %10323 = vmatpush3.bf16.msra.mxu1 %v10032_v24  ;;  %10037 = vmatprep.subr.bf16.mxu0 %v13072_v30  ;;  %v2333_v24 = vld [vmem:[%s14521_s0 + $0x5d] sm:$0xff] }
 0x1f4   :  { %8805 = vmatmul.mubr.f32.gmra.mrb[16].mxu0 %v12790_v15  ;;  %9579 = vmatmul.mubr.f32.gmra.mrb[16].mxu1 %v12795_v33  ;;  %v14720_v15 = vld [vmem:[#allocation12_spill] sm:$0xff] }
 0x1f5   :  { %8807 = vmatprep.mubr.f32.mxu0 %v12800_v35  ;;  %9581 = vmatprep.mubr.f32.mxu1 %v12805_v38  ;;  %v37_v33 = vld [vmem:[%s14523_s2 + $0x60] sm:$0xff]  ;;  %v14722_v38 = vld [vmem:[#allocation14_spill] sm:$0xff] }
 0x1f6   :  { %10325 = vmatprep.subr.bf16.mxu1 %v13072_v30  ;;  %10939 = vset.pattern.permute.xlu0 %v11011_v32  ;;  %v14721_v35 = vld [vmem:[#allocation13_spill] sm:$0xff] }
 0x1f7   :  { %2997 = vperm.xlu0 %10939, %v25_v31   ;;  %10940 = vset.pattern.permute.xlu1 %v11011_v32  ;;  %v10052_v31 = vpack.c.bf16 %v6837_v23, %v6836_v19  ;;  %v6838_v32 = vld [vmem:[%s14522_s1 + $0x450] sm:$0xff]  ;;  %v2354_v23 = vld [vmem:[%s14521_s0 + $0x105] sm:$0xff] }
 0x1f8   :  { %8808 = vmatmul.mubr.f32.gmra.mrb[18].mxu0 %v12815_v39  ;;  %9582 = vmatmul.mubr.f32.gmra.mrb[18].mxu1 %v12820_v40  ;;  %v38_v39 = vld [vmem:[%s14523_s2 + $0x68] sm:$0xff]  ;;  %v14723_v40 = vld [vmem:[#allocation15_spill] sm:$0xff] }
 0x1f9   :  { %8810 = vmatprep.mubr.f32.mxu0 %v12825_v41  ;;  %9584 = vmatprep.mubr.f32.mxu1 %v12830_v45  ;;  %v14724_v41 = vld [vmem:[#allocation16_spill] sm:$0xff]  ;;  %v39_v45 = vld [vmem:[%s14523_s2 + $0x70] sm:$0xff] }
 0x1fa   :  { %3007 = vperm.xlu1 %10940, %v27_v34   ;;  %v6839_v34 = vld [vmem:[%s14522_s1 + $0x458] sm:$0xff]  ;;  %v7219_v19 = vld [vmem:[%s14521_s0 + $0x24d] sm:$0xff] }
 0x1fb   :  { %3002 = vperm.xlu0 %10939, %v26_v43   ;;  %v2335_v43 = vld [vmem:[%s14521_s0 + $0x6d] sm:$0xff] }
 0x1fc   :  { %8811 = vmatmul.mubr.f32.gmra.mrb[20].mxu0 %v12839_v47  ;;  %9585 = vmatmul.mubr.f32.gmra.mrb[20].mxu1 %v12844_v52  ;;  %v14725_v47 = vld [vmem:[#allocation17_spill] sm:$0xff]  ;;  %v14726_v52 = vld [vmem:[#allocation18_spill] sm:$0xff] }
 0x1fd   :  { %8813 = vmatprep.mubr.f32.mxu0 %v12849_v53  ;;  %9587 = vmatprep.mubr.f32.mxu1 %v12854_v61  ;;  %v2026_v53 = vld [vmem:[%s14521_s0 + $0x134] sm:$0xff]  ;;  %v7174_v61 = vld [vmem:[%s14521_s0 + $0x284] sm:$0xff] }
 0x1fe   :  { %3012 = vperm.xlu1 %10940, %v28_v44   ;;  %v7201_v44 = vld [vmem:[%s14521_s0 + $0x1bd] sm:$0xff] }
 0x1ff   :  { %3017 = vperm.xlu0 %10939, %v29_v49   ;;  %v2336_v49 = vld [vmem:[%s14521_s0 + $0x75] sm:$0xff] }
 0x200   :  { %8814 = vmatmul.mubr.f32.gmra.mrb[22].mxu0 %v12863_v62  ;;  %9588 = vmatmul.mubr.f32.gmra.mrb[22].mxu1 %v12868_v2  ;;  %v40_v62 = vld [vmem:[%s14523_s2 + $0x78] sm:$0xff]  ;;  %v41_v2 = vld [vmem:[%s14523_s2 + $0x80] sm:$0xff] }
 0x201   :  { %8816 = vmatprep.mubr.f32.mxu0 %v12873_v10  ;;  %9590 = vmatprep.mubr.f32.mxu1 %v12878_v11  ;;  %v2027_v10 = vld [vmem:[%s14521_s0 + $0x13c] sm:$0xff]  ;;  %v7175_v11 = vld [vmem:[%s14521_s0 + $0x28c] sm:$0xff] }
 0x202   :  { %3022 = vperm.xlu1 %10940, %v30_v50   ;;  %v7202_v50 = vld [vmem:[%s14521_s0 + $0x1c5] sm:$0xff] }
 0x203   :  { %3027 = vperm.xlu0 %10939, %v31_v58   ;;  %v10056_v58 = vpack.c.bf16 %v6839_v34, %v6838_v32  ;;  %v2356_v32 = vld [vmem:[%s14521_s0 + $0x115] sm:$0xff]  ;;  %v7222_v34 = vld [vmem:[%s14521_s0 + $0x265] sm:$0xff] }
 0x204   :  { %8817 = vmatmul.mubr.f32.gmra.mrb[24].mxu0 %v12887_v12  ;;  %9591 = vmatmul.mubr.f32.gmra.mrb[24].mxu1 %v12892_v20  ;;  %v2326_v12 = vld [vmem:[%s14521_s0 + $0x25] sm:$0xff]  ;;  %v7192_v20 = vld [vmem:[%s14521_s0 + $0x175] sm:$0xff] }
 0x205   :  { %8819 = vmatprep.mubr.f32.mxu0 %v12897_v21  ;;  %9593 = vmatprep.mubr.f32.mxu1 %v12902_v22  ;;  %v6830_v21 = vld [vmem:[%s14522_s1 + $0x410] sm:$0xff]  ;;  %v6831_v22 = vld [vmem:[%s14522_s1 + $0x418] sm:$0xff] }
 0x206   :  { %3032 = vperm.xlu1 %10940, %v32_v63   ;;  %v6840_v63 = vld [vmem:[%s14522_s1 + $0x460] sm:$0xff] }
 0x207   :  { %3037 = vperm.xlu0 %10939, %v33_v0   ;;  %v6841_v0 = vld [vmem:[%s14522_s1 + $0x468] sm:$0xff] }
 0x208   :  { %8820 = vmatmul.mubr.f32.gmra.mrb[26].mxu0 %v12911_v27  ;;  %9594 = vmatmul.mubr.f32.gmra.mrb[26].mxu1 %v12916_v28  ;;  %v42_v27 = vld [vmem:[%s14523_s2 + $0x88] sm:$0xff]  ;;  %v43_v28 = vld [vmem:[%s14523_s2 + $0x90] sm:$0xff] }
 0x209   :  { %8822 = vmatprep.mubr.f32.mxu0 %v14717_v7  ;;  %9596 = vmatprep.mubr.f32.mxu1 %v14718_v8  ;;  %v2338_v7 = vld [vmem:[%s14521_s0 + $0x85] sm:$0xff]  ;;  %v7204_v8 = vld [vmem:[%s14521_s0 + $0x1d5] sm:$0xff] }
 0x20a   :  { %3042 = vperm.xlu1 %10940, %v34_v1   ;;  %v2337_v1 = vld [vmem:[%s14521_s0 + $0x7d] sm:$0xff] }
 0x20b   :  { %3047 = vperm.xlu0 %10939, %v35_v6   ;;  %v7203_v6 = vld [vmem:[%s14521_s0 + $0x1cd] sm:$0xff] }
 0x20c   :  { %8823 = vmatmul.mubr.f32.gmra.mrb[28].mxu0 %v14719_v14  ;;  %9597 = vmatmul.mubr.f32.gmra.mrb[28].mxu1 %v14720_v15  ;;  %v6842_v14 = vld [vmem:[%s14522_s1 + $0x470] sm:$0xff]  ;;  %v6843_v15 = vld [vmem:[%s14522_s1 + $0x478] sm:$0xff] }
 0x20d   :  { %8825 = vmatprep.mubr.f32.mxu0 %v14721_v35  ;;  %9599 = vmatprep.mubr.f32.mxu1 %v14722_v38  ;;  %v7205_v35 = vld [vmem:[%s14521_s0 + $0x1dd] sm:$0xff]  ;;  %v2340_v38 = vld [vmem:[%s14521_s0 + $0x95] sm:$0xff] }
 0x20e   :  { %3052 = vperm.xlu1 %10940, %v36_v13   ;;  %v10060_v13 = vpack.c.bf16 %v6841_v0, %v6840_v63  ;;  %v7224_v63 = vld [vmem:[%s14521_s0 + $0x275] sm:$0xff] }
 0x20f   :  { %3057 = vperm.xlu0 %10939, %v37_v33   ;;  %v2339_v33 = vld [vmem:[%s14521_s0 + $0x8d] sm:$0xff]  ;;  %v60_v0 = vld [vmem:[%s14523_s2 + $0x118] sm:$0xff] }
 0x210   :  { %8826 = vmatmul.mubr.f32.gmra.mrb[30].mxu0 %v14723_v40  ;;  %9600 = vmatmul.mubr.f32.gmra.mrb[30].mxu1 %v14724_v41  ;;  %v10064_v40 = vpack.c.bf16 %v6843_v15, %v6842_v14  ;;  %v2341_v41 = vld [vmem:[%s14521_s0 + $0x9d] sm:$0xff]  ;;  %v7227_v14 = vld [vmem:[%s14521_s0 + $0x28d] sm:$0xff] }
 0x211   :  { %8828 = vmatprep.mubr.f32.mxu0 %v14725_v47  ;;  %9602 = vmatprep.mubr.f32.mxu1 %v14726_v52  ;;  %v2342_v47 = vld [vmem:[%s14521_s0 + $0xa5] sm:$0xff]  ;;  %v7208_v52 = vld [vmem:[%s14521_s0 + $0x1f5] sm:$0xff] }
 0x212   :  { %3062 = vperm.xlu1 %10940, %v38_v39   ;;  %v7206_v39 = vld [vmem:[%s14521_s0 + $0x1e5] sm:$0xff] }
 0x213   :  { %3067 = vperm.xlu0 %10939, %v39_v45   ;;  %v7207_v45 = vld [vmem:[%s14521_s0 + $0x1ed] sm:$0xff] }
 0x214   :  { %8829 = vmatmul.mubr.f32.gmra.mrb[32].mxu0 %v12983_v56  ;;  %9603 = vmatmul.mubr.f32.gmra.mrb[32].mxu1 %v12988_v42  ;;  %v10040_v42 = vpack.c.bf16 %v6831_v22, %v6830_v21  ;;  %v6832_v56 = vld [vmem:[%s14522_s1 + $0x420] sm:$0xff]  ;;  %v7211_v21 = vld [vmem:[%s14521_s0 + $0x20d] sm:$0xff] }
 0x215   :  { %8831 = vmatprep.mubr.f32.mxu0 %v2026_v53  ;;  %9605 = vmatprep.mubr.f32.mxu1 %v7174_v61  ;;  %v10044_v60 = vpack.c.bf16 %v6833_v57, %v6832_v56  ;;  %v45_v53 = vld [vmem:[%s14523_s2 + $0xa0] sm:$0xff]  ;;  %v2343_v61 = vld [vmem:[%s14521_s0 + $0xad] sm:$0xff] }
 0x216   :  { %3072 = vperm.xlu1 %10940, %v40_v62   ;;  %v7209_v62 = vld [vmem:[%s14521_s0 + $0x1fd] sm:$0xff]  ;;  %v2346_v22 = vld [vmem:[%s14521_s0 + $0xc5] sm:$0xff]  ;;  %v51_v57 = vld [vmem:[%s14523_s2 + $0xd0] sm:$0xff] }
 0x217   :  { %3077 = vperm.xlu0 %10939, %v41_v2   ;;  %v2344_v2 = vld [vmem:[%s14521_s0 + $0xb5] sm:$0xff]  ;;  %v50_v56 = vld [vmem:[%s14523_s2 + $0xc8] sm:$0xff] }
 0x218   :  { %8832 = vmatmul.mubr.f32.gmra.mrb[34].mxu0 %v2027_v10  ;;  %9606 = vmatmul.mubr.f32.gmra.mrb[34].mxu1 %v7175_v11  ;;  %v7210_v10 = vld [vmem:[%s14521_s0 + $0x205] sm:$0xff] }
 0x219   :  { %8866 = vmatprep.mubr.f32.mxu0 %v2326_v12  ;;  %9640 = vmatprep.mubr.f32.mxu1 %v7192_v20  ;;  %v46_v11 = vld [vmem:[%s14523_s2 + $0xa8] sm:$0xff]  ;;  %v47_v12 = vld [vmem:[%s14523_s2 + $0xb0] sm:$0xff]  ;;  %v2345_v20 = vld [vmem:[%s14521_s0 + $0xbd] sm:$0xff] }
 0x21a   :  { %3082 = vperm.xlu1 %10940, %v42_v27   ;;  %v7212_v27 = vld [vmem:[%s14521_s0 + $0x215] sm:$0xff]  ;;  %v2660_v15 = vld [vmem:[%s14521_s0 + $0x26] sm:$0xff] }
 0x21b   :  { %3087 = vperm.xlu0 %10939, %v43_v28   ;;  %v48_v28 = vld [vmem:[%s14523_s2 + $0xb8] sm:$0xff] }
 0x21c   :  { %8867 = vmatmul.mubr.f32.vlgmr.msra.gmra.mrb[0].mxu0 %v2327_v29  ;;  %9641 = vmatmul.mubr.f32.vlgmr.msra.gmra.mrb[0].mxu1 %v7193_v36  ;;  %v49_v29 = vld [vmem:[%s14523_s2 + $0xc0] sm:$0xff]  ;;  %v2347_v36 = vld [vmem:[%s14521_s0 + $0xcd] sm:$0xff] }
 0x21d   :  { %10039 = vmatpush3.bf16.msra.mxu0 %v13072_v30  ;;  %8869 = vmatprep.mubr.f32.mxu0 %v2328_v37  ;;  %v7213_v37 = vld [vmem:[%s14521_s0 + $0x21d] sm:$0xff] }
 0x21e   :  { %9643 = vmatprep.mubr.f32.mxu1 %v7194_v51  ;;  %10041 = vmatprep.subr.bf16.mxu0 %v10040_v42  ;;  %v7214_v51 = vld [vmem:[%s14521_s0 + $0x225] sm:$0xff] }
 0x21f   :  { %10327 = vmatpush3.bf16.msra.mxu1 %v13072_v30  ;;  %3092 = vperm.xlu1 %10940, %v44_v46   ;;  %v7200_v30 = vld [vmem:[%s14521_s0 + $0x1b5] sm:$0xff]  ;;  %v2349_v46 = vld [vmem:[%s14521_s0 + $0xdd] sm:$0xff] }
 0x220   :  { %8870 = vmatmul.mubr.f32.gmra.mrb[2].mxu0 %v2329_v48  ;;  %9644 = vmatmul.mubr.f32.gmra.mrb[2].mxu1 %v7195_v54  ;;  %v7215_v48 = vld [vmem:[%s14521_s0 + $0x22d] sm:$0xff]  ;;  %v2350_v54 = vld [vmem:[%s14521_s0 + $0xe5] sm:$0xff] }
 0x221   :  { %8872 = vmatprep.mubr.f32.mxu0 %v2330_v55  ;;  %9646 = vmatprep.mubr.f32.mxu1 %v7196_v59  ;;  %v7216_v55 = vld [vmem:[%s14521_s0 + $0x235] sm:$0xff] }
 0x222   :  { %10043 = vmatpush3.bf16.msra.mxu0 %v10040_v42  ;;  %10329 = vmatprep.subr.bf16.mxu1 %v10040_v42  ;;  %v52_v59 = vld [vmem:[%s14523_s2 + $0xd8] sm:$0xff] }
 0x223   :  { %10045 = vmatprep.subr.bf16.mxu0 %v10044_v60  ;;  %10331 = vmatpush3.bf16.msra.mxu1 %v10040_v42  ;;  %v2348_v42 = vld [vmem:[%s14521_s0 + $0xd5] sm:$0xff] }
 0x224   :  { %8873 = vmatmul.mubr.f32.gmra.mrb[4].mxu0 %v2331_v5  ;;  %9647 = vmatmul.mubr.f32.gmra.mrb[4].mxu1 %v7197_v9  ;;  %v2352_v5 = vld [vmem:[%s14521_s0 + $0xf5] sm:$0xff]  ;;  %v7218_v9 = vld [vmem:[%s14521_s0 + $0x245] sm:$0xff] }
 0x225   :  { %8875 = vmatprep.mubr.f32.mxu0 %v2332_v16  ;;  %9649 = vmatprep.mubr.f32.mxu1 %v7198_v17  ;;  %v54_v16 = vld [vmem:[%s14523_s2 + $0xe8] sm:$0xff]  ;;  %v55_v17 = vld [vmem:[%s14523_s2 + $0xf0] sm:$0xff] }
 0x226   :  { %10047 = vmatpush3.bf16.msra.mxu0 %v10044_v60  ;;  %10333 = vmatprep.subr.bf16.mxu1 %v10044_v60 }
 0x227   :  { %10049 = vmatprep.subr.bf16.mxu0 %v10048_v18  ;;  %10335 = vmatpush3.bf16.msra.mxu1 %v10044_v60  ;;  %v53_v60 = vld [vmem:[%s14523_s2 + $0xe0] sm:$0xff] }
 0x228   :  { %8876 = vmatmul.mubr.f32.gmra.mrb[6].mxu0 %v2333_v24  ;;  %9650 = vmatmul.mubr.f32.gmra.mrb[6].mxu1 %v7199_v25  ;;  %v7220_v24 = vld [vmem:[%s14521_s0 + $0x255] sm:$0xff] }
 0x229   :  { %8878 = vmatprep.mubr.f32.mxu0 %v2334_v26  ;;  %9652 = vmatprep.mubr.f32.mxu1 %v7200_v30  ;;  %v56_v25 = vld [vmem:[%s14523_s2 + $0xf8] sm:$0xff]  ;;  %v57_v26 = vld [vmem:[%s14523_s2 + $0x100] sm:$0xff]  ;;  %v2355_v30 = vld [vmem:[%s14521_s0 + $0x10d] sm:$0xff] }
 0x22a   :  { %10051 = vmatpush3.bf16.msra.mxu0 %v10048_v18  ;;  %10337 = vmatprep.subr.bf16.mxu1 %v10048_v18 }
 0x22b   :  { %10053 = vmatprep.subr.bf16.mxu0 %v10052_v31  ;;  %10339 = vmatpush3.bf16.msra.mxu1 %v10048_v18  ;;  %v2353_v18 = vld [vmem:[%s14521_s0 + $0xfd] sm:$0xff] }
 0x22c   :  { %8879 = vmatmul.mubr.f32.gmra.mrb[8].mxu0 %v2335_v43  ;;  %9653 = vmatmul.mubr.f32.gmra.mrb[8].mxu1 %v7201_v44  ;;  %v58_v43 = vld [vmem:[%s14523_s2 + $0x108] sm:$0xff]  ;;  %v59_v44 = vld [vmem:[%s14523_s2 + $0x110] sm:$0xff] }
 0x22d   :  { %8881 = vmatprep.mubr.f32.mxu0 %v2336_v49  ;;  %9655 = vmatprep.mubr.f32.mxu1 %v7202_v50  ;;  %v2357_v49 = vld [vmem:[%s14521_s0 + $0x11d] sm:$0xff]  ;;  %v7223_v50 = vld [vmem:[%s14521_s0 + $0x26d] sm:$0xff] }
 0x22e   :  { %10055 = vmatpush3.bf16.msra.mxu0 %v10052_v31  ;;  %10341 = vmatprep.subr.bf16.mxu1 %v10052_v31 }
 0x22f   :  { %10057 = vmatprep.subr.bf16.mxu0 %v10056_v58  ;;  %10343 = vmatpush3.bf16.msra.mxu1 %v10052_v31  ;;  %v7221_v31 = vld [vmem:[%s14521_s0 + $0x25d] sm:$0xff] }
 0x230   :  { %8882 = vmatmul.mubr.f32.gmra.mrb[10].mxu0 %v2337_v1  ;;  %9656 = vmatmul.mubr.f32.gmra.mrb[10].mxu1 %v7203_v6  ;;  %v2359_v1 = vld [vmem:[%s14521_s0 + $0x12d] sm:$0xff]  ;;  %v7225_v6 = vld [vmem:[%s14521_s0 + $0x27d] sm:$0xff] }
 0x231   :  { %8884 = vmatprep.mubr.f32.mxu0 %v2338_v7  ;;  %9658 = vmatprep.mubr.f32.mxu1 %v7204_v8  ;;  %v2360_v7 = vld [vmem:[%s14521_s0 + $0x135] sm:$0xff]  ;;  %v7226_v8 = vld [vmem:[%s14521_s0 + $0x285] sm:$0xff] }
 0x232   :  { %10059 = vmatpush3.bf16.msra.mxu0 %v10056_v58  ;;  %10345 = vmatprep.subr.bf16.mxu1 %v10056_v58 }
 0x233   :  { %10061 = vmatprep.subr.bf16.mxu0 %v10060_v13  ;;  %10347 = vmatpush3.bf16.msra.mxu1 %v10056_v58  ;;  %v2358_v58 = vld [vmem:[%s14521_s0 + $0x125] sm:$0xff] }
 0x234   :  { %8885 = vmatmul.mubr.f32.gmra.mrb[12].mxu0 %v2339_v33  ;;  %9659 = vmatmul.mubr.f32.gmra.mrb[12].mxu1 %v7205_v35  ;;  %v7244_v33 = vld [vmem:[%s14521_s0 + $0x176] sm:$0xff]  ;;  %v2661_v35 = vld [vmem:[%s14521_s0 + $0x2e] sm:$0xff] }
 0x235   :  { %8887 = vmatprep.mubr.f32.mxu0 %v2340_v38  ;;  %9661 = vmatprep.mubr.f32.mxu1 %v7206_v39  ;;  %v7245_v38 = vld [vmem:[%s14521_s0 + $0x17e] sm:$0xff]  ;;  %v2662_v39 = vld [vmem:[%s14521_s0 + $0x36] sm:$0xff] }
 0x236   :  { %10063 = vmatpush3.bf16.msra.mxu0 %v10060_v13  ;;  %10349 = vmatprep.subr.bf16.mxu1 %v10060_v13 }
 0x237   :  { %10065 = vmatprep.subr.bf16.mxu0 %v10064_v40  ;;  %10351 = vmatpush3.bf16.msra.mxu1 %v10060_v13  ;;  %v2361_v13 = vld [vmem:[%s14521_s0 + $0x13d] sm:$0xff] }
 0x238   :  { %8888 = vmatmul.mubr.f32.gmra.mrb[14].mxu0 %v2341_v41  ;;  %9662 = vmatmul.mubr.f32.gmra.mrb[14].mxu1 %v7207_v45  ;;  %v2663_v41 = vld [vmem:[%s14521_s0 + $0x3e] sm:$0xff]  ;;  %v7247_v45 = vld [vmem:[%s14521_s0 + $0x18e] sm:$0xff] }
 0x239   :  { %8890 = vmatprep.mubr.f32.mxu0 %v2342_v47  ;;  %9664 = vmatprep.mubr.f32.mxu1 %v7208_v52  ;;  %v2664_v47 = vld [vmem:[%s14521_s0 + $0x46] sm:$0xff]  ;;  %v7248_v52 = vld [vmem:[%s14521_s0 + $0x196] sm:$0xff] }
 0x23a   :  { %10067 = vmatpush3.bf16.msra.mxu0 %v10064_v40  ;;  %10353 = vmatprep.subr.bf16.mxu1 %v10064_v40 }
 0x23b   :  { %10355 = vmatpush3.bf16.msra.mxu1 %v10064_v40  ;;  %3097 = vperm.xlu0 %10939, %v45_v53   ;;  %v7246_v40 = vld [vmem:[%s14521_s0 + $0x186] sm:$0xff]  ;;  %v2665_v53 = vld [vmem:[%s14521_s0 + $0x4e] sm:$0xff] }
 0x23c   :  { %8891 = vmatmul.mubr.f32.gmra.mrb[16].mxu0 %v2343_v61  ;;  %9665 = vmatmul.mubr.f32.gmra.mrb[16].mxu1 %v7209_v62  ;;  %v7249_v61 = vld [vmem:[%s14521_s0 + $0x19e] sm:$0xff]  ;;  %v2666_v62 = vld [vmem:[%s14521_s0 + $0x56] sm:$0xff] }
 0x23d   :  { %8893 = vmatprep.mubr.f32.mxu0 %v2344_v2  ;;  %9667 = vmatprep.mubr.f32.mxu1 %v7210_v10  ;;  %v7250_v2 = vld [vmem:[%s14521_s0 + $0x1a6] sm:$0xff]  ;;  %v2667_v10 = vld [vmem:[%s14521_s0 + $0x5e] sm:$0xff] }
 0x23e   :  { %3102 = vperm.xlu1 %10940, %v46_v11   ;;  %v7251_v11 = vld [vmem:[%s14521_s0 + $0x1ae] sm:$0xff] }
 0x23f   :  { %3107 = vperm.xlu0 %10939, %v47_v12   ;;  %v7252_v12 = vld [vmem:[%s14521_s0 + $0x1b6] sm:$0xff] }
 0x240   :  { %8894 = vmatmul.mubr.f32.gmra.mrb[18].mxu0 %v2345_v20  ;;  %9668 = vmatmul.mubr.f32.gmra.mrb[18].mxu1 %v7211_v21  ;;  %v2668_v20 = vld [vmem:[%s14521_s0 + $0x66] sm:$0xff]  ;;  %v2669_v21 = vld [vmem:[%s14521_s0 + $0x6e] sm:$0xff] }
 0x241   :  { %8896 = vmatprep.mubr.f32.mxu0 %v2346_v22  ;;  %9670 = vmatprep.mubr.f32.mxu1 %v7212_v27  ;;  %v7253_v22 = vld [vmem:[%s14521_s0 + $0x1be] sm:$0xff]  ;;  %v7254_v27 = vld [vmem:[%s14521_s0 + $0x1c6] sm:$0xff] }
 0x242   :  { %3112 = vperm.xlu1 %10940, %v48_v28   ;;  %v2670_v28 = vld [vmem:[%s14521_s0 + $0x76] sm:$0xff] }
 0x243   :  { %3117 = vperm.xlu0 %10939, %v49_v29   ;;  %v2671_v29 = vld [vmem:[%s14521_s0 + $0x7e] sm:$0xff] }
 0x244   :  { %8897 = vmatmul.mubr.f32.gmra.mrb[20].mxu0 %v2347_v36  ;;  %9671 = vmatmul.mubr.f32.gmra.mrb[20].mxu1 %v7213_v37  ;;  %v7255_v36 = vld [vmem:[%s14521_s0 + $0x1ce] sm:$0xff]  ;;  %v2672_v37 = vld [vmem:[%s14521_s0 + $0x86] sm:$0xff] }
 0x245   :  { %8899 = vmatprep.mubr.f32.mxu0 %v2348_v42  ;;  %9673 = vmatprep.mubr.f32.mxu1 %v7214_v51  ;;  %v7256_v42 = vld [vmem:[%s14521_s0 + $0x1d6] sm:$0xff]  ;;  %v2673_v51 = vld [vmem:[%s14521_s0 + $0x8e] sm:$0xff] }
 0x246   :  { %3122 = vperm.xlu1 %10940, %v50_v56   ;;  %v7257_v56 = vld [vmem:[%s14521_s0 + $0x1de] sm:$0xff] }
 0x247   :  { %3127 = vperm.xlu0 %10939, %v51_v57   ;;  %v2674_v57 = vld [vmem:[%s14521_s0 + $0x96] sm:$0xff] }
 0x248   :  { %8900 = vmatmul.mubr.f32.gmra.mrb[22].mxu0 %v2349_v46  ;;  %9674 = vmatmul.mubr.f32.gmra.mrb[22].mxu1 %v7215_v48  ;;  %v7258_v46 = vld [vmem:[%s14521_s0 + $0x1e6] sm:$0xff]  ;;  %v2675_v48 = vld [vmem:[%s14521_s0 + $0x9e] sm:$0xff] }
 0x249   :  { %8902 = vmatprep.mubr.f32.mxu0 %v2350_v54  ;;  %9676 = vmatprep.mubr.f32.mxu1 %v7216_v55  ;;  %v7259_v54 = vld [vmem:[%s14521_s0 + $0x1ee] sm:$0xff]  ;;  %v2676_v55 = vld [vmem:[%s14521_s0 + $0xa6] sm:$0xff] }
 0x24a   :  { %3132 = vperm.xlu1 %10940, %v52_v59   ;;  %v7260_v59 = vld [vmem:[%s14521_s0 + $0x1f6] sm:$0xff] }
 0x24b   :  { %3137 = vperm.xlu0 %10939, %v53_v60   ;;  %v2677_v60 = vld [vmem:[%s14521_s0 + $0xae] sm:$0xff] }
 0x24c   :  { %8903 = vmatmul.mubr.f32.gmra.mrb[24].mxu0 %v2351_v3  ;;  %9677 = vmatmul.mubr.f32.gmra.mrb[24].mxu1 %v7217_v4  ;;  %v7261_v3 = vld [vmem:[%s14521_s0 + $0x1fe] sm:$0xff]  ;;  %v2678_v4 = vld [vmem:[%s14521_s0 + $0xb6] sm:$0xff] }
 0x24d   :  { %8905 = vmatprep.mubr.f32.mxu0 %v2352_v5  ;;  %9679 = vmatprep.mubr.f32.mxu1 %v7218_v9  ;;  %v7262_v5 = vld [vmem:[%s14521_s0 + $0x206] sm:$0xff]  ;;  %v2679_v9 = vld [vmem:[%s14521_s0 + $0xbe] sm:$0xff] }
 0x24e   :  { %3142 = vperm.xlu1 %10940, %v54_v16   ;;  %v7263_v16 = vld [vmem:[%s14521_s0 + $0x20e] sm:$0xff] }
 0x24f   :  { %3147 = vperm.xlu0 %10939, %v55_v17   ;;  %v2680_v17 = vld [vmem:[%s14521_s0 + $0xc6] sm:$0xff] }
 0x250   :  { %8906 = vmatmul.mubr.f32.gmra.mrb[26].mxu0 %v2353_v18  ;;  %9680 = vmatmul.mubr.f32.gmra.mrb[26].mxu1 %v7219_v19  ;;  %v7264_v18 = vld [vmem:[%s14521_s0 + $0x216] sm:$0xff]  ;;  %v2681_v19 = vld [vmem:[%s14521_s0 + $0xce] sm:$0xff] }
 0x251   :  { %8908 = vmatprep.mubr.f32.mxu0 %v2354_v23  ;;  %9682 = vmatprep.mubr.f32.mxu1 %v7220_v24  ;;  %v7265_v23 = vld [vmem:[%s14521_s0 + $0x21e] sm:$0xff]  ;;  %v2682_v24 = vld [vmem:[%s14521_s0 + $0xd6] sm:$0xff] }
 0x252   :  { %3152 = vperm.xlu1 %10940, %v56_v25   ;;  %v7266_v25 = vld [vmem:[%s14521_s0 + $0x226] sm:$0xff] }
 0x253   :  { %3157 = vperm.xlu0 %10939, %v57_v26   ;;  %v2683_v26 = vld [vmem:[%s14521_s0 + $0xde] sm:$0xff] }
 0x254   :  { %8909 = vmatmul.mubr.f32.gmra.mrb[28].mxu0 %v2355_v30  ;;  %9683 = vmatmul.mubr.f32.gmra.mrb[28].mxu1 %v7221_v31  ;;  %v7267_v30 = vld [vmem:[%s14521_s0 + $0x22e] sm:$0xff]  ;;  %v2684_v31 = vld [vmem:[%s14521_s0 + $0xe6] sm:$0xff] }
 0x255   :  { %8911 = vmatprep.mubr.f32.mxu0 %v2356_v32  ;;  %9685 = vmatprep.mubr.f32.mxu1 %v7222_v34  ;;  %v7268_v32 = vld [vmem:[%s14521_s0 + $0x236] sm:$0xff]  ;;  %v2685_v34 = vld [vmem:[%s14521_s0 + $0xee] sm:$0xff] }
 0x256   :  { %3162 = vperm.xlu1 %10940, %v58_v43   ;;  %v7269_v43 = vld [vmem:[%s14521_s0 + $0x23e] sm:$0xff] }
 0x257   :  { %3167 = vperm.xlu0 %10939, %v59_v44   ;;  %v2686_v44 = vld [vmem:[%s14521_s0 + $0xf6] sm:$0xff] }
 0x258   :  { %8912 = vmatmul.mubr.f32.gmra.mrb[30].mxu0 %v2357_v49  ;;  %9686 = vmatmul.mubr.f32.gmra.mrb[30].mxu1 %v7223_v50  ;;  %v7270_v49 = vld [vmem:[%s14521_s0 + $0x246] sm:$0xff]  ;;  %v2687_v50 = vld [vmem:[%s14521_s0 + $0xfe] sm:$0xff] }
 0x259   :  { %8914 = vmatprep.mubr.f32.mxu0 %v2358_v58  ;;  %9688 = vmatprep.mubr.f32.mxu1 %v7224_v63  ;;  %v7271_v58 = vld [vmem:[%s14521_s0 + $0x24e] sm:$0xff]  ;;  %v2688_v63 = vld [vmem:[%s14521_s0 + $0x106] sm:$0xff] }
 0x25a   :  { %3172 = vperm.xlu1 %10940, %v60_v0   ;;  %v7272_v0 = vld [vmem:[%s14521_s0 + $0x256] sm:$0xff] }
 0x25c   :  { %8915 = vmatmul.mubr.f32.gmra.mrb[32].mxu0 %v2359_v1  ;;  %9689 = vmatmul.mubr.f32.gmra.mrb[32].mxu1 %v7225_v6  ;;  %v2689_v1 = vld [vmem:[%s14521_s0 + $0x10e] sm:$0xff]  ;;  %v7273_v6 = vld [vmem:[%s14521_s0 + $0x25e] sm:$0xff] }
 0x25d   :  { %8917 = vmatprep.mubr.f32.mxu0 %v2360_v7  ;;  %9691 = vmatprep.mubr.f32.mxu1 %v7226_v8  ;;  %v2690_v7 = vld [vmem:[%s14521_s0 + $0x116] sm:$0xff]  ;;  %v7274_v8 = vld [vmem:[%s14521_s0 + $0x266] sm:$0xff] }
 0x260   :  { %8918 = vmatmul.mubr.f32.gmra.mrb[34].mxu0 %v2361_v13  ;;  %9692 = vmatmul.mubr.f32.gmra.mrb[34].mxu1 %v7227_v14  ;;  %v2691_v13 = vld [vmem:[%s14521_s0 + $0x11e] sm:$0xff]  ;;  %v7275_v14 = vld [vmem:[%s14521_s0 + $0x26e] sm:$0xff] }
 0x261   :  { %8952 = vmatprep.mubr.f32.mxu0 %v2660_v15  ;;  %9726 = vmatprep.mubr.f32.mxu1 %v7244_v33  ;;  %v2692_v15 = vld [vmem:[%s14521_s0 + $0x126] sm:$0xff]  ;;  %v7276_v33 = vld [vmem:[%s14521_s0 + $0x276] sm:$0xff] }
 0x264   :  { %8953 = vmatmul.mubr.f32.vlgmr.msra.gmra.mrb[0].mxu0 %v2661_v35  ;;  %9727 = vmatmul.mubr.f32.vlgmr.msra.gmra.mrb[0].mxu1 %v7245_v38  ;;  %v2693_v35 = vld [vmem:[%s14521_s0 + $0x12e] sm:$0xff]  ;;  %v7277_v38 = vld [vmem:[%s14521_s0 + $0x27e] sm:$0xff] }
 0x265   :  { %8955 = vmatprep.mubr.f32.mxu0 %v2662_v39  ;;  %9729 = vmatprep.mubr.f32.mxu1 %v7246_v40  ;;  %v2694_v39 = vld [vmem:[%s14521_s0 + $0x136] sm:$0xff]  ;;  %v7278_v40 = vld [vmem:[%s14521_s0 + $0x286] sm:$0xff] }
 0x268   :  { %8956 = vmatmul.mubr.f32.gmra.mrb[2].mxu0 %v2663_v41  ;;  %9730 = vmatmul.mubr.f32.gmra.mrb[2].mxu1 %v7247_v45  ;;  %v2695_v41 = vld [vmem:[%s14521_s0 + $0x13e] sm:$0xff]  ;;  %v7279_v45 = vld [vmem:[%s14521_s0 + $0x28e] sm:$0xff]  ;;  %s11013_s0 = smov [#allocation2]  }
 0x269   :  { %8958 = vmatprep.mubr.f32.mxu0 %v2664_v47  ;;  %9732 = vmatprep.mubr.f32.mxu1 %v7248_v52  ;;  %s6678_s11 = sshll.u32 %s11013_s0, 4  ;;  %s6679_s11 = int_to_ptr.vmem [resolvable:$true] %s6678_s11 }
 0x26a   :  { %s10941_s12 = scalar_lea.vmem %s6679_s11, 9216  ;;  %p10946_p1 = scmp.lt.s32.totalorder %s6679_s11, %s6679_s11 }
 0x26b   :  { %p10942_p0 = scmp.ne.s32.totalorder %s6679_s11, %s10941_s12  ;;  %p10947_p2 = scmp.lt.s32.totalorder %s10941_s12, %s10941_s12 }
 0x26c   :  { %8959 = vmatmul.mubr.f32.gmra.mrb[4].mxu0 %v2665_v53  ;;  %9733 = vmatmul.mubr.f32.gmra.mrb[4].mxu1 %v7249_v61 }
 0x26d   :  { %8961 = vmatprep.mubr.f32.mxu0 %v2666_v62  ;;  %9735 = vmatprep.mubr.f32.mxu1 %v7250_v2  ;;  %p10948_p3 = por %p10947_p2, %p10946_p1 }
 0x26f   :  { %p10949_p4 = pnand %p10948_p3, %p10942_p0 }
 0x270   :  { %8962 = vmatmul.mubr.f32.gmra.mrb[6].mxu0 %v2667_v10  ;;  %9736 = vmatmul.mubr.f32.gmra.mrb[6].mxu1 %v7251_v11 }
 0x271   :  { %9738 = vmatprep.mubr.f32.mxu1 %v7252_v12  ;;  %8964 = vmatprep.mubr.f32.mxu0 %v2668_v20 }
 0x274   :  { %8965 = vmatmul.mubr.f32.gmra.mrb[8].mxu0 %v2669_v21  ;;  %9739 = vmatmul.mubr.f32.gmra.mrb[8].mxu1 %v7253_v22 }
 0x275   :  { %9741 = vmatprep.mubr.f32.mxu1 %v7254_v27  ;;  %8967 = vmatprep.mubr.f32.mxu0 %v2670_v28 }
 0x276   :  { %v13710_v47 = vpop.permute.xlu0 %2997 }
 0x278   :  { %8968 = vmatmul.mubr.f32.gmra.mrb[10].mxu0 %v2671_v29  ;;  %9742 = vmatmul.mubr.f32.gmra.mrb[10].mxu1 %v7255_v36 }
 0x279   :  { %8970 = vmatprep.mubr.f32.mxu0 %v2672_v37  ;;  %9744 = vmatprep.mubr.f32.mxu1 %v7256_v42  ;;  %v13712_v52 = vpop.permute.xlu1 %3007 }
 0x27a   :  { %v13714_v53 = vpop.permute.xlu0 %3002 }
 0x27c   :  { %8971 = vmatmul.mubr.f32.gmra.mrb[12].mxu0 %v2673_v51  ;;  %9745 = vmatmul.mubr.f32.gmra.mrb[12].mxu1 %v7257_v56 }
 0x27d   :  { %8973 = vmatprep.mubr.f32.mxu0 %v2674_v57  ;;  %9747 = vmatprep.mubr.f32.mxu1 %v7258_v46  ;;  %v13716_v61 = vpop.permute.xlu1 %3012 }
 0x27e   :  { %v13718_v62 = vpop.permute.xlu0 %3017 }
 0x280   :  { %8974 = vmatmul.mubr.f32.gmra.mrb[14].mxu0 %v2675_v48  ;;  %9748 = vmatmul.mubr.f32.gmra.mrb[14].mxu1 %v7259_v54 }
 0x281   :  { %8976 = vmatprep.mubr.f32.mxu0 %v2676_v55  ;;  %9750 = vmatprep.mubr.f32.mxu1 %v7260_v59  ;;  %v13720_v2 = vpop.permute.xlu1 %3022 }
 0x282   :  { %14727 = vst [vmem:[#allocation9_spill] sm:$0xff] %v13720_v2  ;;  %v13722_v10 = vpop.permute.xlu0 %3027 }
 0x283   :  { %14728 = vst [vmem:[#allocation10_spill] sm:$0xff] %v13722_v10 }
 0x284   :  { %8977 = vmatmul.mubr.f32.gmra.mrb[16].mxu0 %v2677_v60  ;;  %9751 = vmatmul.mubr.f32.gmra.mrb[16].mxu1 %v7261_v3 }
 0x285   :  { %8979 = vmatprep.mubr.f32.mxu0 %v2678_v4  ;;  %9753 = vmatprep.mubr.f32.mxu1 %v7262_v5  ;;  %v13724_v11 = vpop.permute.xlu1 %3032 }
 0x286   :  { %14729 = vst [vmem:[#allocation11_spill] sm:$0xff] %v13724_v11  ;;  %v13726_v12 = vpop.permute.xlu0 %3037 }
 0x287   :  { %14730 = vst [vmem:[#allocation12_spill] sm:$0xff] %v13726_v12 }
 0x288   :  { %8980 = vmatmul.mubr.f32.gmra.mrb[18].mxu0 %v2679_v9  ;;  %9754 = vmatmul.mubr.f32.gmra.mrb[18].mxu1 %v7263_v16 }
 0x289   :  { %8982 = vmatprep.mubr.f32.mxu0 %v2680_v17  ;;  %9756 = vmatprep.mubr.f32.mxu1 %v7264_v18  ;;  %v13728_v20 = vpop.permute.xlu1 %3042 }
 0x28a   :  { %14731 = vst [vmem:[#allocation13_spill] sm:$0xff] %v13728_v20  ;;  %v13730_v21 = vpop.permute.xlu0 %3047 }
 0x28b   :  { %14732 = vst [vmem:[#allocation14_spill] sm:$0xff] %v13730_v21 }
 0x28c   :  { %8983 = vmatmul.mubr.f32.gmra.mrb[20].mxu0 %v2681_v19  ;;  %9757 = vmatmul.mubr.f32.gmra.mrb[20].mxu1 %v7265_v23 }
 0x28d   :  { %8985 = vmatprep.mubr.f32.mxu0 %v2682_v24  ;;  %9759 = vmatprep.mubr.f32.mxu1 %v7266_v25  ;;  %v13732_v22 = vpop.permute.xlu1 %3052 }
 0x28e   :  { %14733 = vst [vmem:[#allocation15_spill] sm:$0xff] %v13732_v22  ;;  %v13734_v27 = vpop.permute.xlu0 %3057 }
 0x28f   :  { %14734 = vst [vmem:[#allocation16_spill] sm:$0xff] %v13734_v27 }
 0x290   :  { %8986 = vmatmul.mubr.f32.gmra.mrb[22].mxu0 %v2683_v26  ;;  %9760 = vmatmul.mubr.f32.gmra.mrb[22].mxu1 %v7267_v30  ;;  %v11012_v26 = vmov 0.0  }
 0x291   :  { %8988 = vmatprep.mubr.f32.mxu0 %v2684_v31  ;;  %9762 = vmatprep.mubr.f32.mxu1 %v7268_v32  ;;  %v13736_v28 = vpop.permute.xlu1 %3062  ;;  %23 = vst [vmem:[#allocation4] sm:$0x1] %v11012_v26  ;;  %24 = vst [vmem:[#allocation6] sm:$0x1] %v11012_v26 }
 0x292   :  { %14735 = vst [vmem:[#allocation17_spill] sm:$0xff] %v13736_v28  ;;  %v13738_v29 = vpop.permute.xlu0 %3067 }
 0x293   :  { %14736 = vst [vmem:[#allocation18_spill] sm:$0xff] %v13738_v29 }
 0x294   :  { %8989 = vmatmul.mubr.f32.gmra.mrb[24].mxu0 %v2685_v34  ;;  %9763 = vmatmul.mubr.f32.gmra.mrb[24].mxu1 %v7269_v43 }
 0x295   :  { %8991 = vmatprep.mubr.f32.mxu0 %v2686_v44  ;;  %9765 = vmatprep.mubr.f32.mxu1 %v7270_v49  ;;  %v13740_v36 = vpop.permute.xlu1 %3072 }
 0x296   :  { %14737 = vst [vmem:[#allocation19_spill] sm:$0xff] %v13740_v36  ;;  %v13742_v37 = vpop.permute.xlu0 %3077 }
 0x297   :  { %14738 = vst [vmem:[#allocation20_spill] sm:$0xff] %v13742_v37 }
 0x298   :  { %8992 = vmatmul.mubr.f32.gmra.mrb[26].mxu0 %v2687_v50  ;;  %9766 = vmatmul.mubr.f32.gmra.mrb[26].mxu1 %v7271_v58 }
 0x299   :  { %8994 = vmatprep.mubr.f32.mxu0 %v2688_v63  ;;  %9768 = vmatprep.mubr.f32.mxu1 %v7272_v0  ;;  %v13744_v42 = vpop.permute.xlu1 %3082 }
 0x29a   :  { %14739 = vst [vmem:[#allocation21_spill] sm:$0xff] %v13744_v42  ;;  %v13762_v60 = vpop.permute.xlu0 %3087 }
 0x29b   :  { %14742 = vst [vmem:[#allocation24_spill] sm:$0xff] %v13762_v60 }
 0x29c   :  { %8995 = vmatmul.mubr.f32.gmra.mrb[28].mxu0 %v2689_v1  ;;  %9769 = vmatmul.mubr.f32.gmra.mrb[28].mxu1 %v7273_v6 }
 0x29d   :  { %8997 = vmatprep.mubr.f32.mxu0 %v2690_v7  ;;  %9771 = vmatprep.mubr.f32.mxu1 %v7274_v8 }
 0x29e   :  { %v13764_v3 = vpop.permute.xlu1 %3092 }
 0x29f   :  { %14743 = vst [vmem:[#allocation25_spill] sm:$0xff] %v13764_v3 }
 0x2a0   :  { %8998 = vmatmul.mubr.f32.gmra.mrb[30].mxu0 %v2691_v13  ;;  %9772 = vmatmul.mubr.f32.gmra.mrb[30].mxu1 %v7275_v14 }
 0x2a1   :  { %9000 = vmatprep.mubr.f32.mxu0 %v2692_v15  ;;  %9774 = vmatprep.mubr.f32.mxu1 %v7276_v33 }
 0x2a4   :  { %9001 = vmatmul.mubr.f32.gmra.mrb[32].mxu0 %v2693_v35  ;;  %9775 = vmatmul.mubr.f32.gmra.mrb[32].mxu1 %v7277_v38 }
 0x2a5   :  { %9003 = vmatprep.mubr.f32.mxu0 %v2694_v39  ;;  %9777 = vmatprep.mubr.f32.mxu1 %v7278_v40 }
 0x2a8   :  { %9004 = vmatmul.mubr.f32.gmra.mrb[34].mxu0 %v2695_v41  ;;  %9778 = vmatmul.mubr.f32.gmra.mrb[34].mxu1 %v7279_v45 }
 0x2ba   :  { %v13798_v6 = vpop.permute.xlu0 %3097 }
 0x2bb   :  { %14748 = vst [vmem:[#allocation30_spill] sm:$0xff] %v13798_v6 }
 0x2bd   :  { %v13800_v7 = vpop.permute.xlu1 %3102 }
 0x2be   :  { %14749 = vst [vmem:[#allocation31_spill] sm:$0xff] %v13800_v7 }
 0x337   :  { %v13746_v51 = vpop.f32.mrb[0].mxu0  ;;  %v13748_v56 = vpop.f32.mrb[0].mxu1 }
 0x338   :  { %14740 = vst [vmem:[#allocation22_spill] sm:$0xff] %v13748_v56  ;;  %v3176_v57 = vmul.f32 %v13746_v51, %v13714_v53  ;;  %v6388_v46 = vmul.f32 %v13748_v56, %v13714_v53  ;;  %v13754_v48 = vpop.f32.mrb[1].mxu0  ;;  %v13756_v54 = vpop.f32.mrb[1].mxu1 }
 0x339   :  { %14741 = vst [vmem:[#allocation23_spill] sm:$0xff] %v13756_v54  ;;  %v3175_v55 = vmul.f32 %v13710_v47, %v13754_v48  ;;  %v6387_v59 = vmul.f32 %v13756_v54, %v13710_v47 }
 0x33a   :  { %3425 = vst [vmem:[#allocation2 + $0x8] sm:$0xff] %v3176_v57  ;;  %6638 = vst [vmem:[#allocation2 + $0x128] sm:$0xff] %v6388_v46 }
 0x33b   :  { %v3211_v4 = vadd.f32 %v3176_v57, %v3175_v55  ;;  %3424 = vst [vmem:[#allocation2] sm:$0xff] %v3175_v55  ;;  %v6423_v5 = vadd.f32 %v6388_v46, %v6387_v59  ;;  %6637 = vst [vmem:[#allocation2 + $0x120] sm:$0xff] %v6387_v59  ;;  %v13766_v9 = vpop.f32.mrb[2].mxu0  ;;  %v13768_v16 = vpop.f32.mrb[2].mxu1 }
 0x33c   :  { %14744 = vst [vmem:[#allocation26_spill] sm:$0xff] %v13768_v16  ;;  %v3178_v17 = vmul.f32 %v13766_v9, %v13716_v61  ;;  %v6390_v18 = vmul.f32 %v13768_v16, %v13716_v61  ;;  %v13774_v19 = vpop.f32.mrb[3].mxu0  ;;  %v13776_v23 = vpop.f32.mrb[3].mxu1 }
 0x33d   :  { %14745 = vst [vmem:[#allocation27_spill] sm:$0xff] %v13776_v23  ;;  %v3177_v24 = vmul.f32 %v13712_v52, %v13774_v19  ;;  %v6389_v25 = vmul.f32 %v13776_v23, %v13712_v52 }
 0x33e   :  { %3427 = vst [vmem:[#allocation2 + $0x18] sm:$0xff] %v3178_v17  ;;  %6640 = vst [vmem:[#allocation2 + $0x138] sm:$0xff] %v6390_v18 }
 0x33f   :  { %v3212_v30 = vadd.f32 %v3211_v4, %v3177_v24  ;;  %3426 = vst [vmem:[#allocation2 + $0x10] sm:$0xff] %v3177_v24  ;;  %v6424_v31 = vadd.f32 %v6423_v5, %v6389_v25  ;;  %6639 = vst [vmem:[#allocation2 + $0x130] sm:$0xff] %v6389_v25  ;;  %v13782_v32 = vpop.f32.mrb[4].mxu0  ;;  %v13784_v34 = vpop.f32.mrb[4].mxu1 }
 0x340   :  { %14746 = vst [vmem:[#allocation28_spill] sm:$0xff] %v13784_v34  ;;  %v3180_v43 = vmul.f32 %v13782_v32, %v13720_v2  ;;  %v6392_v44 = vmul.f32 %v13784_v34, %v13720_v2  ;;  %v13790_v49 = vpop.f32.mrb[5].mxu0  ;;  %v13792_v50 = vpop.f32.mrb[5].mxu1 }
 0x341   :  { %14747 = vst [vmem:[#allocation29_spill] sm:$0xff] %v13792_v50  ;;  %v3179_v58 = vmul.f32 %v13718_v62, %v13790_v49  ;;  %v3213_v63 = vadd.f32 %v3212_v30, %v3178_v17  ;;  %v6391_v0 = vmul.f32 %v13792_v50, %v13718_v62  ;;  %v6425_v1 = vadd.f32 %v6424_v31, %v6390_v18 }
 0x342   :  { %3429 = vst [vmem:[#allocation2 + $0x28] sm:$0xff] %v3180_v43  ;;  %6642 = vst [vmem:[#allocation2 + $0x148] sm:$0xff] %v6392_v44 }
 0x343   :  { %v3214_v8 = vadd.f32 %v3213_v63, %v3179_v58  ;;  %3428 = vst [vmem:[#allocation2 + $0x20] sm:$0xff] %v3179_v58  ;;  %v6426_v13 = vadd.f32 %v6425_v1, %v6391_v0  ;;  %6641 = vst [vmem:[#allocation2 + $0x140] sm:$0xff] %v6391_v0  ;;  %v13802_v14 = vpop.f32.mrb[6].mxu0  ;;  %v13804_v15 = vpop.f32.mrb[6].mxu1 }
 0x344   :  { %14750 = vst [vmem:[#allocation32_spill] sm:$0xff] %v13804_v15  ;;  %v3182_v33 = vmul.f32 %v13802_v14, %v13724_v11  ;;  %v6394_v35 = vmul.f32 %v13804_v15, %v13724_v11  ;;  %v13810_v38 = vpop.f32.mrb[7].mxu0  ;;  %v13812_v39 = vpop.f32.mrb[7].mxu1 }
 0x345   :  { %14751 = vst [vmem:[#allocation33_spill] sm:$0xff] %v13812_v39  ;;  %v3181_v40 = vmul.f32 %v13722_v10, %v13810_v38  ;;  %v3215_v41 = vadd.f32 %v3214_v8, %v3180_v43  ;;  %v6393_v45 = vmul.f32 %v13812_v39, %v13722_v10  ;;  %v6427_v57 = vadd.f32 %v6426_v13, %v6392_v44  ;;  %v13834_v43 = vpop.permute.xlu0 %3107  ;;  %v13836_v44 = vpop.permute.xlu1 %3112 }
 0x346   :  { %3431 = vst [vmem:[#allocation2 + $0x38] sm:$0xff] %v3182_v33  ;;  %6644 = vst [vmem:[#allocation2 + $0x158] sm:$0xff] %v6394_v35 }
 0x347   :  { %v3216_v46 = vadd.f32 %v3215_v41, %v3181_v40  ;;  %3430 = vst [vmem:[#allocation2 + $0x30] sm:$0xff] %v3181_v40  ;;  %v6428_v55 = vadd.f32 %v6427_v57, %v6393_v45  ;;  %6643 = vst [vmem:[#allocation2 + $0x150] sm:$0xff] %v6393_v45  ;;  %v13818_v59 = vpop.f32.mrb[8].mxu0  ;;  %v13820_v4 = vpop.f32.mrb[8].mxu1 }
 0x348   :  { %14752 = vst [vmem:[#allocation34_spill] sm:$0xff] %v13820_v4  ;;  %v3184_v5 = vmul.f32 %v13818_v59, %v13728_v20  ;;  %v6396_v17 = vmul.f32 %v13820_v4, %v13728_v20  ;;  %v13826_v18 = vpop.f32.mrb[9].mxu0  ;;  %v13828_v24 = vpop.f32.mrb[9].mxu1  ;;  %14754 = vst [vmem:[#allocation36_spill] sm:$0xff] %v13834_v43 }
 0x349   :  { %14753 = vst [vmem:[#allocation35_spill] sm:$0xff] %v13828_v24  ;;  %v3183_v25 = vmul.f32 %v13726_v12, %v13826_v18  ;;  %v3217_v26 = vadd.f32 %v3216_v46, %v3182_v33  ;;  %v6395_v30 = vmul.f32 %v13828_v24, %v13726_v12  ;;  %v6429_v31 = vadd.f32 %v6428_v55, %v6394_v35 }
 0x34a   :  { %14755 = vst [vmem:[#allocation37_spill] sm:$0xff] %v13836_v44  ;;  %3433 = vst [vmem:[#allocation2 + $0x48] sm:$0xff] %v3184_v5 }
 0x34b   :  { %6646 = vst [vmem:[#allocation2 + $0x168] sm:$0xff] %v6396_v17  ;;  %v3218_v58 = vadd.f32 %v3217_v26, %v3183_v25  ;;  %3432 = vst [vmem:[#allocation2 + $0x40] sm:$0xff] %v3183_v25  ;;  %v6430_v63 = vadd.f32 %v6429_v31, %v6395_v30  ;;  %v13838_v0 = vpop.f32.mrb[10].mxu0  ;;  %v13840_v1 = vpop.f32.mrb[10].mxu1 }
 0x34c   :  { %6645 = vst [vmem:[#allocation2 + $0x160] sm:$0xff] %v6395_v30  ;;  %14756 = vst [vmem:[#allocation38_spill] sm:$0xff] %v13840_v1  ;;  %v3186_v8 = vmul.f32 %v13838_v0, %v13732_v22  ;;  %v6398_v13 = vmul.f32 %v13840_v1, %v13732_v22  ;;  %v13846_v33 = vpop.f32.mrb[11].mxu0  ;;  %v13848_v35 = vpop.f32.mrb[11].mxu1 }
 0x34d   :  { %14757 = vst [vmem:[#allocation39_spill] sm:$0xff] %v13848_v35  ;;  %v3185_v40 = vmul.f32 %v13730_v21, %v13846_v33  ;;  %v3219_v41 = vadd.f32 %v3218_v58, %v3184_v5  ;;  %v6397_v45 = vmul.f32 %v13848_v35, %v13730_v21  ;;  %v6431_v57 = vadd.f32 %v6430_v63, %v6396_v17 }
 0x34e   :  { %3435 = vst [vmem:[#allocation2 + $0x58] sm:$0xff] %v3186_v8  ;;  %6648 = vst [vmem:[#allocation2 + $0x178] sm:$0xff] %v6398_v13 }
 0x34f   :  { %v3220_v46 = vadd.f32 %v3219_v41, %v3185_v40  ;;  %3434 = vst [vmem:[#allocation2 + $0x50] sm:$0xff] %v3185_v40  ;;  %v6432_v55 = vadd.f32 %v6431_v57, %v6397_v45  ;;  %6647 = vst [vmem:[#allocation2 + $0x170] sm:$0xff] %v6397_v45  ;;  %v13854_v25 = vpop.f32.mrb[12].mxu0  ;;  %v13856_v26 = vpop.f32.mrb[12].mxu1 }
 0x350   :  { %14758 = vst [vmem:[#allocation40_spill] sm:$0xff] %v13856_v26  ;;  %v3188_v30 = vmul.f32 %v13854_v25, %v13736_v28  ;;  %v6400_v5 = vmul.f32 %v13856_v26, %v13736_v28  ;;  %v13862_v31 = vpop.f32.mrb[13].mxu0  ;;  %v13864_v58 = vpop.f32.mrb[13].mxu1 }
 0x351   :  { %14759 = vst [vmem:[#allocation41_spill] sm:$0xff] %v13864_v58  ;;  %v3187_v17 = vmul.f32 %v13734_v27, %v13862_v31  ;;  %v3221_v63 = vadd.f32 %v3220_v46, %v3186_v8  ;;  %v6399_v40 = vmul.f32 %v13864_v58, %v13734_v27  ;;  %v6433_v41 = vadd.f32 %v6432_v55, %v6398_v13  ;;  %v13870_v45 = vpop.permute.xlu0 %3117  ;;  %v13872_v57 = vpop.permute.xlu1 %3122 }
 0x352   :  { %14760 = vst [vmem:[#allocation42_spill] sm:$0xff] %v13870_v45  ;;  %14761 = vst [vmem:[#allocation43_spill] sm:$0xff] %v13872_v57 }
 0x353   :  { %3437 = vst [vmem:[#allocation2 + $0x68] sm:$0xff] %v3188_v30  ;;  %6650 = vst [vmem:[#allocation2 + $0x188] sm:$0xff] %v6400_v5  ;;  %v3222_v22 = vadd.f32 %v3221_v63, %v3187_v17  ;;  %v6434_v28 = vadd.f32 %v6433_v41, %v6399_v40  ;;  %v13874_v21 = vpop.f32.mrb[14].mxu0  ;;  %v13876_v20 = vpop.f32.mrb[14].mxu1 }
 0x354   :  { %3436 = vst [vmem:[#allocation2 + $0x60] sm:$0xff] %v3187_v17  ;;  %6649 = vst [vmem:[#allocation2 + $0x180] sm:$0xff] %v6399_v40  ;;  %v3190_v8 = vmul.f32 %v13874_v21, %v13740_v36  ;;  %v6402_v13 = vmul.f32 %v13876_v20, %v13740_v36  ;;  %v13882_v46 = vpop.f32.mrb[15].mxu0  ;;  %v13884_v55 = vpop.f32.mrb[15].mxu1 }
 0x355   :  { %14762 = vst [vmem:[#allocation44_spill] sm:$0xff] %v13876_v20  ;;  %14763 = vst [vmem:[#allocation45_spill] sm:$0xff] %v13884_v55  ;;  %v3189_v63 = vmul.f32 %v13738_v29, %v13882_v46  ;;  %v3223_v17 = vadd.f32 %v3222_v22, %v3188_v30  ;;  %v6401_v40 = vmul.f32 %v13884_v55, %v13738_v29 }
 0x356   :  { %v6435_v41 = vadd.f32 %v6434_v28, %v6400_v5  ;;  %3439 = vst [vmem:[#allocation2 + $0x78] sm:$0xff] %v3190_v8  ;;  %6652 = vst [vmem:[#allocation2 + $0x198] sm:$0xff] %v6402_v13 }
 0x357   :  { %v3224_v27 = vadd.f32 %v3223_v17, %v3189_v63  ;;  %3438 = vst [vmem:[#allocation2 + $0x70] sm:$0xff] %v3189_v63  ;;  %6651 = vst [vmem:[#allocation2 + $0x190] sm:$0xff] %v6401_v40  ;;  %v13890_v58 = vpop.f32.mrb[16].mxu0  ;;  %v13892_v36 = vpop.f32.mrb[16].mxu1 }
 0x358   :  { %v6436_v26 = vadd.f32 %v6435_v41, %v6401_v40  ;;  %14764 = vst [vmem:[#allocation46_spill] sm:$0xff] %v13892_v36  ;;  %v3192_v20 = vmul.f32 %v13890_v58, %v13744_v42  ;;  %v6404_v22 = vmul.f32 %v13892_v36, %v13744_v42  ;;  %v13898_v30 = vpop.f32.mrb[17].mxu0  ;;  %v13900_v29 = vpop.f32.mrb[17].mxu1 }
 0x359   :  { %14765 = vst [vmem:[#allocation47_spill] sm:$0xff] %v13900_v29  ;;  %v3191_v28 = vmul.f32 %v13742_v37, %v13898_v30  ;;  %v3225_v5 = vadd.f32 %v3224_v27, %v3190_v8  ;;  %v6403_v63 = vmul.f32 %v13900_v29, %v13742_v37  ;;  %v13906_v40 = vpop.permute.xlu0 %3127  ;;  %v13908_v41 = vpop.permute.xlu1 %3132 }
 0x35a   :  { %v6437_v17 = vadd.f32 %v6436_v26, %v6402_v13  ;;  %14766 = vst [vmem:[#allocation48_spill] sm:$0xff] %v13906_v40  ;;  %14767 = vst [vmem:[#allocation49_spill] sm:$0xff] %v13908_v41 }
 0x35b   :  { %3441 = vst [vmem:[#allocation2 + $0x88] sm:$0xff] %v3192_v20  ;;  %6654 = vst [vmem:[#allocation2 + $0x1a8] sm:$0xff] %v6404_v22  ;;  %v3226_v55 = vadd.f32 %v3225_v5, %v3191_v28  ;;  %v13910_v36 = vpop.f32.mrb[18].mxu0  ;;  %v13912_v1 = vpop.f32.mrb[18].mxu1 }
 0x35c   :  { %3440 = vst [vmem:[#allocation2 + $0x80] sm:$0xff] %v3191_v28  ;;  %v6438_v42 = vadd.f32 %v6437_v17, %v6403_v63  ;;  %6653 = vst [vmem:[#allocation2 + $0x1a0] sm:$0xff] %v6403_v63  ;;  %v3194_v27 = vmul.f32 %v13910_v36, %v13764_v3  ;;  %v6406_v26 = vmul.f32 %v13912_v1, %v13764_v3  ;;  %v13918_v8 = vpop.f32.mrb[19].mxu0  ;;  %v13920_v13 = vpop.f32.mrb[19].mxu1 }
 0x35d   :  { %14768 = vst [vmem:[#allocation50_spill] sm:$0xff] %v13912_v1  ;;  %14769 = vst [vmem:[#allocation51_spill] sm:$0xff] %v13920_v13  ;;  %v3193_v5 = vmul.f32 %v13762_v60, %v13918_v8  ;;  %v3227_v28 = vadd.f32 %v3226_v55, %v3192_v20  ;;  %v6405_v63 = vmul.f32 %v13920_v13, %v13762_v60 }
 0x35e   :  { %v6439_v17 = vadd.f32 %v6438_v42, %v6404_v22  ;;  %3443 = vst [vmem:[#allocation2 + $0x98] sm:$0xff] %v3194_v27  ;;  %6656 = vst [vmem:[#allocation2 + $0x1b8] sm:$0xff] %v6406_v26 }
 0x35f   :  { %v3228_v37 = vadd.f32 %v3227_v28, %v3193_v5  ;;  %3442 = vst [vmem:[#allocation2 + $0x90] sm:$0xff] %v3193_v5  ;;  %6655 = vst [vmem:[#allocation2 + $0x1b0] sm:$0xff] %v6405_v63  ;;  %v13926_v35 = vpop.f32.mrb[20].mxu0  ;;  %v13928_v3 = vpop.f32.mrb[20].mxu1 }
 0x360   :  { %v6440_v29 = vadd.f32 %v6439_v17, %v6405_v63  ;;  %14770 = vst [vmem:[#allocation52_spill] sm:$0xff] %v13928_v3  ;;  %v3196_v1 = vmul.f32 %v13926_v35, %v13800_v7  ;;  %v6408_v20 = vmul.f32 %v13928_v3, %v13800_v7  ;;  %v13934_v55 = vpop.f32.mrb[21].mxu0  ;;  %v13936_v60 = vpop.f32.mrb[21].mxu1 }
 0x361   :  { %14771 = vst [vmem:[#allocation53_spill] sm:$0xff] %v13936_v60  ;;  %v3195_v42 = vmul.f32 %v13798_v6, %v13934_v55  ;;  %v3229_v22 = vadd.f32 %v3228_v37, %v3194_v27  ;;  %v6407_v5 = vmul.f32 %v13936_v60, %v13798_v6  ;;  %v13942_v63 = vpop.permute.xlu0 %3137  ;;  %v13944_v17 = vpop.permute.xlu1 %3142 }
 0x362   :  { %v6441_v28 = vadd.f32 %v6440_v29, %v6406_v26  ;;  %14772 = vst [vmem:[#allocation54_spill] sm:$0xff] %v13942_v63  ;;  %14773 = vst [vmem:[#allocation55_spill] sm:$0xff] %v13944_v17 }
 0x363   :  { %3445 = vst [vmem:[#allocation2 + $0xa8] sm:$0xff] %v3196_v1  ;;  %6658 = vst [vmem:[#allocation2 + $0x1c8] sm:$0xff] %v6408_v20  ;;  %v3230_v13 = vadd.f32 %v3229_v22, %v3195_v42  ;;  %v13946_v3 = vpop.f32.mrb[22].mxu0  ;;  %v13948_v4 = vpop.f32.mrb[22].mxu1 }
 0x364   :  { %3444 = vst [vmem:[#allocation2 + $0xa0] sm:$0xff] %v3195_v42  ;;  %v6442_v7 = vadd.f32 %v6441_v28, %v6407_v5  ;;  %6657 = vst [vmem:[#allocation2 + $0x1c0] sm:$0xff] %v6407_v5  ;;  %v3198_v37 = vmul.f32 %v13946_v3, %v13836_v44  ;;  %v6410_v29 = vmul.f32 %v13948_v4, %v13836_v44  ;;  %v13954_v27 = vpop.f32.mrb[23].mxu0  ;;  %v13956_v26 = vpop.f32.mrb[23].mxu1 }
 0x365   :  { %14774 = vst [vmem:[#allocation56_spill] sm:$0xff] %v13948_v4  ;;  %14775 = vst [vmem:[#allocation57_spill] sm:$0xff] %v13956_v26  ;;  %v3197_v22 = vmul.f32 %v13834_v43, %v13954_v27  ;;  %v3231_v42 = vadd.f32 %v3230_v13, %v3196_v1  ;;  %v6409_v5 = vmul.f32 %v13956_v26, %v13834_v43 }
 0x366   :  { %v6443_v28 = vadd.f32 %v6442_v7, %v6408_v20  ;;  %3447 = vst [vmem:[#allocation2 + $0xb8] sm:$0xff] %v3198_v37  ;;  %6660 = vst [vmem:[#allocation2 + $0x1d8] sm:$0xff] %v6410_v29 }
 0x367   :  { %v3232_v6 = vadd.f32 %v3231_v42, %v3197_v22  ;;  %3446 = vst [vmem:[#allocation2 + $0xb0] sm:$0xff] %v3197_v22  ;;  %6659 = vst [vmem:[#allocation2 + $0x1d0] sm:$0xff] %v6409_v5  ;;  %v13962_v24 = vpop.f32.mrb[24].mxu0  ;;  %v13964_v44 = vpop.f32.mrb[24].mxu1 }
 0x368   :  { %v6444_v60 = vadd.f32 %v6443_v28, %v6409_v5  ;;  %14776 = vst [vmem:[#allocation58_spill] sm:$0xff] %v13964_v44  ;;  %v3200_v4 = vmul.f32 %v13962_v24, %v13872_v57  ;;  %v6412_v1 = vmul.f32 %v13964_v44, %v13872_v57  ;;  %v13970_v13 = vpop.f32.mrb[25].mxu0  ;;  %v13972_v43 = vpop.f32.mrb[25].mxu1 }
 0x369   :  { %14777 = vst [vmem:[#allocation59_spill] sm:$0xff] %v13972_v43  ;;  %v3199_v7 = vmul.f32 %v13870_v45, %v13970_v13  ;;  %v3233_v20 = vadd.f32 %v3232_v6, %v3198_v37  ;;  %v6411_v22 = vmul.f32 %v13972_v43, %v13870_v45  ;;  %v13978_v5 = vpop.permute.xlu0 %3147  ;;  %v13980_v28 = vpop.permute.xlu1 %3152 }
 0x36a   :  { %v6445_v42 = vadd.f32 %v6444_v60, %v6410_v29  ;;  %14778 = vst [vmem:[#allocation60_spill] sm:$0xff] %v13978_v5  ;;  %14779 = vst [vmem:[#allocation61_spill] sm:$0xff] %v13980_v28 }
 0x36b   :  { %3449 = vst [vmem:[#allocation2 + $0xc8] sm:$0xff] %v3200_v4  ;;  %6662 = vst [vmem:[#allocation2 + $0x1e8] sm:$0xff] %v6412_v1  ;;  %v3234_v26 = vadd.f32 %v3233_v20, %v3199_v7  ;;  %v13982_v44 = vpop.f32.mrb[26].mxu0  ;;  %v13984_v15 = vpop.f32.mrb[26].mxu1 }
 0x36c   :  { %3448 = vst [vmem:[#allocation2 + $0xc0] sm:$0xff] %v3199_v7  ;;  %v6446_v57 = vadd.f32 %v6445_v42, %v6411_v22  ;;  %6661 = vst [vmem:[#allocation2 + $0x1e0] sm:$0xff] %v6411_v22  ;;  %v3202_v6 = vmul.f32 %v13982_v44, %v13908_v41  ;;  %v6414_v60 = vmul.f32 %v13984_v15, %v13908_v41  ;;  %v13990_v37 = vpop.f32.mrb[27].mxu0  ;;  %v13992_v29 = vpop.f32.mrb[27].mxu1 }
 0x36d   :  { %14780 = vst [vmem:[#allocation62_spill] sm:$0xff] %v13982_v44  ;;  %14781 = vst [vmem:[#allocation63_spill] sm:$0xff] %v13984_v15  ;;  %v3201_v20 = vmul.f32 %v13906_v40, %v13990_v37  ;;  %v3235_v7 = vadd.f32 %v3234_v26, %v3200_v4  ;;  %v6413_v22 = vmul.f32 %v13992_v29, %v13906_v40 }
 0x36e   :  { %14782 = vst [vmem:[#allocation64_spill] sm:$0xff] %v13992_v29  ;;  %v6447_v42 = vadd.f32 %v6446_v57, %v6412_v1  ;;  %3451 = vst [vmem:[#allocation2 + $0xd8] sm:$0xff] %v3202_v6 }
 0x36f   :  { %6664 = vst [vmem:[#allocation2 + $0x1f8] sm:$0xff] %v6414_v60  ;;  %v3236_v45 = vadd.f32 %v3235_v7, %v3201_v20  ;;  %3450 = vst [vmem:[#allocation2 + $0xd0] sm:$0xff] %v3201_v20  ;;  %v13998_v39 = vpop.f32.mrb[28].mxu0  ;;  %v14000_v41 = vpop.f32.mrb[28].mxu1 }
 0x370   :  { %v6448_v43 = vadd.f32 %v6447_v42, %v6413_v22  ;;  %6663 = vst [vmem:[#allocation2 + $0x1f0] sm:$0xff] %v6413_v22  ;;  %14783 = vst [vmem:[#allocation65_spill] sm:$0xff] %v13998_v39  ;;  %v3204_v15 = vmul.f32 %v13998_v39, %v13944_v17  ;;  %v6416_v4 = vmul.f32 %v14000_v41, %v13944_v17  ;;  %v14006_v26 = vpop.f32.mrb[29].mxu0  ;;  %v14008_v40 = vpop.f32.mrb[29].mxu1 }
 0x371   :  { %14784 = vst [vmem:[#allocation66_spill] sm:$0xff] %v14000_v41  ;;  %14785 = vst [vmem:[#allocation67_spill] sm:$0xff] %v14006_v26  ;;  %v3203_v57 = vmul.f32 %v13942_v63, %v14006_v26  ;;  %v3237_v1 = vadd.f32 %v3236_v45, %v3202_v6  ;;  %v6415_v20 = vmul.f32 %v14008_v40, %v13942_v63  ;;  %v14014_v22 = vpop.permute.xlu0 %3157  ;;  %v14016_v42 = vpop.permute.xlu1 %3162 }
 0x372   :  { %14786 = vst [vmem:[#allocation68_spill] sm:$0xff] %v14008_v40  ;;  %v6449_v7 = vadd.f32 %v6448_v43, %v6414_v60  ;;  %14787 = vst [vmem:[#allocation69_spill] sm:$0xff] %v14014_v22 }
 0x373   :  { %14788 = vst [vmem:[#allocation70_spill] sm:$0xff] %v14016_v42  ;;  %3453 = vst [vmem:[#allocation2 + $0xe8] sm:$0xff] %v3204_v15  ;;  %v3238_v29 = vadd.f32 %v3237_v1, %v3203_v57  ;;  %v14018_v41 = vpop.f32.mrb[30].mxu0  ;;  %v14020_v34 = vpop.f32.mrb[30].mxu1 }
 0x374   :  { %6666 = vst [vmem:[#allocation2 + $0x208] sm:$0xff] %v6416_v4  ;;  %3452 = vst [vmem:[#allocation2 + $0xe0] sm:$0xff] %v3203_v57  ;;  %v6450_v17 = vadd.f32 %v6449_v7, %v6415_v20  ;;  %v3206_v45 = vmul.f32 %v14018_v41, %v13980_v28  ;;  %v6418_v43 = vmul.f32 %v14020_v34, %v13980_v28  ;;  %v14026_v6 = vpop.f32.mrb[31].mxu0  ;;  %v14028_v60 = vpop.f32.mrb[31].mxu1 }
 0x375   :  { %6665 = vst [vmem:[#allocation2 + $0x200] sm:$0xff] %v6415_v20  ;;  %14789 = vst [vmem:[#allocation71_spill] sm:$0xff] %v14018_v41  ;;  %v3205_v1 = vmul.f32 %v13978_v5, %v14026_v6  ;;  %v3239_v57 = vadd.f32 %v3238_v29, %v3204_v15  ;;  %v6417_v20 = vmul.f32 %v14028_v60, %v13978_v5 }
 0x376   :  { %14790 = vst [vmem:[#allocation72_spill] sm:$0xff] %v14020_v34  ;;  %14791 = vst [vmem:[#allocation73_spill] sm:$0xff] %v14026_v6  ;;  %v6451_v7 = vadd.f32 %v6450_v17, %v6416_v4 }
 0x377   :  { %14792 = vst [vmem:[#allocation74_spill] sm:$0xff] %v14028_v60  ;;  %3455 = vst [vmem:[#allocation2 + $0xf8] sm:$0xff] %v3206_v45  ;;  %v3240_v63 = vadd.f32 %v3239_v57, %v3205_v1  ;;  %v14034_v50 = vpop.f32.mrb[32].mxu0  ;;  %v14036_v28 = vpop.f32.mrb[32].mxu1 }
 0x378   :  { %6668 = vst [vmem:[#allocation2 + $0x218] sm:$0xff] %v6418_v43  ;;  %3454 = vst [vmem:[#allocation2 + $0xf0] sm:$0xff] %v3205_v1  ;;  %v6452_v40 = vadd.f32 %v6451_v7, %v6417_v20  ;;  %v3208_v34 = vmul.f32 %v14034_v50, %v14016_v42  ;;  %v6420_v15 = vmul.f32 %v14036_v28, %v14016_v42  ;;  %v14042_v29 = vpop.f32.mrb[33].mxu0  ;;  %v14044_v5 = vpop.f32.mrb[33].mxu1 }
 0x379   :  { %6667 = vst [vmem:[#allocation2 + $0x210] sm:$0xff] %v6417_v20  ;;  %14793 = vst [vmem:[#allocation75_spill] sm:$0xff] %v14034_v50  ;;  %v3207_v17 = vmul.f32 %v14014_v22, %v14042_v29  ;;  %v3241_v4 = vadd.f32 %v3240_v63, %v3206_v45  ;;  %v6419_v1 = vmul.f32 %v14044_v5, %v14014_v22  ;;  %v14050_v20 = vpop.permute.xlu0 %3167  ;;  %v14052_v7 = vpop.permute.xlu1 %3172 }
 0x37a   :  { %14794 = vst [vmem:[#allocation76_spill] sm:$0xff] %v14036_v28  ;;  %14795 = vst [vmem:[#allocation77_spill] sm:$0xff] %v14042_v29  ;;  %v6453_v57 = vadd.f32 %v6452_v40, %v6418_v43 }
 0x37b   :  { %14796 = vst [vmem:[#allocation78_spill] sm:$0xff] %v14044_v5  ;;  %14797 = vst [vmem:[#allocation79_spill] sm:$0xff] %v14050_v20  ;;  %v3242_v60 = vadd.f32 %v3241_v4, %v3207_v17  ;;  %v14054_v28 = vpop.f32.mrb[34].mxu0  ;;  %v14056_v16 = vpop.f32.mrb[34].mxu1 }
 0x37c   :  { %14798 = vst [vmem:[#allocation80_spill] sm:$0xff] %v14052_v7  ;;  %3457 = vst [vmem:[#allocation2 + $0x108] sm:$0xff] %v3208_v34  ;;  %v6454_v42 = vadd.f32 %v6453_v57, %v6419_v1  ;;  %v3210_v63 = vmul.f32 %v14054_v28, %v14052_v7  ;;  %v6422_v40 = vmul.f32 %v14056_v16, %v14052_v7  ;;  %v14062_v45 = vpop.f32.mrb[35].mxu0  ;;  %v14064_v43 = vpop.f32.mrb[35].mxu1 }
 0x37d   :  { %6670 = vst [vmem:[#allocation2 + $0x228] sm:$0xff] %v6420_v15  ;;  %3456 = vst [vmem:[#allocation2 + $0x100] sm:$0xff] %v3207_v17  ;;  %v3209_v4 = vmul.f32 %v14050_v20, %v14062_v45  ;;  %v3243_v17 = vadd.f32 %v3242_v60, %v3208_v34 }
 0x37e   :  { %6669 = vst [vmem:[#allocation2 + $0x220] sm:$0xff] %v6419_v1  ;;  %14799 = vst [vmem:[#allocation81_spill] sm:$0xff] %v14054_v28  ;;  %v6421_v1 = vmul.f32 %v14064_v43, %v14050_v20  ;;  %v6455_v57 = vadd.f32 %v6454_v42, %v6420_v15 }
 0x37f   :  { %14800 = vst [vmem:[#allocation82_spill] sm:$0xff] %v14056_v16  ;;  %14801 = vst [vmem:[#allocation83_spill] sm:$0xff] %v14062_v45  ;;  %v3244_v22 = vadd.f32 %v3243_v17, %v3209_v4 }
 0x380   :  { %14802 = vst [vmem:[#allocation84_spill] sm:$0xff] %v14064_v43  ;;  %3459 = vst [vmem:[#allocation2 + $0x118] sm:$0xff] %v3210_v63  ;;  %v6456_v5 = vadd.f32 %v6455_v57, %v6421_v1 }
 0x381   :  { %6672 = vst [vmem:[#allocation2 + $0x238] sm:$0xff] %v6422_v40  ;;  %3458 = vst [vmem:[#allocation2 + $0x110] sm:$0xff] %v3209_v4  ;;  %v3245_v23 = vadd.f32 %v3244_v22, %v3210_v63 }
 0x382   :  { %6671 = vst [vmem:[#allocation2 + $0x230] sm:$0xff] %v6421_v1  ;;  %v6457_v7 = vadd.f32 %v6456_v5, %v6422_v40 }
 0x383   :  { %v3246_v16 = vrot.slane %v3245_v23, 4 }
 0x384   :  { %v6458_v12 = vrot.slane %v6457_v7, 4 }
 0x385   :  { %v3247_v56 = vadd.f32 %v3246_v16, %v3245_v23 }
 0x386   :  { %v6459_v2 = vadd.f32 %v6458_v12, %v6457_v7 }
 0x387   :  { %v3248_v54 = vrot.slane %v3247_v56, 2 }
 0x388   :  { %v6460_v20 = vrot.slane %v6459_v2, 2 }
 0x389   :  { %v3249_v11 = vadd.f32 %v3248_v54, %v3247_v56 }
 0x38b   :  { %v3250_v10 = vrot.slane %v3249_v11, 1 }
 0x38d   :  { %v3251_v34 = vadd.f32 %v3250_v10, %v3249_v11 }
 0x38f   :  { %v14070_v60 = vmul.f32 0.00390625, %v3251_v34 }
 0x391   :  { %v3253_v42 = vsub.f32 %v13754_v48, %v14070_v60  ;;  %v3254_v15 = vsub.f32 %v13746_v51, %v14070_v60  ;;  %v3255_v5 = vsub.f32 %v13774_v19, %v14070_v60  ;;  %v3256_v16 = vsub.f32 %v13766_v9, %v14070_v60 }
 0x392   :  { %v3257_v56 = vsub.f32 %v13790_v49, %v14070_v60  ;;  %v3258_v10 = vsub.f32 %v13782_v32, %v14070_v60  ;;  %v3259_v11 = vsub.f32 %v13810_v38, %v14070_v60  ;;  %v3260_v12 = vsub.f32 %v13802_v14, %v14070_v60 }
 0x393   :  { %v3261_v51 = vsub.f32 %v13826_v18, %v14070_v60 }
 0x394   :  { %10952 = shalt.err (!%p10949_p4)
}
 0x395   :  { %s10953_s15 = scalar_lea.hbm %s14524_s3, 9216 }
 0x396   :  { %p10954_p5 = scmp.ne.s32.totalorder %s14524_s3, %s10953_s15  ;;  %p10957_p6 = scmp.lt.u32.totalorder %s10953_s15, %s14524_s3 }
 0x398   :  { %p10959_p7 = pnand %p10957_p6, %p10954_p5 }
 0x39a   :  { %10962 = shalt.err (!%p10959_p7)
}
 0x39b   :  { %s11014_s19 = smov 128   ;;  %s11015_s20 = smov 8   ;;  %v6461_v40 = vadd.f32 %v6460_v20, %v6459_v2  ;;  %v3289_v57 = vmul.f32 %v3253_v42, %v13710_v47  ;;  %v3290_v1 = vmul.f32 %v3254_v15, %v13714_v53  ;;  %v3291_v63 = vmul.f32 %v3255_v5, %v13712_v52  ;;  %v14803_v22 = vld [vmem:[#allocation9_spill] sm:$0xff]  ;;  %v14804_v38 = vld [vmem:[#allocation10_spill] sm:$0xff]  ;;  %v14805_v2 = vld [vmem:[#allocation11_spill] sm:$0xff] }
 0x39c   :  { %6684 = dma.vmem_to_hbm [thread:$0]  %s6679_s11, 9216, %s14524_s3, [#allocation3], %s11014_s19, %s11014_s19, %s11015_s20   ;;  %v3292_v4 = vmul.f32 %v3256_v16, %v13716_v61  ;;  %v3293_v7 = vmul.f32 %v3257_v56, %v13718_v62  ;;  %v3294_v18 = vmul.f32 %v3258_v10, %v14803_v22  ;;  %v3295_v14 = vmul.f32 %v3259_v11, %v14804_v38  ;;  %v14806_v42 = vld [vmem:[#allocation12_spill] sm:$0xff]  ;;  %v14807_v56 = vld [vmem:[#allocation23_spill] sm:$0xff]  ;;  %v14808_v10 = vld [vmem:[#allocation22_spill] sm:$0xff] }
 0x39d   :  { %v6462_v34 = vrot.slane %v6461_v40, 1  ;;  %v3325_v49 = vmul.f32 %v3289_v57, %v3289_v57  ;;  %v3326_v32 = vmul.f32 %v3290_v1, %v3290_v1  ;;  %v3296_v20 = vmul.f32 %v3260_v12, %v14805_v2  ;;  %v14809_v1 = vld [vmem:[#allocation27_spill] sm:$0xff]  ;;  %v14810_v57 = vld [vmem:[#allocation26_spill] sm:$0xff]  ;;  %v14850_v39 = vld [vmem:[#allocation17_spill] sm:$0xff]  ;;  %s11016_s3 = smov [#allocation4]  }
 0x39e   :  { %v3297_v19 = vmul.f32 %v3261_v51, %v14806_v42  ;;  %v3327_v15 = vmul.f32 %v3291_v63, %v3291_v63  ;;  %v3330_v5 = vmul.f32 %v3294_v18, %v3294_v18  ;;  %v3331_v9 = vmul.f32 %v3295_v14, %v3295_v14  ;;  %v14811_v51 = vld [vmem:[#allocation29_spill] sm:$0xff]  ;;  %v14817_v12 = vld [vmem:[#allocation39_spill] sm:$0xff]  ;;  %v14818_v63 = vld [vmem:[#allocation38_spill] sm:$0xff]  ;;  %s6691_s23 = sshll.u32 %s11016_s3, 4  ;;  %s6692_s23 = int_to_ptr.vmem [resolvable:$true] %s6691_s23 }
 0x39f   :  { %v6463_v17 = vadd.f32 %v6462_v34, %v6461_v40  ;;  %v3328_v40 = vmul.f32 %v3292_v4, %v3292_v4  ;;  %v3329_v34 = vmul.f32 %v3293_v7, %v3293_v7  ;;  %v3361_v16 = vadd.f32 %v3326_v32, %v3325_v49  ;;  %v14812_v7 = vld [vmem:[#allocation28_spill] sm:$0xff]  ;;  %v14813_v32 = vld [vmem:[#allocation33_spill] sm:$0xff]  ;;  %v14844_v26 = vld [vmem:[#allocation14_spill] sm:$0xff]  ;;  %s10963_s2 = scalar_lea.vmem %s6692_s23, 16  ;;  %s10967_s24 = scalar_lea.vmem %s6692_s23, 32 }
 0x3a0   :  { %v14814_v4 = vld [vmem:[#allocation32_spill] sm:$0xff]  ;;  %v14842_v41 = vsub.f32 %v13818_v59, %v14070_v60  ;;  %v14845_v44 = vsub.f32 %v13846_v33, %v14070_v60  ;;  %v3333_v45 = vmul.f32 %v3297_v19, %v3297_v19  ;;  %v14846_v29 = vld [vmem:[#allocation15_spill] sm:$0xff]  ;;  %p10964_p8 = scmp.ne.s32.totalorder %s6692_s23, %s10963_s2  ;;  %p10968_p9 = scmp.lt.s32.totalorder %s6692_s23, %s6692_s23 }
 0x3a1   :  { %v14163_v23 = vmul.f32 0.00390625, %v6463_v17  ;;  %v3362_v14 = vadd.f32 %v3361_v16, %v3327_v15  ;;  %v14816_v17 = vld [vmem:[#allocation34_spill] sm:$0xff]  ;;  %v14820_v15 = vld [vmem:[#allocation40_spill] sm:$0xff]  ;;  %p10969_p10 = scmp.lt.s32.totalorder %s10967_s24, %s10963_s2 }
 0x3a2   :  { %v3299_v50 = vmul.f32 %v14845_v44, %v14844_v26  ;;  %v14851_v44 = vsub.f32 %v13854_v25, %v14070_v60 }
 0x3a3   :  { %v6465_v54 = vsub.f32 %v14807_v56, %v14163_v23  ;;  %v6466_v11 = vsub.f32 %v14808_v10, %v14163_v23  ;;  %v14815_v10 = vld [vmem:[#allocation35_spill] sm:$0xff]  ;;  %v3363_v49 = vadd.f32 %v3362_v14, %v3328_v40  ;;  %v14827_v40 = vld [vmem:[#allocation53_spill] sm:$0xff]  ;;  %p10970_p11 = por %p10969_p10, %p10968_p9 }
 0x3a4   :  { %v3302_v33 = vmul.f32 %v14851_v44, %v14850_v39 }
 0x3a5   :  { %v3364_v16 = vadd.f32 %v3363_v49, %v3329_v34  ;;  %v14834_v34 = vld [vmem:[#allocation63_spill] sm:$0xff]  ;;  %v3332_v49 = vmul.f32 %v3296_v20, %v3296_v20  ;;  %v6502_v25 = vmul.f32 %v6466_v11, %v13714_v53  ;;  %p10971_p12 = pnand %p10970_p11, %p10964_p8 }
 0x3a7   :  { %v3365_v14 = vadd.f32 %v3364_v16, %v3330_v5  ;;  %v14841_v16 = vld [vmem:[#allocation13_spill] sm:$0xff]  ;;  %v14847_v5 = vsub.f32 %v13838_v0, %v14070_v60  ;;  %v14853_v0 = vsub.f32 %v13882_v46, %v14070_v60  ;;  %v6538_v11 = vmul.f32 %v6502_v25, %v6502_v25 }
 0x3a8   :  { %v3298_v6 = vmul.f32 %v14842_v41, %v14841_v16  ;;  %v14848_v41 = vld [vmem:[#allocation16_spill] sm:$0xff] }
 0x3a9   :  { %v3366_v48 = vadd.f32 %v3365_v14, %v3331_v9  ;;  %v3300_v43 = vmul.f32 %v14847_v5, %v14846_v29  ;;  %v14849_v9 = vsub.f32 %v13862_v31, %v14070_v60  ;;  %v3335_v14 = vmul.f32 %v3299_v50, %v3299_v50  ;;  %v14854_v5 = vld [vmem:[#allocation19_spill] sm:$0xff] }
 0x3aa   :  { %v3334_v56 = vmul.f32 %v3298_v6, %v3298_v6  ;;  %v14855_v31 = vsub.f32 %v13874_v21, %v14070_v60 }
 0x3ab   :  { %v3367_v18 = vadd.f32 %v3366_v48, %v3332_v49  ;;  %v3301_v20 = vmul.f32 %v14849_v9, %v14848_v41  ;;  %v3336_v48 = vmul.f32 %v3300_v43, %v3300_v43  ;;  %v14852_v49 = vld [vmem:[#allocation18_spill] sm:$0xff]  ;;  %v6501_v9 = vmul.f32 %v6465_v54, %v13710_v47  ;;  %v14856_v43 = vld [vmem:[#allocation20_spill] sm:$0xff] }
 0x3ac   :  { %v3303_v6 = vmul.f32 %v14853_v0, %v14852_v49  ;;  %v3304_v50 = vmul.f32 %v14855_v31, %v14854_v5  ;;  %v14860_v47 = vsub.f32 %v14809_v1, %v14163_v23  ;;  %v3408_v31 = vld [vmem:[#allocation4] sm:$0x1]  ;;  %v14865_v1 = vsub.f32 %v13910_v36, %v14070_v60 }
 0x3ad   :  { %v3368_v59 = vadd.f32 %v3367_v18, %v3333_v45  ;;  %v3337_v45 = vmul.f32 %v3301_v20, %v3301_v20  ;;  %v14858_v20 = vld [vmem:[#allocation21_spill] sm:$0xff]  ;;  %v6537_v53 = vmul.f32 %v6501_v9, %v6501_v9 }
 0x3ae   :  { %v3339_v46 = vmul.f32 %v3303_v6, %v3303_v6  ;;  %v3340_v21 = vmul.f32 %v3304_v50, %v3304_v50  ;;  %v6503_v54 = vmul.f32 %v14860_v47, %v13712_v52  ;;  %v14870_v47 = vld [vmem:[#allocation31_spill] sm:$0xff] }
 0x3af   :  { %v3369_v28 = vadd.f32 %v3368_v59, %v3334_v56  ;;  %v3338_v56 = vmul.f32 %v3302_v33, %v3302_v33  ;;  %v14861_v33 = vld [vmem:[#allocation24_spill] sm:$0xff] }
 0x3b1   :  { %v3370_v19 = vadd.f32 %v3369_v28, %v3335_v14  ;;  %v14857_v28 = vsub.f32 %v13898_v30, %v14070_v60  ;;  %v14862_v30 = vsub.f32 %v13918_v8, %v14070_v60  ;;  %v14866_v8 = vsub.f32 %v14811_v51, %v14163_v23 }
 0x3b3   :  { %v3371_v18 = vadd.f32 %v3370_v19, %v3336_v48  ;;  %v3305_v14 = vmul.f32 %v14857_v28, %v14856_v43  ;;  %v14859_v48 = vsub.f32 %v13890_v58, %v14070_v60  ;;  %v3307_v6 = vmul.f32 %v14862_v30, %v14861_v33 }
 0x3b4   :  { %v14863_v58 = vsub.f32 %v14810_v57, %v14163_v23  ;;  %v6505_v25 = vmul.f32 %v14866_v8, %v13718_v62  ;;  %v6539_v28 = vmul.f32 %v6503_v54, %v6503_v54  ;;  %v14871_v54 = vsub.f32 %v13926_v35, %v14070_v60 }
 0x3b5   :  { %v3372_v59 = vadd.f32 %v3371_v18, %v3337_v45  ;;  %v3306_v19 = vmul.f32 %v14859_v48, %v14858_v20  ;;  %v3341_v45 = vmul.f32 %v3305_v14, %v3305_v14  ;;  %v6573_v14 = vadd.f32 %v6538_v11, %v6537_v53 }
 0x3b6   :  { %v6504_v50 = vmul.f32 %v14863_v58, %v13716_v61  ;;  %v14868_v61 = vsub.f32 %v13934_v55, %v14070_v60  ;;  %v3343_v48 = vmul.f32 %v3307_v6, %v3307_v6  ;;  %v3310_v53 = vmul.f32 %v14871_v54, %v14870_v47 }
 0x3b7   :  { %v3373_v44 = vadd.f32 %v3372_v59, %v3338_v56  ;;  %v14864_v56 = vld [vmem:[#allocation25_spill] sm:$0xff]  ;;  %v3342_v59 = vmul.f32 %v3306_v19, %v3306_v19  ;;  %v14869_v19 = vsub.f32 %v14812_v7, %v14163_v23  ;;  %v6574_v51 = vadd.f32 %v6573_v14, %v6539_v28 }
 0x3b8   :  { %v3308_v52 = vmul.f32 %v14865_v1, %v14864_v56  ;;  %v14872_v55 = vsub.f32 %v14813_v32, %v14163_v23  ;;  %v14874_v7 = vsub.f32 %v13954_v27, %v14070_v60  ;;  %v14875_v35 = vsub.f32 %v14814_v4, %v14163_v23 }
 0x3b9   :  { %v3374_v0 = vadd.f32 %v3373_v44, %v3339_v46  ;;  %v14298_v46 = vsub.f32 %v14070_v60, %v3408_v31  ;;  %v14867_v44 = vld [vmem:[#allocation30_spill] sm:$0xff]  ;;  %v3346_v8 = vmul.f32 %v3310_v53, %v3310_v53  ;;  %v14878_v27 = vsub.f32 %v14815_v10, %v14163_v23 }
 0x3ba   :  { %v3309_v57 = vmul.f32 %v14868_v61, %v14867_v44  ;;  %v3344_v11 = vmul.f32 %v3308_v52, %v3308_v52  ;;  %v6507_v6 = vmul.f32 %v14872_v55, %v14804_v38  ;;  %v6508_v1 = vmul.f32 %v14875_v35, %v14805_v2  ;;  %v14889_v35 = vld [vmem:[#allocation62_spill] sm:$0xff] }
 0x3bb   :  { %v3375_v18 = vadd.f32 %v3374_v0, %v3340_v21  ;;  %v6506_v21 = vmul.f32 %v14869_v19, %v14803_v22  ;;  %v6540_v0 = vmul.f32 %v6504_v50, %v6504_v50  ;;  %v3413_v62 = vadd.f32 %v14298_v46, %v3408_v31  ;;  %v14873_v22 = vld [vmem:[#allocation36_spill] sm:$0xff] }
 0x3bc   :  { %v3311_v31 = vmul.f32 %v14874_v7, %v14873_v22  ;;  %v3345_v58 = vmul.f32 %v3309_v57, %v3309_v57  ;;  %v14877_v38 = vsub.f32 %v13946_v3, %v14070_v60  ;;  %v6509_v28 = vmul.f32 %v14878_v27, %v14806_v42  ;;  %v14879_v57 = vld [vmem:[#allocation42_spill] sm:$0xff] }
 0x3bd   :  { %v3376_v9 = vadd.f32 %v3375_v18, %v3341_v45  ;;  %v6541_v45 = vmul.f32 %v6505_v25, %v6505_v25  ;;  %v6575_v18 = vadd.f32 %v6574_v51, %v6540_v0  ;;  %3414 = vst [vmem:[#allocation4] sm:$0x1] %v3413_v62  ;;  %v6542_v52 = vmul.f32 %v6506_v21, %v6506_v21  ;;  %v14882_v51 = vld [vmem:[#allocation43_spill] sm:$0xff] }
 0x3be   :  { %v6543_v14 = vmul.f32 %v6507_v6, %v6507_v6  ;;  %v14880_v2 = vsub.f32 %v13970_v13, %v14070_v60  ;;  %v14881_v3 = vsub.f32 %v14816_v17, %v14163_v23  ;;  %v6544_v21 = vmul.f32 %v6508_v1, %v6508_v1 }
 0x3bf   :  { %v3377_v36 = vadd.f32 %v3376_v9, %v3342_v59  ;;  %v6576_v59 = vadd.f32 %v6575_v18, %v6541_v45  ;;  %v14876_v9 = vld [vmem:[#allocation37_spill] sm:$0xff]  ;;  %v14883_v42 = vsub.f32 %v13962_v24, %v14070_v60  ;;  %v14884_v13 = vsub.f32 %v14817_v12, %v14163_v23 }
 0x3c0   :  { %v3312_v32 = vmul.f32 %v14877_v38, %v14876_v9  ;;  %v3313_v4 = vmul.f32 %v14880_v2, %v14879_v57  ;;  %v6510_v19 = vmul.f32 %v14881_v3, %v14841_v16  ;;  %v14885_v16 = vld [vmem:[#allocation48_spill] sm:$0xff]  ;;  %v14886_v6 = vsub.f32 %v13990_v37, %v14070_v60  ;;  %v14891_v38 = vld [vmem:[#allocation41_spill] sm:$0xff] }
 0x3c1   :  { %v3378_v30 = vadd.f32 %v3377_v36, %v3343_v48  ;;  %v6577_v61 = vadd.f32 %v6576_v59, %v6542_v52  ;;  %v3347_v48 = vmul.f32 %v3311_v31, %v3311_v31  ;;  %v3314_v10 = vmul.f32 %v14883_v42, %v14882_v51 }
 0x3c2   :  { %v3348_v62 = vmul.f32 %v3312_v32, %v3312_v32  ;;  %v3315_v45 = vmul.f32 %v14886_v6, %v14885_v16  ;;  %v3349_v24 = vmul.f32 %v3313_v4, %v3313_v4  ;;  %v14887_v7 = vsub.f32 %v14818_v63, %v14163_v23 }
 0x3c3   :  { %v3379_v50 = vadd.f32 %v3378_v30, %v3344_v11  ;;  %v6578_v0 = vadd.f32 %v6577_v61, %v6543_v14  ;;  %v6511_v11 = vmul.f32 %v14884_v13, %v14844_v26  ;;  %v6545_v30 = vmul.f32 %v6509_v28, %v6509_v28  ;;  %v14894_v28 = vld [vmem:[#allocation67_spill] sm:$0xff] }
 0x3c4   :  { %v6620_v53 = vld [vmem:[#allocation4] sm:$0x1]  ;;  %v6512_v12 = vmul.f32 %v14887_v7, %v14846_v29  ;;  %v6546_v26 = vmul.f32 %v6510_v19, %v6510_v19  ;;  %v14890_v1 = vsub.f32 %v14889_v35, %v14070_v60  ;;  %v3350_v37 = vmul.f32 %v3314_v10, %v3314_v10  ;;  %v14893_v29 = vld [vmem:[#allocation54_spill] sm:$0xff] }
 0x3c5   :  { %v3380_v25 = vadd.f32 %v3379_v50, %v3345_v58  ;;  %v6579_v55 = vadd.f32 %v6578_v0, %v6544_v21  ;;  %v14350_v17 = vsub.f32 %v14163_v23, %v6620_v53  ;;  %v14888_v50 = vld [vmem:[#allocation49_spill] sm:$0xff]  ;;  %v14892_v32 = vsub.f32 %v14891_v38, %v14163_v23 }
 0x3c6   :  { %v3316_v52 = vmul.f32 %v14890_v1, %v14888_v50  ;;  %v14895_v14 = vsub.f32 %v14894_v28, %v14070_v60  ;;  %v3351_v2 = vmul.f32 %v3315_v45, %v3315_v45  ;;  %v6548_v3 = vmul.f32 %v6512_v12, %v6512_v12  ;;  %v14898_v21 = vld [vmem:[#allocation65_spill] sm:$0xff] }
 0x3c7   :  { %v3381_v36 = vadd.f32 %v3380_v25, %v3346_v8  ;;  %v6580_v31 = vadd.f32 %v6579_v55, %v6545_v30  ;;  %v6624_v58 = vmul.f32 0.5, %v14350_v17  ;;  %v6513_v8 = vmul.f32 %v14892_v32, %v14848_v41  ;;  %v14897_v41 = vld [vmem:[#allocation55_spill] sm:$0xff] }
 0x3c8   :  { %v6547_v25 = vmul.f32 %v6511_v11, %v6511_v11  ;;  %v3317_v61 = vmul.f32 %v14895_v14, %v14893_v29  ;;  %v14899_v0 = vsub.f32 %v14898_v21, %v14070_v60  ;;  %v3352_v10 = vmul.f32 %v3316_v52, %v3316_v52 }
 0x3c9   :  { %v3382_v54 = vadd.f32 %v3381_v36, %v3347_v48  ;;  %v6581_v27 = vadd.f32 %v6580_v31, %v6546_v26  ;;  %v6625_v63 = vadd.f32 %v6624_v58, %v6620_v53  ;;  %v14896_v48 = vsub.f32 %v14820_v15, %v14163_v23 }
 0x3ca   :  { %v3318_v42 = vmul.f32 %v14899_v0, %v14897_v41 }
 0x3cb   :  { %v3383_v18 = vadd.f32 %v3382_v54, %v3348_v62  ;;  %v6514_v36 = vmul.f32 %v14896_v48, %v14850_v39  ;;  %v6582_v19 = vadd.f32 %v6581_v27, %v6547_v25  ;;  %6626 = vst [vmem:[#allocation4] sm:$0x1] %v6625_v63 }
 0x3cd   :  { %v3384_v59 = vadd.f32 %v3383_v18, %v3349_v24 }
 0x3cf   :  { %v3385_v4 = vadd.f32 %v3384_v59, %v3350_v37 }
 0x3d1   :  { %v3386_v62 = vadd.f32 %v3385_v4, %v3351_v2 }
 0x3d2   :  { %10974 = shalt.err (!%p10971_p12)
}
 0x3d3   :  { %s10975_s27 = scalar_lea.hbm %s14525_s4, 16 }
 0x3d4   :  { %p10976_p13 = scmp.ne.s32.totalorder %s14525_s4, %s10975_s27  ;;  %p10979_p0 = scmp.lt.u32.totalorder %s10975_s27, %s14525_s4 }
 0x3d6   :  { %p10981_p1 = pnand %p10979_p0, %p10976_p13 }
 0x3d8   :  { %10984 = shalt.err (!%p10981_p1)
}
 0x3d9   :  { %6694 = dma.vmem_to_hbm [thread:$0]  %s6692_s23, 16, %s14525_s4, [#allocation5]   ;;  %v14900_v39 = vld [vmem:[#allocation45_spill] sm:$0xff]  ;;  %v6549_v53 = vmul.f32 %v6513_v8, %v6513_v8  ;;  %v6583_v13 = vadd.f32 %v6582_v19, %v6548_v3  ;;  %v14902_v11 = vld [vmem:[#allocation60_spill] sm:$0xff]  ;;  %v3353_v45 = vmul.f32 %v3317_v61, %v3317_v61  ;;  %v3387_v24 = vadd.f32 %v3386_v62, %v3352_v10  ;;  %v14908_v35 = vld [vmem:[#allocation71_spill] sm:$0xff] }
 0x3da   :  { %v14901_v15 = vsub.f32 %v14900_v39, %v14163_v23  ;;  %v14903_v30 = vld [vmem:[#allocation73_spill] sm:$0xff]  ;;  %v14905_v18 = vld [vmem:[#allocation44_spill] sm:$0xff]  ;;  %v6550_v26 = vmul.f32 %v6514_v36, %v6514_v36  ;;  %v3354_v52 = vmul.f32 %v3318_v42, %v3318_v42  ;;  %v14910_v59 = vld [vmem:[#allocation47_spill] sm:$0xff]  ;;  %s11017_s4 = smov [#allocation6]  }
 0x3db   :  { %v14904_v55 = vsub.f32 %v14903_v30, %v14070_v60  ;;  %v14906_v7 = vsub.f32 %v14905_v18, %v14163_v23  ;;  %v6584_v31 = vadd.f32 %v6583_v13, %v6549_v53  ;;  %v14907_v58 = vld [vmem:[#allocation61_spill] sm:$0xff]  ;;  %v3388_v37 = vadd.f32 %v3387_v24, %v3353_v45  ;;  %v14915_v2 = vld [vmem:[#allocation46_spill] sm:$0xff]  ;;  %v14918_v21 = vld [vmem:[#allocation75_spill] sm:$0xff]  ;;  %s6701_s9 = sshll.u32 %s11017_s4, 4  ;;  %s6702_s9 = int_to_ptr.vmem [resolvable:$true] %s6701_s9 }
 0x3dc   :  { %v6515_v54 = vmul.f32 %v14901_v15, %v14852_v49  ;;  %v14909_v49 = vsub.f32 %v14908_v35, %v14070_v60  ;;  %v14911_v38 = vsub.f32 %v14910_v59, %v14163_v23  ;;  %v14912_v27 = vld [vmem:[#allocation69_spill] sm:$0xff]  ;;  %v14916_v4 = vsub.f32 %v14915_v2, %v14163_v23  ;;  %v14917_v19 = vld [vmem:[#allocation70_spill] sm:$0xff]  ;;  %v14920_v62 = vld [vmem:[#allocation51_spill] sm:$0xff]  ;;  %s10985_s10 = scalar_lea.vmem %s6702_s9, 16  ;;  %s10989_s0 = scalar_lea.vmem %s6702_s9, 32 }
 0x3dd   :  { %v3319_v6 = vmul.f32 %v14904_v55, %v14902_v11  ;;  %v6516_v12 = vmul.f32 %v14906_v7, %v14854_v5  ;;  %v6585_v25 = vadd.f32 %v6584_v31, %v6550_v26  ;;  %v14913_v63 = vld [vmem:[#allocation77_spill] sm:$0xff]  ;;  %v3389_v61 = vadd.f32 %v3388_v37, %v3354_v52  ;;  %v14922_v13 = vld [vmem:[#allocation79_spill] sm:$0xff]  ;;  %v14925_v24 = vld [vmem:[#allocation50_spill] sm:$0xff]  ;;  %p10986_p2 = scmp.ne.s32.totalorder %s6702_s9, %s10985_s10  ;;  %p10990_p3 = scmp.lt.s32.totalorder %s6702_s9, %s6702_s9 }
 0x3de   :  { %v3320_v1 = vmul.f32 %v14909_v49, %v14907_v58  ;;  %v6517_v32 = vmul.f32 %v14911_v38, %v14856_v43  ;;  %v6551_v8 = vmul.f32 %v6515_v54, %v6515_v54  ;;  %v14914_v5 = vsub.f32 %v14913_v63, %v14070_v60  ;;  %v14923_v30 = vld [vmem:[#allocation83_spill] sm:$0xff]  ;;  %v14927_v31 = vld [vmem:[#allocation80_spill] sm:$0xff]  ;;  %v14928_v35 = vld [vmem:[#allocation81_spill] sm:$0xff]  ;;  %p10991_p4 = scmp.lt.s32.totalorder %s10989_s0, %s10985_s10 }
 0x3df   :  { %v3355_v14 = vmul.f32 %v3319_v6, %v3319_v6  ;;  %v6518_v48 = vmul.f32 %v14916_v4, %v14858_v20  ;;  %v6552_v36 = vmul.f32 %v6516_v12, %v6516_v12  ;;  %v14919_v43 = vsub.f32 %v14918_v21, %v14070_v60  ;;  %v14933_v2 = vld [vmem:[#allocation57_spill] sm:$0xff] }
 0x3e0   :  { %v3321_v28 = vmul.f32 %v14914_v5, %v14912_v27  ;;  %v6586_v3 = vadd.f32 %v6585_v25, %v6551_v8  ;;  %v3356_v42 = vmul.f32 %v3320_v1, %v3320_v1  ;;  %v14921_v39 = vsub.f32 %v14920_v62, %v14163_v23  ;;  %p10992_p5 = por %p10991_p4, %p10990_p3 }
 0x3e1   :  { %v3322_v0 = vmul.f32 %v14919_v43, %v14917_v19  ;;  %v3390_v10 = vadd.f32 %v3389_v61, %v3355_v14  ;;  %v6553_v54 = vmul.f32 %v6517_v32, %v6517_v32  ;;  %v14924_v20 = vsub.f32 %v14923_v30, %v14070_v60 }
 0x3e2   :  { %v6519_v15 = vmul.f32 %v14921_v39, %v14861_v33  ;;  %v6587_v53 = vadd.f32 %v6586_v3, %v6552_v36  ;;  %v3357_v6 = vmul.f32 %v3321_v28, %v3321_v28  ;;  %v14926_v18 = vsub.f32 %v14925_v24, %v14163_v23  ;;  %v14935_v3 = vld [vmem:[#allocation56_spill] sm:$0xff]  ;;  %p10993_p6 = pnand %p10992_p5, %p10986_p2 }
 0x3e3   :  { %v3323_v55 = vmul.f32 %v14924_v20, %v14922_v13  ;;  %v3391_v45 = vadd.f32 %v3390_v10, %v3356_v42  ;;  %v6554_v12 = vmul.f32 %v6518_v48, %v6518_v48  ;;  %v14929_v33 = vsub.f32 %v14928_v35, %v14070_v60  ;;  %v14937_v10 = vld [vmem:[#allocation59_spill] sm:$0xff] }
 0x3e4   :  { %v6520_v7 = vmul.f32 %v14926_v18, %v14864_v56  ;;  %v6588_v26 = vadd.f32 %v6587_v53, %v6553_v54  ;;  %v3358_v1 = vmul.f32 %v3322_v0, %v3322_v0  ;;  %v14930_v37 = vsub.f32 %v14827_v40, %v14163_v23  ;;  %v14931_v56 = vld [vmem:[#allocation52_spill] sm:$0xff] }
 0x3e5   :  { %v3324_v49 = vmul.f32 %v14929_v33, %v14927_v31  ;;  %v3392_v52 = vadd.f32 %v3391_v45, %v3357_v6  ;;  %v6555_v38 = vmul.f32 %v6519_v15, %v6519_v15  ;;  %v3359_v8 = vmul.f32 %v3323_v55, %v3323_v55 }
 0x3e6   :  { %v6521_v59 = vmul.f32 %v14930_v37, %v14867_v44  ;;  %v6589_v32 = vadd.f32 %v6588_v26, %v6554_v12  ;;  %v14932_v63 = vsub.f32 %v14931_v56, %v14163_v23  ;;  %v6556_v28 = vmul.f32 %v6520_v7, %v6520_v7 }
 0x3e7   :  { %v3393_v25 = vadd.f32 %v3392_v52, %v3358_v1  ;;  %v3360_v60 = vmul.f32 %v3324_v49, %v3324_v49  ;;  %v14934_v4 = vsub.f32 %v14933_v2, %v14163_v23  ;;  %v14936_v21 = vsub.f32 %v14935_v3, %v14163_v23  ;;  %v14944_v52 = vld [vmem:[#allocation68_spill] sm:$0xff] }
 0x3e8   :  { %v6522_v5 = vmul.f32 %v14932_v63, %v14870_v47  ;;  %v6590_v14 = vadd.f32 %v6589_v32, %v6555_v38  ;;  %v6557_v40 = vmul.f32 %v6521_v59, %v6521_v59  ;;  %v14938_v62 = vsub.f32 %v14937_v10, %v14163_v23  ;;  %v3415_v32 = vld [vmem:[#allocation6] sm:$0x1] }
 0x3e9   :  { %v3394_v61 = vadd.f32 %v3393_v25, %v3359_v8  ;;  %v6523_v48 = vmul.f32 %v14934_v4, %v14873_v22  ;;  %v6524_v43 = vmul.f32 %v14936_v21, %v14876_v9  ;;  %v14939_v22 = vld [vmem:[#allocation58_spill] sm:$0xff]  ;;  %v14941_v9 = vld [vmem:[#allocation64_spill] sm:$0xff]  ;;  %v14945_v37 = vsub.f32 %v14944_v52, %v14163_v23 }
 0x3ea   :  { %v6591_v44 = vadd.f32 %v6590_v14, %v6556_v28  ;;  %v6558_v0 = vmul.f32 %v6522_v5, %v6522_v5  ;;  %v6525_v39 = vmul.f32 %v14938_v62, %v14879_v57  ;;  %v14940_v30 = vsub.f32 %v14939_v22, %v14163_v23  ;;  %v14946_v25 = vld [vmem:[#allocation66_spill] sm:$0xff]  ;;  %v14950_v4 = vld [vmem:[#allocation72_spill] sm:$0xff] }
 0x3eb   :  { %v3395_v36 = vadd.f32 %v3394_v61, %v3360_v60  ;;  %v6559_v15 = vmul.f32 %v6523_v48, %v6523_v48  ;;  %v6560_v55 = vmul.f32 %v6524_v43, %v6524_v43  ;;  %v14942_v24 = vsub.f32 %v14941_v9, %v14163_v23  ;;  %v14958_v22 = vld [vmem:[#allocation82_spill] sm:$0xff] }
 0x3ec   :  { %v6592_v42 = vadd.f32 %v6591_v44, %v6557_v40  ;;  %v6526_v20 = vmul.f32 %v14940_v30, %v14882_v51  ;;  %v6561_v7 = vmul.f32 %v6525_v39, %v6525_v39  ;;  %v14943_v57 = vsub.f32 %v14834_v34, %v14163_v23  ;;  %v14956_v39 = vld [vmem:[#allocation84_spill] sm:$0xff] }
 0x3ed   :  { %v3396_v47 = vrot.slane %v3395_v36, 4  ;;  %v6527_v18 = vmul.f32 %v14942_v24, %v14885_v16  ;;  %v3417_v51 = vmul.f32 %v14298_v46, %v14298_v46  ;;  %v6529_v59 = vmul.f32 %v14945_v37, %v14893_v29  ;;  %v14948_v46 = vld [vmem:[#allocation74_spill] sm:$0xff] }
 0x3ee   :  { %v6593_v54 = vadd.f32 %v6592_v42, %v6558_v0  ;;  %v6528_v35 = vmul.f32 %v14943_v57, %v14888_v50  ;;  %v6562_v33 = vmul.f32 %v6526_v20, %v6526_v20  ;;  %v14947_v34 = vsub.f32 %v14946_v25, %v14163_v23 }
 0x3ef   :  { %v3397_v53 = vadd.f32 %v3396_v47, %v3395_v36  ;;  %v6563_v16 = vmul.f32 %v6527_v18, %v6527_v18  ;;  %v3421_v28 = vmul.f32 0.0, %v3417_v51  ;;  %v14949_v14 = vsub.f32 %v14948_v46, %v14163_v23 }
 0x3f0   :  { %v6594_v6 = vadd.f32 %v6593_v54, %v6559_v15  ;;  %v6530_v50 = vmul.f32 %v14947_v34, %v14897_v41  ;;  %v6564_v56 = vmul.f32 %v6528_v35, %v6528_v35  ;;  %v6565_v61 = vmul.f32 %v6529_v59, %v6529_v59  ;;  %v14952_v41 = vld [vmem:[#allocation78_spill] sm:$0xff] }
 0x3f1   :  { %v3398_v45 = vrot.slane %v3397_v53, 2  ;;  %v6531_v60 = vmul.f32 %v14949_v14, %v14902_v11  ;;  %v14951_v48 = vsub.f32 %v14950_v4, %v14163_v23  ;;  %v14953_v3 = vsub.f32 %v14952_v41, %v14163_v23  ;;  %v14954_v11 = vld [vmem:[#allocation76_spill] sm:$0xff] }
 0x3f2   :  { %v6595_v12 = vadd.f32 %v6594_v6, %v6560_v55  ;;  %v6566_v44 = vmul.f32 %v6530_v50, %v6530_v50  ;;  %v14955_v42 = vsub.f32 %v14954_v11, %v14163_v23 }
 0x3f3   :  { %v3399_v26 = vadd.f32 %v3398_v45, %v3397_v53  ;;  %v6532_v40 = vmul.f32 %v14951_v48, %v14907_v58  ;;  %v6533_v21 = vmul.f32 %v14953_v3, %v14912_v27  ;;  %v6567_v43 = vmul.f32 %v6531_v60, %v6531_v60 }
 0x3f4   :  { %v6596_v49 = vadd.f32 %v6595_v12, %v6561_v7  ;;  %v6534_v47 = vmul.f32 %v14955_v42, %v14917_v19  ;;  %v14957_v58 = vsub.f32 %v14956_v39, %v14163_v23  ;;  %v14959_v27 = vsub.f32 %v14958_v22, %v14163_v23 }
 0x3f5   :  { %v3400_v1 = vrot.slane %v3399_v26, 1  ;;  %v6568_v10 = vmul.f32 %v6532_v40, %v6532_v40  ;;  %v6569_v54 = vmul.f32 %v6533_v21, %v6533_v21 }
 0x3f6   :  { %v6597_v38 = vadd.f32 %v6596_v49, %v6562_v33  ;;  %v6535_v15 = vmul.f32 %v14957_v58, %v14922_v13  ;;  %v6536_v30 = vmul.f32 %v14959_v27, %v14927_v31  ;;  %v6570_v20 = vmul.f32 %v6534_v47, %v6534_v47 }
 0x3f7   :  { %v3401_v8 = vadd.f32 %v3400_v1, %v3399_v26  ;;  %v6629_v13 = vmul.f32 %v14350_v17, %v14350_v17 }
 0x3f8   :  { %v6598_v63 = vadd.f32 %v6597_v38, %v6563_v16  ;;  %v6571_v6 = vmul.f32 %v6535_v15, %v6535_v15  ;;  %v6572_v9 = vmul.f32 %v6536_v30, %v6536_v30 }
 0x3f9   :  { %v3416_v5 = vadd.f32 %v3415_v32, %v3401_v8  ;;  %v6633_v23 = vmul.f32 128.0, %v6629_v13 }
 0x3fa   :  { %v6599_v29 = vadd.f32 %v6598_v63, %v6564_v56 }
 0x3fb   :  { %v3422_v2 = vadd.f32 %v3421_v28, %v3416_v5 }
 0x3fc   :  { %v6600_v36 = vadd.f32 %v6599_v29, %v6565_v61 }
 0x3fd   :  { %3423 = vst [vmem:[#allocation6] sm:$0x1] %v3422_v2 }
 0x3fe   :  { %v6601_v0 = vadd.f32 %v6600_v36, %v6566_v44 }
 0x400   :  { %v6602_v62 = vadd.f32 %v6601_v0, %v6567_v43 }
 0x402   :  { %v6603_v53 = vadd.f32 %v6602_v62, %v6568_v10 }
 0x404   :  { %v6604_v55 = vadd.f32 %v6603_v53, %v6569_v54  ;;  %v6627_v35 = vld [vmem:[#allocation6] sm:$0x1] }
 0x406   :  { %v6605_v45 = vadd.f32 %v6604_v55, %v6570_v20 }
 0x408   :  { %v6606_v19 = vadd.f32 %v6605_v45, %v6571_v6 }
 0x40a   :  { %v6607_v24 = vadd.f32 %v6606_v19, %v6572_v9 }
 0x40c   :  { %v6608_v18 = vrot.slane %v6607_v24, 4 }
 0x40e   :  { %v6609_v7 = vadd.f32 %v6608_v18, %v6607_v24 }
 0x410   :  { %v6610_v12 = vrot.slane %v6609_v7, 2 }
 0x412   :  { %v6611_v26 = vadd.f32 %v6610_v12, %v6609_v7 }
 0x414   :  { %v6612_v57 = vrot.slane %v6611_v26, 1 }
 0x416   :  { %v6613_v33 = vadd.f32 %v6612_v57, %v6611_v26 }
 0x418   :  { %v6628_v31 = vadd.f32 %v6627_v35, %v6613_v33 }
 0x41a   :  { %v6634_v49 = vadd.f32 %v6633_v23, %v6628_v31 }
 0x41c   :  { %6635 = vst [vmem:[#allocation6] sm:$0x1] %v6634_v49 }
 0x41d   :  { %10996 = shalt.err (!%p10993_p6)
}
 0x41e   :  { %s10997_s13 = scalar_lea.hbm %s14526_s5, 16 }
 0x41f   :  { %p10998_p7 = scmp.ne.s32.totalorder %s14526_s5, %s10997_s13  ;;  %p11001_p8 = scmp.lt.u32.totalorder %s10997_s13, %s14526_s5 }
 0x421   :  { %p11003_p9 = pnand %p11001_p8, %p10998_p7 }
 0x423   :  { %11006 = shalt.err (!%p11003_p9)
}
 0x424   :  { %6704 = dma.vmem_to_hbm [thread:$0]  %s6702_s9, 16, %s14526_s5, [#allocation5]  }
 0x425   :  { %11007 = dma.done.wait [#allocation3], 9216  }
 0x426   :  { %11008 = vsyncadd [#allocation3], 4294958080 }
 0x427   :  { %11009 = dma.done.wait [#allocation5], 32  }
 0x428   :  { %11010 = vsyncadd [#allocation5], 4294967264 }
 0x429   :  { %6714 = vsyncpa [#allocation3], 1 }
 0x42a   :  { %6715 = vsyncpa [#allocation5], 1 }

</bundles_post_ra>
